<compile_context>
chip_gen: v7x
topology: tpu7x:2x2x1
jax: 0.10.0
libtpu: 0.0.40
codegen_flags: <defaults>
</compile_context>

<pallas_src>
import functools

import jax
import jax.numpy as jnp
import numpy as np
from jax.experimental import pallas as pl
from jax.experimental.pallas import tpu as pltpu


def _round_up(x, m):
    return ((x + m - 1) // m) * m


# ------------------------------ Pallas kernel -----------------------------
def _decoder_kernel(emb_ref, h0_ref, c0_ref, enc_ref,
                    w0_ref, b0_ref, w1_ref, b1_ref,
                    wcat_ref, bcat_ref, wout_ref, bout_ref,
                    logp_ref, attn_ref, h_out_ref, c_out_ref,
                    h_st, c_st, *, hidden, seq_len):
    """One grid step == one decode step of the 2-layer LSTM decoder:
    fused LSTM cells -> dot attention -> concat linear + relu -> output
    linear -> log_softmax.  h/c carried across steps in VMEM scratch."""
    t = pl.program_id(0)

    # ---- init recurrent state at the first decode step ----
    @pl.when(t == 0)
    def _():
        h_st[...] = h0_ref[...]
        c_st[...] = c0_ref[...]

    x = emb_ref[0]                                    # (Bp, E) embedded token

    def lstm_cell(x_and_h, c_prev, w_ref, b_ref):
        # Single fused matmul: concat([x, h_prev]) @ [W_ih; W_hh]^T + b
        gates = (jnp.dot(x_and_h, w_ref[...],
                         preferred_element_type=jnp.float32) + b_ref[...])
        # Full-width activations: 4H == 128 lanes == one vreg; EUP slot is
        # otherwise idle, so the extra tanh/sigmoid lanes are free.
        sg = jax.nn.sigmoid(gates)
        th = jnp.tanh(gates)
        i = sg[:, 0 * hidden:1 * hidden]
        f = sg[:, 1 * hidden:2 * hidden]
        g = th[:, 2 * hidden:3 * hidden]
        o = sg[:, 3 * hidden:4 * hidden]
        c_new = f * c_prev + i * g
        h_new = o * jnp.tanh(c_new)
        return h_new, c_new

    # ---- stacked 2-layer LSTM (seq len 1) ----
    h0n, c0n = lstm_cell(jnp.concatenate([x, h_st[0]], axis=-1), c_st[0],
                         w0_ref, b0_ref)
    h1n, c1n = lstm_cell(jnp.concatenate([h0n, h_st[1]], axis=-1), c_st[1],
                         w1_ref, b1_ref)
    h_st[0] = h0n
    h_st[1] = h1n
    c_st[0] = c0n
    c_st[1] = c1n

    top = h1n                                         # (Bp, H) == embedded[0]

    # ---- Luong dot attention over (padded, masked) encoder outputs ----
    # Kept as VPU multiply + XLU reduce: the batched matrix-vector dot_general
    # form does not lower more profitably at H=32 and risks unsupported paths.
    enc = enc_ref[...]                                # (Bp, Sp, H)
    scores = jnp.sum(enc * top[:, None, :], axis=-1)  # (Bp, Sp)
    pos = jax.lax.broadcasted_iota(jnp.int32, scores.shape, 1)
    scores = jnp.where(pos < seq_len, scores, -1e30)  # mask Sp padding
    scores = scores - jnp.max(scores, axis=-1, keepdims=True)
    e = jnp.exp(scores)
    attn = e * pl.reciprocal(jnp.sum(e, axis=-1, keepdims=True), approx=False)
    attn_ref[0] = attn                                # lane-dense (Bp, Sp)
    context = jnp.sum(attn[:, :, None] * enc, axis=1)  # (Bp, H)

    # ---- concat linear + relu: one fused (Bp, 2H) @ (2H, H) matmul ----
    combined = jnp.concatenate([top, context], axis=-1)          # (Bp, 2H)
    concat = jnp.maximum(
        jnp.dot(combined, wcat_ref[...], preferred_element_type=jnp.float32)
        + bcat_ref[...], 0.0)

    # ---- output projection (V padded to 128, pad bias = -1e30) + log_softmax
    logits = (jnp.dot(concat, wout_ref[...], preferred_element_type=jnp.float32)
              + bout_ref[...])                                   # (Bp, Vp)
    z = logits - jnp.max(logits, axis=-1, keepdims=True)
    lse = jnp.log(jnp.sum(jnp.exp(z), axis=-1, keepdims=True))
    logp_ref[0] = z - lse                             # lane-dense (Bp, Vp)

    # ---- write final recurrent state once, at the last decode step ----
    @pl.when(t == pl.num_programs(0) - 1)
    def _():
        h_out_ref[...] = h_st[...]
        c_out_ref[...] = c_st[...]


# ------------------------------ wrappers ----------------------------------
@jax.jit
def decoder_forward_steps(tokens, h0, c0, encoder_outputs, params):
    """Fused teacher-forced decode of T steps (one pallas_call).
       tokens: (T, B) int32; h0, c0: (L, B, H); encoder_outputs: (S, B, H).
       Returns (log_probs (T,B,V), attn (T,B,S), h_out (L,B,H), c_out (L,B,H))."""
    T, B = tokens.shape
    L, _, H = h0.shape
    assert L == 2, "kernel is specialized to num_layers == 2"
    S = encoder_outputs.shape[0]
    E = params['embedding'].shape[1]
    V = params['w_out_t'].shape[1]

    Bp = _round_up(B, 8)        # fill all 8 sublanes of every f32 vreg
    Sp = _round_up(S, 128)      # lane-dense attention output
    Vp = _round_up(V, 128)      # lane-dense log-prob output

    # ---- glue: embedding gather (+ identity dropout), transpose, padding ----
    emb = jnp.take(params['embedding'], tokens, axis=0)           # (T, B, E)
    emb = jnp.pad(emb, ((0, 0), (0, Bp - B), (0, 0)))
    h0p = jnp.pad(h0, ((0, 0), (0, Bp - B), (0, 0)))
    c0p = jnp.pad(c0, ((0, 0), (0, Bp - B), (0, 0)))
    enc = jnp.transpose(encoder_outputs, (1, 0, 2))               # (B, S, H)
    enc = jnp.pad(enc, ((0, Bp - B), (0, Sp - S), (0, 0)))

    # ---- fused LSTM weights: one (in+H, 4H) matrix per layer ----
    w_l0 = jnp.concatenate([params['w_ih0_t'], params['w_hh0_t']], axis=0)
    w_l1 = jnp.concatenate([params['w_ih1_t'], params['w_hh1_t']], axis=0)

    # ---- lane-dense output projection: pad V, padded bias = -1e30 ----
    w_out = jnp.pad(params['w_out_t'], ((0, 0), (0, Vp - V)))
    b_out = jnp.pad(params['b_out'], ((0, 0), (0, Vp - V)),
                    constant_values=-1e30)

    kernel = functools.partial(_decoder_kernel, hidden=H, seq_len=S)

    in_specs = [
        pl.BlockSpec((1, Bp, E), lambda t: (t, 0, 0)),       # embedded tokens (per step)
        pl.BlockSpec((L, Bp, H), lambda t: (0, 0, 0)),       # h0 (resident)
        pl.BlockSpec((L, Bp, H), lambda t: (0, 0, 0)),       # c0 (resident)
        pl.BlockSpec((Bp, Sp, H), lambda t: (0, 0, 0)),      # encoder outputs (resident)
        pl.BlockSpec((E + H, 4 * H), lambda t: (0, 0)),      # fused LSTM L0 weight
        pl.BlockSpec((1, 4 * H), lambda t: (0, 0)),          # LSTM L0 bias
        pl.BlockSpec((2 * H, 4 * H), lambda t: (0, 0)),      # fused LSTM L1 weight
        pl.BlockSpec((1, 4 * H), lambda t: (0, 0)),          # LSTM L1 bias
        pl.BlockSpec((2 * H, H), lambda t: (0, 0)),          # concat weight
        pl.BlockSpec((1, H), lambda t: (0, 0)),              # concat bias
        pl.BlockSpec((H, Vp), lambda t: (0, 0)),             # out weight (V padded)
        pl.BlockSpec((1, Vp), lambda t: (0, 0)),             # out bias
    ]
    out_specs = (
        pl.BlockSpec((1, Bp, Vp), lambda t: (t, 0, 0)),      # log-probs per step
        pl.BlockSpec((1, Bp, Sp), lambda t: (t, 0, 0)),      # attention per step
        pl.BlockSpec((L, Bp, H), lambda t: (0, 0, 0)),       # final h
        pl.BlockSpec((L, Bp, H), lambda t: (0, 0, 0)),       # final c
    )
    out_shape = (
        jax.ShapeDtypeStruct((T, Bp, Vp), jnp.float32),
        jax.ShapeDtypeStruct((T, Bp, Sp), jnp.float32),
        jax.ShapeDtypeStruct((L, Bp, H), jnp.float32),
        jax.ShapeDtypeStruct((L, Bp, H), jnp.float32),
    )

    logp, attn_w, h_out, c_out = pl.pallas_call(
        kernel,
        grid=(T,),
        in_specs=in_specs,
        out_specs=out_specs,
        out_shape=out_shape,
        scratch_shapes=[pltpu.VMEM((L, Bp, H), jnp.float32),   # h state carry
                        pltpu.VMEM((L, Bp, H), jnp.float32)],  # c state carry
        compiler_params=pltpu.CompilerParams(
            dimension_semantics=("arbitrary",)),               # sequential state carry
    )(emb, h0p, c0p, enc,
      w_l0, params['b0'], w_l1, params['b1'],
      params['w_concat_t'], params['b_concat'], w_out, b_out)

    return (logp[:, :B, :V], attn_w[:, :B, :S],
            h_out[:, :B, :], c_out[:, :B, :])


@jax.jit
def decoder_forward(inputs, h0, c0, encoder_outputs, params):
    """Single-step API matching Decoder.forward: inputs (B,) int32."""
    logp, attn_w, h_out, c_out = decoder_forward_steps(
        inputs[None, :], h0, c0, encoder_outputs, params)
    return logp[0], (h_out, c_out), attn_w[0]


# --------------------------- pure-JAX reference ---------------------------
def decoder_step_reference(token, h, c, encoder_outputs, params, H):
    emb = params['embedding'][token]                              # (B, E)

    def cell(x, hp, cp, wih_t, whh_t, b):
        g = x @ wih_t + hp @ whh_t + b
        i = jax.nn.sigmoid(g[:, 0 * H:1 * H])
        f = jax.nn.sigmoid(g[:, 1 * H:2 * H])
        gg = jnp.tanh(g[:, 2 * H:3 * H])
        o = jax.nn.sigmoid(g[:, 3 * H:4 * H])
        cn = f * cp + i * gg
        return o * jnp.tanh(cn), cn

    h0n, c0n = cell(emb, h[0], c[0], params['w_ih0_t'], params['w_hh0_t'], params['b0'])
    h1n, c1n = cell(h0n, h[1], c[1], params['w_ih1_t'], params['w_hh1_t'], params['b1'])
    top = h1n
    enc_b = jnp.transpose(encoder_outputs, (1, 0, 2))
    scores = jnp.einsum('bsh,bh->bs', enc_b, top)
    attn = jax.nn.softmax(scores, axis=-1)
    ctx = jnp.einsum('bs,bsh->bh', attn, enc_b)
    combined = jnp.concatenate([top, ctx], axis=1)
    concat = jax.nn.relu(combined @ params['w_concat_t'] + params['b_concat'])
    logits = concat @ params['w_out_t'] + params['b_out']
    return (jax.nn.log_softmax(logits, axis=1),
            (jnp.stack([h0n, h1n]), jnp.stack([c0n, c1n])), attn)


# --------------------------------- main -----------------------------------
if __name__ == "__main__":
    B = 2      # batch
    E = 16     # embedding_size
    H = 32     # hidden_size
    S = 8      # encoder sequence length
    V = 64     # output_size (vocab)
    L = 2      # num_layers
    T = 4      # fused decode steps (teacher-forced)

    root = jax.random.PRNGKey(0)

    def init(k, shape, scale=0.1):
        return (scale * jax.random.normal(k, shape)).astype(jnp.float32)

    ks = jax.random.split(root, 16)
    params = {
        'embedding':  init(ks[0], (V, E)),
        # LSTM layer 0 (PyTorch stores (4H, in); we pass transposed, biases fused)
        'w_ih0_t':    init(ks[1], (E, 4 * H)),
        'w_hh0_t':    init(ks[2], (H, 4 * H)),
        'b0':         init(ks[3], (1, 4 * H)),
        # LSTM layer 1
        'w_ih1_t':    init(ks[4], (H, 4 * H)),
        'w_hh1_t':    init(ks[5], (H, 4 * H)),
        'b1':         init(ks[6], (1, 4 * H)),
        # concat Linear: (H, 2H) in torch -> transposed (2H, H)
        'w_concat_t': init(ks[7], (2 * H, H)),
        'b_concat':   init(ks[8], (1, H)),
        # out Linear: (V, H) in torch -> transposed (H, V)
        'w_out_t':    init(ks[9], (H, V)),
        'b_out':      init(ks[10], (1, V)),
    }

    tokens = jax.random.randint(ks[11], (T, B), 0, V, dtype=jnp.int32)
    h0 = init(ks[12], (L, B, H), scale=0.5)
    c0 = init(ks[13], (L, B, H), scale=0.5)
    encoder_outputs = init(ks[14], (S, B, H), scale=0.5)

    # fused multi-step decode: one pallas_call for all T steps
    logp, attn_w, h_out, c_out = decoder_forward_steps(
        tokens, h0, c0, encoder_outputs, params)
    jax.block_until_ready((logp, attn_w, h_out, c_out))

    # reference: T sequential applications of the single-step decoder
    h, c = h0, c0
    ref_logp, ref_attn = [], []
    for t in range(T):
        lp, (h, c), aw = decoder_step_reference(tokens[t], h, c,
                                                encoder_outputs, params, H)
        ref_logp.append(lp)
        ref_attn.append(aw)
    ref_logp = jnp.stack(ref_logp)
    ref_attn = jnp.stack(ref_attn)

    np.testing.assert_allclose(np.asarray(logp), np.asarray(ref_logp), atol=1e-4, rtol=1e-4)
    np.testing.assert_allclose(np.asarray(attn_w), np.asarray(ref_attn), atol=1e-4, rtol=1e-4)
    np.testing.assert_allclose(np.asarray(h_out), np.asarray(h), atol=1e-4, rtol=1e-4)
    np.testing.assert_allclose(np.asarray(c_out), np.asarray(c), atol=1e-4, rtol=1e-4)

    # single-step API (exact Decoder.forward semantics)
    lp1, (h1, c1), aw1 = decoder_forward(tokens[0], h0, c0, encoder_outputs, params)
    jax.block_until_ready((lp1, h1, c1, aw1))
    r_lp1, (r_h1, r_c1), r_aw1 = decoder_step_reference(tokens[0], h0, c0,
                                                        encoder_outputs, params, H)
    np.testing.assert_allclose(np.asarray(lp1), np.asarray(r_lp1), atol=1e-4, rtol=1e-4)
    np.testing.assert_allclose(np.asarray(aw1), np.asarray(r_aw1), atol=1e-4, rtol=1e-4)
    np.testing.assert_allclose(np.asarray(h1), np.asarray(r_h1), atol=1e-4, rtol=1e-4)
    np.testing.assert_allclose(np.asarray(c1), np.asarray(r_c1), atol=1e-4, rtol=1e-4)

    assert logp.shape == (T, B, V) and attn_w.shape == (T, B, S)
    assert h_out.shape == (L, B, H) and c_out.shape == (L, B, H)
    assert lp1.shape == (B, V) and aw1.shape == (B, S)

    print("KERNEL_OK")
</pallas_src>

<mosaic_0001>
module attributes {stable_mosaic.version = 11 : i64} {
  func.func @_decoder_kernel(%arg0: i32, %arg1: memref<1x8x16xf32, #tpu.memory_space<vmem>>, %arg2: memref<2x8x32xf32, #tpu.memory_space<vmem>>, %arg3: memref<2x8x32xf32, #tpu.memory_space<vmem>>, %arg4: memref<8x128x32xf32, #tpu.memory_space<vmem>>, %arg5: memref<48x128xf32, #tpu.memory_space<vmem>>, %arg6: memref<1x128xf32, #tpu.memory_space<vmem>>, %arg7: memref<64x128xf32, #tpu.memory_space<vmem>>, %arg8: memref<1x128xf32, #tpu.memory_space<vmem>>, %arg9: memref<64x32xf32, #tpu.memory_space<vmem>>, %arg10: memref<1x32xf32, #tpu.memory_space<vmem>>, %arg11: memref<32x128xf32, #tpu.memory_space<vmem>>, %arg12: memref<1x128xf32, #tpu.memory_space<vmem>>, %arg13: memref<1x8x128xf32, #tpu.memory_space<vmem>>, %arg14: memref<1x8x128xf32, #tpu.memory_space<vmem>>, %arg15: memref<2x8x32xf32, #tpu.memory_space<vmem>>, %arg16: memref<2x8x32xf32, #tpu.memory_space<vmem>>, %arg17: memref<2x8x32xf32, #tpu.memory_space<vmem>>, %arg18: memref<2x8x32xf32, #tpu.memory_space<vmem>>) attributes {dimension_semantics = [#tpu.dimension_semantics<arbitrary>], iteration_bounds = array<i64: 4>, scalar_prefetch = 0 : i64, scratch_operands = 2 : i64, tpu.core_type = #tpu.core_type<tc>, window_params = [{transform_indices = @transform_0, window_bounds = array<i64: 1, 8, 16>}, {pipeline_mode = #tpu.pipeline_mode<synchronous>, transform_indices = @transform_1, window_bounds = array<i64: 2, 8, 32>}, {pipeline_mode = #tpu.pipeline_mode<synchronous>, transform_indices = @transform_2, window_bounds = array<i64: 2, 8, 32>}, {pipeline_mode = #tpu.pipeline_mode<synchronous>, transform_indices = @transform_3, window_bounds = array<i64: 8, 128, 32>}, {pipeline_mode = #tpu.pipeline_mode<synchronous>, transform_indices = @transform_4, window_bounds = array<i64: 48, 128>}, {pipeline_mode = #tpu.pipeline_mode<synchronous>, transform_indices = @transform_5, window_bounds = array<i64: 1, 128>}, {pipeline_mode = #tpu.pipeline_mode<synchronous>, transform_indices = @transform_6, window_bounds = array<i64: 64, 128>}, {pipeline_mode = #tpu.pipeline_mode<synchronous>, transform_indices = @transform_7, window_bounds = array<i64: 1, 128>}, {pipeline_mode = #tpu.pipeline_mode<synchronous>, transform_indices = @transform_8, window_bounds = array<i64: 64, 32>}, {pipeline_mode = #tpu.pipeline_mode<synchronous>, transform_indices = @transform_9, window_bounds = array<i64: 1, 32>}, {pipeline_mode = #tpu.pipeline_mode<synchronous>, transform_indices = @transform_10, window_bounds = array<i64: 32, 128>}, {pipeline_mode = #tpu.pipeline_mode<synchronous>, transform_indices = @transform_11, window_bounds = array<i64: 1, 128>}, {transform_indices = @transform_12, window_bounds = array<i64: 1, 8, 128>}, {transform_indices = @transform_13, window_bounds = array<i64: 1, 8, 128>}, {pipeline_mode = #tpu.pipeline_mode<synchronous>, transform_indices = @transform_14, window_bounds = array<i64: 2, 8, 32>}, {pipeline_mode = #tpu.pipeline_mode<synchronous>, transform_indices = @transform_15, window_bounds = array<i64: 2, 8, 32>}]} {
    %c0_i32 = arith.constant 0 : i32
    %0 = arith.cmpi eq, %arg0, %c0_i32 : i32
    %1 = arith.extui %0 : i1 to i32
    %c0_i32_0 = arith.constant 0 : i32
    %2 = arith.cmpi ne, %1, %c0_i32_0 : i32
    scf.if %2 {
      %c0_65 = arith.constant 0 : index
      %c0_66 = arith.constant 0 : index
      %c0_67 = arith.constant 0 : index
      %123 = vector.load %arg2[%c0_65, %c0_66, %c0_67] : memref<2x8x32xf32, #tpu.memory_space<vmem>>, vector<2x8x32xf32>
      %c0_68 = arith.constant 0 : index
      %c0_69 = arith.constant 0 : index
      %c0_70 = arith.constant 0 : index
      %124 = vector.load %arg17[%c0_68, %c0_69, %c0_70] : memref<2x8x32xf32, #tpu.memory_space<vmem>>, vector<2x8x32xf32>
      tpu.vector_store %arg17[%c0_68, %c0_69, %c0_70], %123 {strides = array<i32>} : memref<2x8x32xf32, #tpu.memory_space<vmem>>, vector<2x8x32xf32>,
      %c0_71 = arith.constant 0 : index
      %c0_72 = arith.constant 0 : index
      %c0_73 = arith.constant 0 : index
      %125 = vector.load %arg3[%c0_71, %c0_72, %c0_73] : memref<2x8x32xf32, #tpu.memory_space<vmem>>, vector<2x8x32xf32>
      %c0_74 = arith.constant 0 : index
      %c0_75 = arith.constant 0 : index
      %c0_76 = arith.constant 0 : index
      %126 = vector.load %arg18[%c0_74, %c0_75, %c0_76] : memref<2x8x32xf32, #tpu.memory_space<vmem>>, vector<2x8x32xf32>
      tpu.vector_store %arg18[%c0_74, %c0_75, %c0_76], %125 {strides = array<i32>} : memref<2x8x32xf32, #tpu.memory_space<vmem>>, vector<2x8x32xf32>,
    } else {
    }
    %c0 = arith.constant 0 : index
    %c0_1 = arith.constant 0 : index
    %c0_2 = arith.constant 0 : index
    %3 = vector.load %arg1[%c0, %c0_1, %c0_2] : memref<1x8x16xf32, #tpu.memory_space<vmem>>, vector<1x8x16xf32>
    %4 = vector.shape_cast %3 : vector<1x8x16xf32> to vector<8x16xf32>
    %c0_3 = arith.constant 0 : index
    %c0_4 = arith.constant 0 : index
    %c0_5 = arith.constant 0 : index
    %5 = vector.load %arg17[%c0_3, %c0_4, %c0_5] : memref<2x8x32xf32, #tpu.memory_space<vmem>>, vector<1x8x32xf32>
    %6 = vector.shape_cast %5 : vector<1x8x32xf32> to vector<8x32xf32>
    %7 = tpu.concatenate %4, %6 in 1 : vector<8x16xf32>, vector<8x32xf32> -> vector<8x48xf32>
    %c0_6 = arith.constant 0 : index
    %c0_7 = arith.constant 0 : index
    %c0_8 = arith.constant 0 : index
    %8 = vector.load %arg18[%c0_6, %c0_7, %c0_8] : memref<2x8x32xf32, #tpu.memory_space<vmem>>, vector<1x8x32xf32>
    %9 = vector.shape_cast %8 : vector<1x8x32xf32> to vector<8x32xf32>
    %c0_9 = arith.constant 0 : index
    %c0_10 = arith.constant 0 : index
    %10 = vector.load %arg5[%c0_9, %c0_10] : memref<48x128xf32, #tpu.memory_space<vmem>>, vector<48x128xf32>
    %cst = arith.constant dense<0.000000e+00> : vector<8x128xf32>
    %11 = tpu.matmul %7, %10, %cst {dimension_numbers = #tpu.dot_dimension_numbers<[1], [0], [0], [1], [0, 0, 1, 1], [], []>} : vector<8x48xf32>, vector<48x128xf32>, vector<8x128xf32> -> vector<8x128xf32>
    %c0_11 = arith.constant 0 : index
    %c0_12 = arith.constant 0 : index
    %12 = vector.load %arg6[%c0_11, %c0_12] : memref<1x128xf32, #tpu.memory_space<vmem>>, vector<1x128xf32>
    %13 = vector.broadcast %12 : vector<1x128xf32> to vector<8x128xf32>
    %14 = arith.addf %11, %13 : vector<8x128xf32>
    %15 = arith.negf %14 : vector<8x128xf32>
    %16 = math.exp %15 : vector<8x128xf32>
    %cst_13 = arith.constant 1.000000e+00 : f32
    %17 = vector.broadcast %cst_13 : f32 to vector<8x128xf32>
    %18 = arith.addf %17, %16 : vector<8x128xf32>
    %19 = arith.divf %17, %18 : vector<8x128xf32>
    %20 = math.tanh %14 : vector<8x128xf32>
    %21 = vector.extract_strided_slice %19 {offsets = [0, 0], sizes = [8, 32], strides = [1, 1]} : vector<8x128xf32> to vector<8x32xf32>
    %22 = vector.extract_strided_slice %19 {offsets = [0, 32], sizes = [8, 32], strides = [1, 1]} : vector<8x128xf32> to vector<8x32xf32>
    %23 = vector.extract_strided_slice %20 {offsets = [0, 64], sizes = [8, 32], strides = [1, 1]} : vector<8x128xf32> to vector<8x32xf32>
    %24 = vector.extract_strided_slice %19 {offsets = [0, 96], sizes = [8, 32], strides = [1, 1]} : vector<8x128xf32> to vector<8x32xf32>
    %25 = arith.mulf %22, %9 : vector<8x32xf32>
    %26 = arith.mulf %21, %23 : vector<8x32xf32>
    %27 = arith.addf %25, %26 : vector<8x32xf32>
    %28 = math.tanh %27 : vector<8x32xf32>
    %29 = arith.mulf %24, %28 : vector<8x32xf32>
    %c1 = arith.constant 1 : index
    %c0_14 = arith.constant 0 : index
    %c0_15 = arith.constant 0 : index
    %30 = vector.load %arg17[%c1, %c0_14, %c0_15] : memref<2x8x32xf32, #tpu.memory_space<vmem>>, vector<1x8x32xf32>
    %31 = vector.shape_cast %30 : vector<1x8x32xf32> to vector<8x32xf32>
    %32 = tpu.concatenate %29, %31 in 1 : vector<8x32xf32>, vector<8x32xf32> -> vector<8x64xf32>
    %c1_16 = arith.constant 1 : index
    %c0_17 = arith.constant 0 : index
    %c0_18 = arith.constant 0 : index
    %33 = vector.load %arg18[%c1_16, %c0_17, %c0_18] : memref<2x8x32xf32, #tpu.memory_space<vmem>>, vector<1x8x32xf32>
    %34 = vector.shape_cast %33 : vector<1x8x32xf32> to vector<8x32xf32>
    %c0_19 = arith.constant 0 : index
    %c0_20 = arith.constant 0 : index
    %35 = vector.load %arg7[%c0_19, %c0_20] : memref<64x128xf32, #tpu.memory_space<vmem>>, vector<64x128xf32>
    %cst_21 = arith.constant dense<0.000000e+00> : vector<8x128xf32>
    %36 = tpu.matmul %32, %35, %cst_21 {dimension_numbers = #tpu.dot_dimension_numbers<[1], [0], [0], [1], [0, 0, 1, 1], [], []>} : vector<8x64xf32>, vector<64x128xf32>, vector<8x128xf32> -> vector<8x128xf32>
    %c0_22 = arith.constant 0 : index
    %c0_23 = arith.constant 0 : index
    %37 = vector.load %arg8[%c0_22, %c0_23] : memref<1x128xf32, #tpu.memory_space<vmem>>, vector<1x128xf32>
    %38 = vector.broadcast %37 : vector<1x128xf32> to vector<8x128xf32>
    %39 = arith.addf %36, %38 : vector<8x128xf32>
    %40 = arith.negf %39 : vector<8x128xf32>
    %41 = math.exp %40 : vector<8x128xf32>
    %cst_24 = arith.constant 1.000000e+00 : f32
    %42 = vector.broadcast %cst_24 : f32 to vector<8x128xf32>
    %43 = arith.addf %42, %41 : vector<8x128xf32>
    %44 = arith.divf %42, %43 : vector<8x128xf32>
    %45 = math.tanh %39 : vector<8x128xf32>
    %46 = vector.extract_strided_slice %44 {offsets = [0, 0], sizes = [8, 32], strides = [1, 1]} : vector<8x128xf32> to vector<8x32xf32>
    %47 = vector.extract_strided_slice %44 {offsets = [0, 32], sizes = [8, 32], strides = [1, 1]} : vector<8x128xf32> to vector<8x32xf32>
    %48 = vector.extract_strided_slice %45 {offsets = [0, 64], sizes = [8, 32], strides = [1, 1]} : vector<8x128xf32> to vector<8x32xf32>
    %49 = vector.extract_strided_slice %44 {offsets = [0, 96], sizes = [8, 32], strides = [1, 1]} : vector<8x128xf32> to vector<8x32xf32>
    %50 = arith.mulf %47, %34 : vector<8x32xf32>
    %51 = arith.mulf %46, %48 : vector<8x32xf32>
    %52 = arith.addf %50, %51 : vector<8x32xf32>
    %53 = math.tanh %52 : vector<8x32xf32>
    %54 = arith.mulf %49, %53 : vector<8x32xf32>
    %c0_25 = arith.constant 0 : index
    %c0_26 = arith.constant 0 : index
    %c0_27 = arith.constant 0 : index
    %55 = vector.load %arg17[%c0_25, %c0_26, %c0_27] : memref<2x8x32xf32, #tpu.memory_space<vmem>>, vector<1x8x32xf32>
    %56 = vector.shape_cast %55 : vector<1x8x32xf32> to vector<8x32xf32>
    %57 = vector.shape_cast %29 : vector<8x32xf32> to vector<1x8x32xf32>
    tpu.vector_store %arg17[%c0_25, %c0_26, %c0_27], %57 {strides = array<i32>} : memref<2x8x32xf32, #tpu.memory_space<vmem>>, vector<1x8x32xf32>,
    %c1_28 = arith.constant 1 : index
    %c0_29 = arith.constant 0 : index
    %c0_30 = arith.constant 0 : index
    %58 = vector.load %arg17[%c1_28, %c0_29, %c0_30] : memref<2x8x32xf32, #tpu.memory_space<vmem>>, vector<1x8x32xf32>
    %59 = vector.shape_cast %58 : vector<1x8x32xf32> to vector<8x32xf32>
    %60 = vector.shape_cast %54 : vector<8x32xf32> to vector<1x8x32xf32>
    tpu.vector_store %arg17[%c1_28, %c0_29, %c0_30], %60 {strides = array<i32>} : memref<2x8x32xf32, #tpu.memory_space<vmem>>, vector<1x8x32xf32>,
    %c0_31 = arith.constant 0 : index
    %c0_32 = arith.constant 0 : index
    %c0_33 = arith.constant 0 : index
    %61 = vector.load %arg18[%c0_31, %c0_32, %c0_33] : memref<2x8x32xf32, #tpu.memory_space<vmem>>, vector<1x8x32xf32>
    %62 = vector.shape_cast %61 : vector<1x8x32xf32> to vector<8x32xf32>
    %63 = vector.shape_cast %27 : vector<8x32xf32> to vector<1x8x32xf32>
    tpu.vector_store %arg18[%c0_31, %c0_32, %c0_33], %63 {strides = array<i32>} : memref<2x8x32xf32, #tpu.memory_space<vmem>>, vector<1x8x32xf32>,
    %c1_34 = arith.constant 1 : index
    %c0_35 = arith.constant 0 : index
    %c0_36 = arith.constant 0 : index
    %64 = vector.load %arg18[%c1_34, %c0_35, %c0_36] : memref<2x8x32xf32, #tpu.memory_space<vmem>>, vector<1x8x32xf32>
    %65 = vector.shape_cast %64 : vector<1x8x32xf32> to vector<8x32xf32>
    %66 = vector.shape_cast %52 : vector<8x32xf32> to vector<1x8x32xf32>
    tpu.vector_store %arg18[%c1_34, %c0_35, %c0_36], %66 {strides = array<i32>} : memref<2x8x32xf32, #tpu.memory_space<vmem>>, vector<1x8x32xf32>,
    %c0_37 = arith.constant 0 : index
    %c0_38 = arith.constant 0 : index
    %c0_39 = arith.constant 0 : index
    %67 = vector.load %arg4[%c0_37, %c0_38, %c0_39] : memref<8x128x32xf32, #tpu.memory_space<vmem>>, vector<8x128x32xf32>
    %68 = vector.shape_cast %54 : vector<8x32xf32> to vector<8x1x32xf32>
    %69 = vector.broadcast %68 : vector<8x1x32xf32> to vector<8x128x32xf32>
    %70 = arith.mulf %67, %69 : vector<8x128x32xf32>
    %cst_40 = arith.constant dense<0.000000e+00> : vector<8x128xf32>
    %71 = vector.multi_reduction <add>, %70, %cst_40 [2] : vector<8x128x32xf32> to vector<8x128xf32>
    %72 = tpu.iota {dimensions = array<i32: 1>} : vector<8x128xi32>
    %c8_i32 = arith.constant 8 : i32
    %73 = vector.broadcast %c8_i32 : i32 to vector<8x128xi32>
    %74 = arith.cmpi slt, %72, %73 : vector<8x128xi32>
    %cst_41 = arith.constant -1.000000e+30 : f32
    %75 = vector.broadcast %cst_41 : f32 to vector<8x128xf32>
    %76 = arith.select %74, %71, %75 : vector<8x128xi1>, vector<8x128xf32>
    %cst_42 = arith.constant dense<0xFF800000> : vector<8xf32>
    %77 = vector.multi_reduction <maximumf>, %76, %cst_42 [1] : vector<8x128xf32> to vector<8xf32>
    %78 = vector.shape_cast %77 : vector<8xf32> to vector<8x1xf32>
    %79 = vector.broadcast %78 : vector<8x1xf32> to vector<8x128xf32>
    %80 = arith.subf %76, %79 : vector<8x128xf32>
    %81 = math.exp %80 : vector<8x128xf32>
    %cst_43 = arith.constant dense<0.000000e+00> : vector<8xf32>
    %82 = vector.multi_reduction <add>, %81, %cst_43 [1] : vector<8x128xf32> to vector<8xf32>
    %83 = vector.shape_cast %82 : vector<8xf32> to vector<8x1xf32>
    %84 = tpu.reciprocal %83 : vector<8x1xf32> -> vector<8x1xf32>
    %85 = vector.broadcast %84 : vector<8x1xf32> to vector<8x128xf32>
    %86 = arith.mulf %81, %85 : vector<8x128xf32>
    %c0_44 = arith.constant 0 : index
    %c0_45 = arith.constant 0 : index
    %c0_46 = arith.constant 0 : index
    %87 = vector.load %arg14[%c0_44, %c0_45, %c0_46] : memref<1x8x128xf32, #tpu.memory_space<vmem>>, vector<1x8x128xf32>
    %88 = vector.shape_cast %87 : vector<1x8x128xf32> to vector<8x128xf32>
    %89 = vector.shape_cast %86 : vector<8x128xf32> to vector<1x8x128xf32>
    tpu.vector_store %arg14[%c0_44, %c0_45, %c0_46], %89 {strides = array<i32>} : memref<1x8x128xf32, #tpu.memory_space<vmem>>, vector<1x8x128xf32>,
    %90 = vector.shape_cast %86 : vector<8x128xf32> to vector<8x128x1xf32>
    %91 = vector.broadcast %90 : vector<8x128x1xf32> to vector<8x128x32xf32>
    %92 = arith.mulf %91, %67 : vector<8x128x32xf32>
    %cst_47 = arith.constant dense<0.000000e+00> : vector<8x32xf32>
    %93 = vector.multi_reduction <add>, %92, %cst_47 [1] : vector<8x128x32xf32> to vector<8x32xf32>
    %94 = tpu.concatenate %54, %93 in 1 : vector<8x32xf32>, vector<8x32xf32> -> vector<8x64xf32>
    %c0_48 = arith.constant 0 : index
    %c0_49 = arith.constant 0 : index
    %95 = vector.load %arg9[%c0_48, %c0_49] : memref<64x32xf32, #tpu.memory_space<vmem>>, vector<64x32xf32>
    %cst_50 = arith.constant dense<0.000000e+00> : vector<8x32xf32>
    %96 = tpu.matmul %94, %95, %cst_50 {dimension_numbers = #tpu.dot_dimension_numbers<[1], [0], [0], [1], [0, 0, 1, 1], [], []>} : vector<8x64xf32>, vector<64x32xf32>, vector<8x32xf32> -> vector<8x32xf32>
    %c0_51 = arith.constant 0 : index
    %c0_52 = arith.constant 0 : index
    %97 = vector.load %arg10[%c0_51, %c0_52] : memref<1x32xf32, #tpu.memory_space<vmem>>, vector<1x32xf32>
    %98 = vector.broadcast %97 : vector<1x32xf32> to vector<8x32xf32>
    %99 = arith.addf %96, %98 : vector<8x32xf32>
    %cst_53 = arith.constant 0.000000e+00 : f32
    %100 = vector.broadcast %cst_53 : f32 to vector<8x32xf32>
    %101 = arith.maximumf %99, %100 : vector<8x32xf32>
    %c0_54 = arith.constant 0 : index
    %c0_55 = arith.constant 0 : index
    %102 = vector.load %arg11[%c0_54, %c0_55] : memref<32x128xf32, #tpu.memory_space<vmem>>, vector<32x128xf32>
    %cst_56 = arith.constant dense<0.000000e+00> : vector<8x128xf32>
    %103 = tpu.matmul %101, %102, %cst_56 {dimension_numbers = #tpu.dot_dimension_numbers<[1], [0], [0], [1], [0, 0, 1, 1], [], []>} : vector<8x32xf32>, vector<32x128xf32>, vector<8x128xf32> -> vector<8x128xf32>
    %c0_57 = arith.constant 0 : index
    %c0_58 = arith.constant 0 : index
    %104 = vector.load %arg12[%c0_57, %c0_58] : memref<1x128xf32, #tpu.memory_space<vmem>>, vector<1x128xf32>
    %105 = vector.broadcast %104 : vector<1x128xf32> to vector<8x128xf32>
    %106 = arith.addf %103, %105 : vector<8x128xf32>
    %cst_59 = arith.constant dense<0xFF800000> : vector<8xf32>
    %107 = vector.multi_reduction <maximumf>, %106, %cst_59 [1] : vector<8x128xf32> to vector<8xf32>
    %108 = vector.shape_cast %107 : vector<8xf32> to vector<8x1xf32>
    %109 = vector.broadcast %108 : vector<8x1xf32> to vector<8x128xf32>
    %110 = arith.subf %106, %109 : vector<8x128xf32>
    %111 = math.exp %110 : vector<8x128xf32>
    %cst_60 = arith.constant dense<0.000000e+00> : vector<8xf32>
    %112 = vector.multi_reduction <add>, %111, %cst_60 [1] : vector<8x128xf32> to vector<8xf32>
    %113 = vector.shape_cast %112 : vector<8xf32> to vector<8x1xf32>
    %114 = math.log %113 : vector<8x1xf32>
    %115 = vector.broadcast %114 : vector<8x1xf32> to vector<8x128xf32>
    %116 = arith.subf %110, %115 : vector<8x128xf32>
    %c0_61 = arith.constant 0 : index
    %c0_62 = arith.constant 0 : index
    %c0_63 = arith.constant 0 : index
    %117 = vector.load %arg13[%c0_61, %c0_62, %c0_63] : memref<1x8x128xf32, #tpu.memory_space<vmem>>, vector<1x8x128xf32>
    %118 = vector.shape_cast %117 : vector<1x8x128xf32> to vector<8x128xf32>
    %119 = vector.shape_cast %116 : vector<8x128xf32> to vector<1x8x128xf32>
    tpu.vector_store %arg13[%c0_61, %c0_62, %c0_63], %119 {strides = array<i32>} : memref<1x8x128xf32, #tpu.memory_space<vmem>>, vector<1x8x128xf32>,
    %c3_i32 = arith.constant 3 : i32
    %120 = arith.cmpi eq, %arg0, %c3_i32 : i32
    %121 = arith.extui %120 : i1 to i32
    %c0_i32_64 = arith.constant 0 : i32
    %122 = arith.cmpi ne, %121, %c0_i32_64 : i32
    scf.if %122 {
      %c0_65 = arith.constant 0 : index
      %c0_66 = arith.constant 0 : index
      %c0_67 = arith.constant 0 : index
      %123 = vector.load %arg17[%c0_65, %c0_66, %c0_67] : memref<2x8x32xf32, #tpu.memory_space<vmem>>, vector<2x8x32xf32>
      %c0_68 = arith.constant 0 : index
      %c0_69 = arith.constant 0 : index
      %c0_70 = arith.constant 0 : index
      %124 = vector.load %arg15[%c0_68, %c0_69, %c0_70] : memref<2x8x32xf32, #tpu.memory_space<vmem>>, vector<2x8x32xf32>
      tpu.vector_store %arg15[%c0_68, %c0_69, %c0_70], %123 {strides = array<i32>} : memref<2x8x32xf32, #tpu.memory_space<vmem>>, vector<2x8x32xf32>,
      %c0_71 = arith.constant 0 : index
      %c0_72 = arith.constant 0 : index
      %c0_73 = arith.constant 0 : index
      %125 = vector.load %arg18[%c0_71, %c0_72, %c0_73] : memref<2x8x32xf32, #tpu.memory_space<vmem>>, vector<2x8x32xf32>
      %c0_74 = arith.constant 0 : index
      %c0_75 = arith.constant 0 : index
      %c0_76 = arith.constant 0 : index
      %126 = vector.load %arg16[%c0_74, %c0_75, %c0_76] : memref<2x8x32xf32, #tpu.memory_space<vmem>>, vector<2x8x32xf32>
      tpu.vector_store %arg16[%c0_74, %c0_75, %c0_76], %125 {strides = array<i32>} : memref<2x8x32xf32, #tpu.memory_space<vmem>>, vector<2x8x32xf32>,
    } else {
    }
    return
  }
  func.func @transform_0(%arg0: i32) -> (i32, i32, i32) {
    %c0_i32 = arith.constant 0 : i32
    %c0_i32_0 = arith.constant 0 : i32
    %c0_i32_1 = arith.constant 0 : i32
    return %arg0, %c0_i32, %c0_i32_0 : i32, i32, i32
  }
  func.func @transform_1(%arg0: i32) -> (i32, i32, i32) {
    %c0_i32 = arith.constant 0 : i32
    %c0_i32_0 = arith.constant 0 : i32
    %c0_i32_1 = arith.constant 0 : i32
    %c0_i32_2 = arith.constant 0 : i32
    return %c0_i32, %c0_i32_0, %c0_i32_1 : i32, i32, i32
  }
  func.func @transform_2(%arg0: i32) -> (i32, i32, i32) {
    %c0_i32 = arith.constant 0 : i32
    %c0_i32_0 = arith.constant 0 : i32
    %c0_i32_1 = arith.constant 0 : i32
    %c0_i32_2 = arith.constant 0 : i32
    return %c0_i32, %c0_i32_0, %c0_i32_1 : i32, i32, i32
  }
  func.func @transform_3(%arg0: i32) -> (i32, i32, i32) {
    %c0_i32 = arith.constant 0 : i32
    %c0_i32_0 = arith.constant 0 : i32
    %c0_i32_1 = arith.constant 0 : i32
    %c0_i32_2 = arith.constant 0 : i32
    return %c0_i32, %c0_i32_0, %c0_i32_1 : i32, i32, i32
  }
  func.func @transform_4(%arg0: i32) -> (i32, i32) {
    %c0_i32 = arith.constant 0 : i32
    %c0_i32_0 = arith.constant 0 : i32
    %c0_i32_1 = arith.constant 0 : i32
    return %c0_i32, %c0_i32_0 : i32, i32
  }
  func.func @transform_5(%arg0: i32) -> (i32, i32) {
    %c0_i32 = arith.constant 0 : i32
    %c0_i32_0 = arith.constant 0 : i32
    %c0_i32_1 = arith.constant 0 : i32
    return %c0_i32, %c0_i32_0 : i32, i32
  }
  func.func @transform_6(%arg0: i32) -> (i32, i32) {
    %c0_i32 = arith.constant 0 : i32
    %c0_i32_0 = arith.constant 0 : i32
    %c0_i32_1 = arith.constant 0 : i32
    return %c0_i32, %c0_i32_0 : i32, i32
  }
  func.func @transform_7(%arg0: i32) -> (i32, i32) {
    %c0_i32 = arith.constant 0 : i32
    %c0_i32_0 = arith.constant 0 : i32
    %c0_i32_1 = arith.constant 0 : i32
    return %c0_i32, %c0_i32_0 : i32, i32
  }
  func.func @transform_8(%arg0: i32) -> (i32, i32) {
    %c0_i32 = arith.constant 0 : i32
    %c0_i32_0 = arith.constant 0 : i32
    %c0_i32_1 = arith.constant 0 : i32
    return %c0_i32, %c0_i32_0 : i32, i32
  }
  func.func @transform_9(%arg0: i32) -> (i32, i32) {
    %c0_i32 = arith.constant 0 : i32
    %c0_i32_0 = arith.constant 0 : i32
    %c0_i32_1 = arith.constant 0 : i32
    return %c0_i32, %c0_i32_0 : i32, i32
  }
  func.func @transform_10(%arg0: i32) -> (i32, i32) {
    %c0_i32 = arith.constant 0 : i32
    %c0_i32_0 = arith.constant 0 : i32
    %c0_i32_1 = arith.constant 0 : i32
    return %c0_i32, %c0_i32_0 : i32, i32
  }
  func.func @transform_11(%arg0: i32) -> (i32, i32) {
    %c0_i32 = arith.constant 0 : i32
    %c0_i32_0 = arith.constant 0 : i32
    %c0_i32_1 = arith.constant 0 : i32
    return %c0_i32, %c0_i32_0 : i32, i32
  }
  func.func @transform_12(%arg0: i32) -> (i32, i32, i32) {
    %c0_i32 = arith.constant 0 : i32
    %c0_i32_0 = arith.constant 0 : i32
    %c0_i32_1 = arith.constant 0 : i32
    return %arg0, %c0_i32, %c0_i32_0 : i32, i32, i32
  }
  func.func @transform_13(%arg0: i32) -> (i32, i32, i32) {
    %c0_i32 = arith.constant 0 : i32
    %c0_i32_0 = arith.constant 0 : i32
    %c0_i32_1 = arith.constant 0 : i32
    return %arg0, %c0_i32, %c0_i32_0 : i32, i32, i32
  }
  func.func @transform_14(%arg0: i32) -> (i32, i32, i32) {
    %c0_i32 = arith.constant 0 : i32
    %c0_i32_0 = arith.constant 0 : i32
    %c0_i32_1 = arith.constant 0 : i32
    %c0_i32_2 = arith.constant 0 : i32
    return %c0_i32, %c0_i32_0, %c0_i32_1 : i32, i32, i32
  }
  func.func @transform_15(%arg0: i32) -> (i32, i32, i32) {
    %c0_i32 = arith.constant 0 : i32
    %c0_i32_0 = arith.constant 0 : i32
    %c0_i32_1 = arith.constant 0 : i32
    %c0_i32_2 = arith.constant 0 : i32
    return %c0_i32, %c0_i32_0, %c0_i32_1 : i32, i32, i32
  }
}

</mosaic_0001>

<bundles_post_ra>
// kernel: decoder_forward_steps.1
= control target key start
LH: loop header
LB: loop body
LE: loop exit
PB: predicated region body
PF: predicated region fallthrough
CT: control target
= control target key end

     0   :  { %s4033_s18 = smov 0   ;;  %s6358_s0 = inlined_call_operand.vmem [shape: f32[4,8,16], index: 0, kind: input, shape index: {}]   ;;  %s6359_s1 = inlined_call_operand.vmem [shape: f32[2,8,32], index: 1, kind: input, shape index: {}]   ;;  %s6360_s2 = inlined_call_operand.vmem [shape: f32[2,8,32], index: 2, kind: input, shape index: {}]   ;;  %s6361_s3 = inlined_call_operand.vmem [shape: f32[8,128,32], index: 3, kind: input, shape index: {}]   ;;  %s6362_s4 = inlined_call_operand.vmem [shape: f32[48,128], index: 4, kind: input, shape index: {}]   ;;  %s6363_s5 = inlined_call_operand.vmem [shape: f32[1,128], index: 5, kind: input, shape index: {}]   ;;  %s6364_s6 = inlined_call_operand.vmem [shape: f32[64,128], index: 6, kind: input, shape index: {}]   ;;  %s6365_s7 = inlined_call_operand.vmem [shape: f32[1,128], index: 7, kind: input, shape index: {}]   ;;  %s6366_s8 = inlined_call_operand.vmem [shape: f32[64,32], index: 8, kind: input, shape index: {}]   ;;  %s6367_s9 = inlined_call_operand.vmem [shape: f32[1,32], index: 9, kind: input, shape index: {}]   ;;  %s6368_s10 = inlined_call_operand.vmem [shape: f32[32,128], index: 10, kind: input, shape index: {}]   ;;  %s6369_s11 = inlined_call_operand.vmem [shape: f32[1,128], index: 11, kind: input, shape index: {}]   ;;  %s6370_s12 = inlined_call_operand.vmem [shape: f32[4,8,128], index: 12, kind: output, shape index: {0}]   ;;  %s6371_s13 = inlined_call_operand.vmem [shape: f32[4,8,128], index: 13, kind: output, shape index: {1}]   ;;  %s6372_s14 = inlined_call_operand.vmem [shape: f32[2,8,32], index: 14, kind: output, shape index: {2}]   ;;  %s6373_s15 = inlined_call_operand.vmem [shape: f32[2,8,32], index: 15, kind: output, shape index: {3}]  }
   0x1 LB: > { %s4039_s19 = sadd.s32 4294967295, %s3943_s18   ;;  %p3618_p0 = scmp.ge.s32.totalorder %s3943_s18, 1  ;;  %s3943_s18 = sphi %s4033_s18, %s26_s18  }
   0x2   : > { %p433_p1 = scmp.lt.s32.totalorder %s3943_s18, 5 }
   0x4   : > { %p434_p2 = pnand %p3618_p0, %p433_p1 }
   0x6   : > { %437 = sbr.rel (%p434_p2) target bundleno = 3516 (0xdbc), region = 68 }
   0xd   : > { %p483_p3 = scmp.lt.s32.totalorder %s4039_s19, 3  ;;  %p3622_p4 = scmp.ne.s32.totalorder %s4039_s19, 0 }
   0xe   : > { %v499_v0 = vld [vmem:[%s6359_s1] sm:$0xff] (!%p3622_p4)  ;;  %vm501_vm0 = vcmask (!%p3622_p4), 261120   ;;  %v500_v1 = vld [vmem:[%s6359_s1 + $0x8] sm:$0xff] (!%p3622_p4) }
   0xf   : > { %s484_s20 = scalar_select %p483_p3, %s4039_s19, 3 }
  0x10   : > { %498 = sbr.rel (%p3622_p4) target bundleno = 23 (0x17), region = 72  ;;  %v504_v2 = vld [vmem:[%s6360_s2] sm:$0xff] (!%p3622_p4)  ;;  %502 = vst.msk [vmem:[#allocation2] sm:$0xff] (!%p3622_p4), %vm501_vm0, %v499_v0  ;;  %503 = vst.msk [vmem:[#allocation2 + $0x8] sm:$0xff] (!%p3622_p4), %vm501_vm0, %v500_v1  ;;  %v505_v3 = vld [vmem:[%s6360_s2 + $0x8] sm:$0xff] (!%p3622_p4) }
  0x11   : > { %s4045_s21 = sshll.u32 %s484_s20, 3  ;;  %506 = vst.msk [vmem:[#allocation3] sm:$0xff] (!%p3622_p4), %vm501_vm0, %v504_v2  ;;  %507 = vst.msk [vmem:[#allocation3 + $0x8] sm:$0xff] (!%p3622_p4), %vm501_vm0, %v505_v3 }
  0x12   : > { %s494_s30 = scalar_lea.vmem %s6371_s13, %s4045_s21 }
  0x17 PF: > { %v509_v4 = vld [vmem:[#allocation2] sm:$0xff]  ;;  %v518_v6 = vld [vmem:[%s6362_s4 + $0x8] sm:$0xff]  ;;  %s3945_s24 = smov 16   ;;  %v6377_v7 = vmov 0.0|0.0   ;;  %v519_v9 = vld [vmem:[%s6362_s4 + $0x10] sm:$0xff]  ;;  %vm3947_vm1 = vmmov 0   ;;  %s6389_s22 = scalar_lea.vmem %s6358_s0, %s4045_s21 }
  0x18   : > { %v517_v5 = vld [vmem:[%s6362_s4] sm:$0xff]  ;;  %511 = vrot.lane.b32.xlu0 %v509_v4, %s3945_s24  ;;  %3730 = vmatprep.subr.bf16.mxu0 %v6377_v7  ;;  %v520_v10 = vld [vmem:[%s6362_s4 + $0x18] sm:$0xff]  ;;  %v3948_v11 = vmov 0.0   ;;  %v516_v12 = vld [vmem:[#allocation3] sm:$0xff]  ;;  %s3949_s26 = smov 32   ;;  %vm514_vm2 = vcmask 130048  }
  0x19   : > { %v3731_v8 = vpack.c.bf16 %v518_v6, %v517_v5  ;;  %3678 = vmatprep.mubr.msk.f32.mxu0 %vm3947_vm1, %v3948_v11  ;;  %3739 = vmatprep.subr.bf16.mxu1 %v6377_v7  ;;  %v3734_v13 = vpack.c.bf16 %v520_v10, %v519_v9  ;;  %v521_v14 = vld [vmem:[%s6362_s4 + $0x20] sm:$0xff]  ;;  %v522_v15 = vld [vmem:[%s6362_s4 + $0x28] sm:$0xff]  ;;  %vm530_vm3 = vcmask 392192   ;;  %s3950_s28 = smov 64   ;;  %v648_v37 = vld [vmem:[%s6364_s6 + $0x10] sm:$0xff]  ;;  %vm6387_vm4 = vcmask 261120  }
  0x1a   : > { %612 = vrot.lane.b32.xlu1 %v516_v12, %s3949_s26  ;;  %3697 = vmatprep.mubr.msk.f32.mxu1 %vm3947_vm1, %v3948_v11  ;;  %v3737_v16 = vpack.c.bf16 %v522_v15, %v521_v14  ;;  %v508_v17 = vld [vmem:[%s6389_s22] sm:$0xff]  ;;  %v647_v36 = vld [vmem:[%s6364_s6 + $0x8] sm:$0xff]  ;;  %v649_v39 = vld [vmem:[%s6364_s6 + $0x18] sm:$0xff]  ;;  %vm6374_vm5 = vcmask 523264   ;;  %v911_v10 = vlaneseq  ;;  %vm1664_vm6 = vcmask 130112   ;;  %s3952_s20 = smov 96  }
  0x1b   : > { %3732 = vmatpush3.bf16.msra.mxu0 %v3731_v8  ;;  %v3623_v20 = vld [vmem:[%s6363_s5] ss:$0 sm:$0xff]  ;;  %v3743_v40 = vpack.c.bf16 %v649_v39, %v648_v37  ;;  %v651_v42 = vld [vmem:[%s6364_s6 + $0x28] sm:$0xff]  ;;  %v652_v44 = vld [vmem:[%s6364_s6 + $0x30] sm:$0xff]  ;;  %v3951_v8 = vmov 1966171168  }
  0x1c   : > { %3733 = vmatprep.subr.bf16.mxu0 %v6377_v7  ;;  %v646_v35 = vld [vmem:[%s6364_s6] sm:$0xff]  ;;  %v653_v45 = vld [vmem:[%s6364_s6 + $0x38] sm:$0xff]  ;;  %v633_v48 = vld [vmem:[#allocation2 + $0x8] sm:$0xff]  ;;  %v909_v9 = vunpack.c.l.s4 %v3951_v8  ;;  %v4162_v12 = vshrl.u32 %v911_v10, 7  ;;  %vm1671_vm7 = vcmask 195712   ;;  %vm1678_vm8 = vcmask 261312  }
  0x1d   : > { %v3740_v38 = vpack.c.bf16 %v647_v36, %v646_v35  ;;  %v650_v41 = vld [vmem:[%s6364_s6 + $0x20] sm:$0xff]  ;;  %v3749_v47 = vpack.c.bf16 %v653_v45, %v652_v44  ;;  %v645_v49 = vld [vmem:[#allocation3 + $0x8] sm:$0xff]  ;;  %vm1685_vm9 = vcmask 326912   ;;  %vm1692_vm10 = vcmask 392512   ;;  %p3633_p5 = scmp.ne.s32.totalorder %s4039_s19, 3 }
  0x1e   : > { %v3746_v43 = vpack.c.bf16 %v651_v42, %v650_v41  ;;  %v3626_v55 = vld [vmem:[%s6365_s7] ss:$0 sm:$0xff]  ;;  %6392 = vst [vmem:[#allocation6_spill] sm:$0xff] %v4162_v12  ;;  %vm6375_vm11 = vcmask 458112   ;;  %vm1706_vm12 = vcmask 523712   ;;  %vm1713_vm13 = vcmask 589312  }
  0x1f   : > { %3735 = vmatpush3.bf16.msra.mxu0 %v3734_v13  ;;  %3741 = vmatpush3.bf16.msra.mxu1 %v3740_v38  ;;  %v779_v39 = vld [vmem:[%s6361_s3] sm:$0xff]  ;;  %vm1720_vm14 = vcmask 654912   ;;  %vm1727_vm15 = vcmask 720512   ;;  %vm1734_vm0 = vcmask 786112  }
  0x20   : > { %3736 = vmatprep.subr.bf16.mxu0 %v6377_v7  ;;  %3742 = vmatprep.subr.bf16.mxu1 %v6377_v7  ;;  %v783_v42 = vld [vmem:[%s6361_s3 + $0x20] sm:$0xff] }
  0x21   : > { %v795_v8 = vld [vmem:[%s6361_s3 + $0x80] sm:$0xff] }
  0x23   : > { %3738 = vmatpush3.bf16.msra.mxu0 %v3737_v16  ;;  %3744 = vmatpush3.bf16.msra.mxu1 %v3743_v40  ;;  %v780_v40 = vld [vmem:[%s6361_s3 + $0x8] sm:$0xff] }
  0x24   : > { %3751 = vmatprep.subr.bf16.mxu0 %v6377_v7  ;;  %3745 = vmatprep.subr.bf16.mxu1 %v6377_v7 }
  0x27   : > { %3747 = vmatpush3.bf16.msra.mxu1 %v3746_v43  ;;  %v781_v43 = vld [vmem:[%s6361_s3 + $0x10] sm:$0xff] }
  0x28   : > { %3748 = vmatprep.subr.bf16.mxu1 %v6377_v7 }
  0x2b   : > { %3750 = vmatpush3.bf16.msra.mxu1 %v3749_v47 }
  0x2c   : > { %3763 = vmatprep.subr.bf16.mxu1 %v6377_v7 }
  0x8a   : > { %v512_v18 = vpop.permute.xlu0 %511 }
  0x8b   : > { %v515_v19 = vsel %vm514_vm2, %v508_v17, %v512_v18  ;;  %v4171_v18 = vsub.s32 0, %v4162_v12  ;;  %vm1748_vm2 = vcmask 917312  }
  0x8c   : > { %3679 = vmatmul.mubr.msk.f32.vlgmr.msra.gmra.mrb[0].mxu0 %vm530_vm3, %v515_v19  ;;  %v613_v31 = vpop.permute.xlu1 %612  ;;  %vm1755_vm3 = vcmask 982912  }
  0x8d   : > { %3716 = vmatprep.mubr.msk.f32.mxu0 %vm3947_vm1, %v3948_v11  ;;  %6394 = vst [vmem:[#allocation8_spill] sm:$0xff] %v4171_v18 }
 0x15f   : > { %v600_v21 = vpop.f32.mrb[0].mxu0 }
 0x160   : > { %v601_v22 = vadd.f32 %v3623_v20, %v600_v21  ;;  %v3680_v23 = vpop.f32.mrb[1].mxu0 }
 0x162   : > { %3785 = vtanh.f32 %v601_v22  ;;  %v3625_v25 = vmul.f32 -1.442695, %v601_v22 }
 0x164   : > { %3787 = vpow2.f32 %v3625_v25 }
 0x16c   : > { %v3786_v24 = vpop.eup %3785 }
 0x16d   : > { %617 = vrot.lane.b32.xlu0 %v3786_v24, %s3950_s28 }
 0x16e   : > { %v3788_v26 = vpop.eup %3787 }
 0x16f   : > { %v607_v27 = vadd.f32 1.0, %v3788_v26 }
 0x171   : > { %3789 = vrcp.f32 %v607_v27 }
 0x17b   : > { %v3790_v28 = vpop.eup %3789 }
 0x17c   : > { %v615_v32 = vmul.f32 %v3790_v28, %v613_v31 }
 0x1df   : > { %v618_v29 = vpop.permute.xlu0 %617 }
 0x1e0   : > { %v620_v30 = vmul.f32 %v3790_v28, %v618_v29 }
 0x1e2   : > { %622 = vrot.lane.b32.xlu1 %v620_v30, %s3949_s26 }
 0x254   : > { %v623_v33 = vpop.permute.xlu1 %622 }
 0x255   : > { %v4112_v34 = vadd.f32 %v623_v33, %v615_v32 }
 0x257   : > { %6390 = vst [vmem:[#allocation4_spill] sm:$0xff] %v4112_v34  ;;  %3791 = vtanh.f32 %v4112_v34 }
 0x261   : > { %v3792_v46 = vpop.eup %3791 }
 0x262   : > { %628 = vrot.lane.b32.xlu0 %v3792_v46, %s3950_s28 }
 0x266   : > { %639 = vrot.lane.b32.xlu0 %v633_v48, %s3949_s26 }
 0x26a   : > { %743 = vrot.lane.b32.xlu0 %v645_v49, %s3949_s26 }
 0x2d4   : > { %v629_v50 = vpop.permute.xlu0 %628 }
 0x2d5   : > { %v631_v51 = vmul.f32 %v3790_v28, %v629_v50  ;;  %v784_v50 = vld [vmem:[%s6361_s3 + $0x28] sm:$0xff] }
 0x2d7   : > { %635 = vrot.lane.b32.xlu1 %v631_v51, %s3949_s26  ;;  %v782_v51 = vld [vmem:[%s6361_s3 + $0x18] sm:$0xff] }
 0x2d8   : > { %v640_v52 = vpop.permute.xlu0 %639 }
 0x2dc   : > { %v744_v2 = vpop.permute.xlu0 %743 }
 0x349   : > { %v636_v53 = vpop.permute.xlu1 %635 }
 0x34a   : > { %763 = vst.msk [vmem:[#allocation2] sm:$0xff] %vm6387_vm4, %v636_v53  ;;  %v643_v54 = vsel %vm6387_vm4, %v636_v53, %v640_v52 }
 0x34b   : > { %3698 = vmatmul.mubr.msk.f32.vlgmr.msra.gmra.mrb[0].mxu1 %vm6374_vm5, %v643_v54  ;;  %vm1762_vm5 = vcmask 1048512  }
 0x34c   : > { %3727 = vmatprep.mubr.msk.f32.mxu1 %vm3947_vm1, %v3948_v11  ;;  %v910_v11 = vunpack.c.0.s8 %v909_v9  ;;  %vm1741_vm1 = vcmask 851712  }
 0x34e   : > { %v913_v13 = vsub.s32 %v910_v11, %v4162_v12 }
 0x41e   : > { %v731_v56 = vpop.f32.mrb[0].mxu1 }
 0x41f   : > { %v732_v57 = vadd.f32 %v3626_v55, %v731_v56  ;;  %v3699_v58 = vpop.f32.mrb[1].mxu1  ;;  %v787_v56 = vld [vmem:[%s6361_s3 + $0x40] sm:$0xff] }
 0x421   : > { %3793 = vtanh.f32 %v732_v57  ;;  %v3628_v60 = vmul.f32 -1.442695, %v732_v57  ;;  %v785_v57 = vld [vmem:[%s6361_s3 + $0x30] sm:$0xff] }
 0x423   : > { %3795 = vpow2.f32 %v3628_v60 }
 0x42b   : > { %v3794_v59 = vpop.eup %3793 }
 0x42c   : > { %748 = vrot.lane.b32.xlu1 %v3794_v59, %s3950_s28 }
 0x42d   : > { %v3796_v61 = vpop.eup %3795 }
 0x42e   : > { %v738_v62 = vadd.f32 1.0, %v3796_v61 }
 0x430   : > { %3797 = vrcp.f32 %v738_v62  ;;  %v788_v62 = vld [vmem:[%s6361_s3 + $0x48] sm:$0xff] }
 0x43a   : > { %v3798_v63 = vpop.eup %3797 }
 0x43b   : > { %v746_v3 = vmul.f32 %v3798_v63, %v744_v2 }
 0x49e   : > { %v749_v0 = vpop.permute.xlu1 %748 }
 0x49f   : > { %v751_v1 = vmul.f32 %v3798_v63, %v749_v0 }
 0x4a1   : > { %753 = vrot.lane.b32.xlu1 %v751_v1, %s3949_s26 }
 0x513   : > { %v754_v4 = vpop.permute.xlu1 %753 }
 0x514   : > { %v4157_v5 = vadd.f32 %v754_v4, %v746_v3 }
 0x516   : > { %6391 = vst [vmem:[#allocation5_spill] sm:$0xff] %v4157_v5  ;;  %3799 = vtanh.f32 %v4157_v5 }
 0x520   : > { %v3800_v6 = vpop.eup %3799 }
 0x521   : > { %759 = vrot.lane.b32.xlu0 %v3800_v6, %s3950_s28  ;;  %v789_v6 = vld [vmem:[%s6361_s3 + $0x50] sm:$0xff] }
 0x593   : > { %v760_v14 = vpop.permute.xlu0 %759 }
 0x594   : > { %v4165_v15 = vmul.f32 %v3798_v63, %v760_v14  ;;  %v786_v63 = vld [vmem:[%s6361_s3 + $0x38] sm:$0xff] }
 0x596   : > { %6393 = vst [vmem:[#allocation7_spill] sm:$0xff] %v4165_v15  ;;  %v907_v16 = vcombine.high %v4165_v15, %v4165_v15  ;;  %v914_v17 = vrot.slane %v4165_v15, %v913_v13 }
 0x598   : > { %v930_v19 = vrot.slane %v914_v17, %v913_v13  ;;  %v922_v20 = vcombine.high %v914_v17, %v914_v17  ;;  %v921_v21 = vrot.slane %v907_v16, %v913_v13  ;;  %v790_v17 = vld [vmem:[%s6361_s3 + $0x58] sm:$0xff] }
 0x59a   : > { %v959_v22 = vrot.slane %v930_v19, %v4171_v18  ;;  %v944_v23 = vrot.slane %v922_v20, %v913_v13  ;;  %v952_v24 = vcombine.high %v930_v19, %v930_v19  ;;  %v923_v27 = vcombine.high %v921_v21, %v921_v21  ;;  %v811_v19 = vld [vmem:[%s6361_s3 + $0x100] sm:$0xff] }
 0x59b   : > { %v937_v29 = vrot.slane %v921_v21, %v913_v13 }
 0x59c   : > { %988 = vrot.lane.b32.xlu1 %v959_v22, %s3949_s26  ;;  %v963_v25 = vrot.slane %v944_v23, %v4171_v18  ;;  %v954_v26 = vcombine.high %v944_v23, %v944_v23  ;;  %v967_v28 = vrot.slane %v952_v24, %v4171_v18  ;;  %v951_v31 = vrot.slane %v923_v27, %v913_v13  ;;  %v791_v24 = vld [vmem:[%s6361_s3 + $0x60] sm:$0xff] }
 0x59d   : > { %v975_v32 = vrot.slane %v937_v29, %v4171_v18  ;;  %v953_v33 = vcombine.high %v937_v29, %v937_v29 }
 0x59e   : > { %990 = vrot.lane.b32.xlu0 %v963_v25, %s3949_s26  ;;  %v971_v30 = vrot.slane %v954_v26, %v4171_v18  ;;  %v979_v35 = vrot.slane %v951_v31, %v4171_v18  ;;  %v955_v36 = vcombine.high %v951_v31, %v951_v31  ;;  %v813_v25 = vld [vmem:[%s6361_s3 + $0x110] sm:$0xff]  ;;  %v799_v31 = vld [vmem:[%s6361_s3 + $0xa0] sm:$0xff] }
 0x59f   : > { %v983_v37 = vrot.slane %v953_v33, %v4171_v18 }
 0x5a0   : > { %992 = vrot.lane.b32.xlu1 %v967_v28, %s3949_s26  ;;  %v987_v38 = vrot.slane %v955_v36, %v4171_v18 }
 0x5a2   : > { %994 = vrot.lane.b32.xlu0 %v971_v30, %s3949_s26  ;;  %v792_v30 = vld [vmem:[%s6361_s3 + $0x68] sm:$0xff] }
 0x5a4   : > { %996 = vrot.lane.b32.xlu1 %v975_v32, %s3949_s26 }
 0x5a6   : > { %998 = vrot.lane.b32.xlu0 %v979_v35, %s3949_s26 }
 0x5a8   : > { %1000 = vrot.lane.b32.xlu1 %v983_v37, %s3949_s26 }
 0x5aa   : > { %1002 = vrot.lane.b32.xlu0 %v987_v38, %s3949_s26  ;;  %v793_v38 = vld [vmem:[%s6361_s3 + $0x70] sm:$0xff] }
 0x60e   : > { %v4195_v41 = vpop.permute.xlu1 %988 }
 0x60f   : > { %v1012_v44 = vmul.f32 %v4195_v41, %v779_v39  ;;  %v1013_v45 = vmul.f32 %v4195_v41, %v780_v40  ;;  %v1016_v48 = vmul.f32 %v4195_v41, %v783_v42  ;;  %v1014_v49 = vmul.f32 %v4195_v41, %v781_v43  ;;  %v844_v39 = vld [vmem:[%s6361_s3 + $0x208] sm:$0xff] }
 0x610   : > { %v1017_v54 = vmul.f32 %v4195_v41, %v784_v50  ;;  %v1015_v55 = vmul.f32 %v4195_v41, %v782_v51  ;;  %v1020_v60 = vmul.f32 %v4195_v41, %v787_v56  ;;  %v1018_v61 = vmul.f32 %v4195_v41, %v785_v57  ;;  %v4239_v4 = vpop.permute.xlu0 %990  ;;  %v796_v51 = vld [vmem:[%s6361_s3 + $0x88] sm:$0xff]  ;;  %v797_v56 = vld [vmem:[%s6361_s3 + $0x90] sm:$0xff]  ;;  %v846_v57 = vld [vmem:[%s6361_s3 + $0x218] sm:$0xff] }
 0x611   : > { %v1140_v46 = vsel %vm6387_vm4, %v1012_v44, 0.0  ;;  %v1143_v47 = vsel %vm6387_vm4, %v1013_v45, 0.0  ;;  %v1152_v52 = vsel %vm6387_vm4, %v1016_v48, 0.0  ;;  %v1146_v53 = vsel %vm6387_vm4, %v1014_v49, 0.0  ;;  %v794_v45 = vld [vmem:[%s6361_s3 + $0x78] sm:$0xff] }
 0x612   : > { %1141 = vadd.xlane.f32.xlu1 %v1140_v46  ;;  %1144 = vadd.xlane.f32.xlu0 %v1143_v47  ;;  %v1155_v58 = vsel %vm6387_vm4, %v1017_v54, 0.0  ;;  %v1149_v59 = vsel %vm6387_vm4, %v1015_v55, 0.0  ;;  %v1164_v0 = vsel %vm6387_vm4, %v1020_v60, 0.0  ;;  %v1158_v1 = vsel %vm6387_vm4, %v1018_v61, 0.0  ;;  %v4251_v16 = vpop.permute.xlu1 %992  ;;  %v800_v46 = vld [vmem:[%s6361_s3 + $0xa8] sm:$0xff] }
 0x613   : > { %v1021_v2 = vmul.f32 %v4195_v41, %v788_v62  ;;  %v1019_v3 = vmul.f32 %v4195_v41, %v786_v63  ;;  %v1022_v13 = vmul.f32 %v4195_v41, %v789_v6  ;;  %v1028_v14 = vmul.f32 %v4239_v4, %v795_v8  ;;  %v812_v62 = vld [vmem:[%s6361_s3 + $0x108] sm:$0xff]  ;;  %v817_v63 = vld [vmem:[%s6361_s3 + $0x130] sm:$0xff]  ;;  %v798_v6 = vld [vmem:[%s6361_s3 + $0x98] sm:$0xff] }
 0x614   : > { %v1023_v22 = vmul.f32 %v4195_v41, %v790_v17  ;;  %v1044_v23 = vmul.f32 %v4251_v16, %v811_v19  ;;  %v1024_v28 = vmul.f32 %v4195_v41, %v791_v24  ;;  %v1046_v29 = vmul.f32 %v4251_v16, %v813_v25  ;;  %v847_v8 = vld [vmem:[%s6361_s3 + $0x220] sm:$0xff]  ;;  %v814_v17 = vld [vmem:[%s6361_s3 + $0x118] sm:$0xff]  ;;  %v804_v25 = vld [vmem:[%s6361_s3 + $0xc8] sm:$0xff] }
 0x615   : > { %v1167_v9 = vsel %vm6387_vm4, %v1021_v2, 0.0  ;;  %v1161_v11 = vsel %vm6387_vm4, %v1019_v3, 0.0  ;;  %v1170_v20 = vsel %vm6387_vm4, %v1022_v13, 0.0  ;;  %v1188_v21 = vsel %vm6387_vm4, %v1028_v14, 0.0  ;;  %v803_v19 = vld [vmem:[%s6361_s3 + $0xc0] sm:$0xff] }
 0x616   : > { %1153 = vadd.xlane.f32.xlu1 %v1152_v52  ;;  %1147 = vadd.xlane.f32.xlu0 %v1146_v53  ;;  %v1173_v26 = vsel %vm6387_vm4, %v1023_v22, 0.0  ;;  %v1236_v27 = vsel %vm6387_vm4, %v1044_v23, 0.0  ;;  %v1176_v32 = vsel %vm6387_vm4, %v1024_v28, 0.0  ;;  %v1242_v33 = vsel %vm6387_vm4, %v1046_v29, 0.0  ;;  %v4283_v37 = vpop.permute.xlu1 %996  ;;  %v816_v52 = vld [vmem:[%s6361_s3 + $0x128] sm:$0xff]  ;;  %v843_v24 = vld [vmem:[%s6361_s3 + $0x200] sm:$0xff] }
 0x617   : > { %v1025_v35 = vmul.f32 %v4195_v41, %v792_v30  ;;  %v1032_v36 = vmul.f32 %v4239_v4, %v799_v31  ;;  %v1026_v43 = vmul.f32 %v4195_v41, %v793_v38  ;;  %v1077_v44 = vmul.f32 %v4283_v37, %v844_v39  ;;  %v815_v30 = vld [vmem:[%s6361_s3 + $0x120] sm:$0xff]  ;;  %v805_v31 = vld [vmem:[%s6361_s3 + $0xd0] sm:$0xff]  ;;  %v806_v39 = vld [vmem:[%s6361_s3 + $0xd8] sm:$0xff] }
 0x618   : > { %v1027_v49 = vmul.f32 %v4195_v41, %v794_v45  ;;  %v1033_v50 = vmul.f32 %v4239_v4, %v800_v46  ;;  %v1029_v55 = vmul.f32 %v4239_v4, %v796_v51  ;;  %v1049_v41 = vmul.f32 %v4251_v16, %v816_v52  ;;  %v845_v38 = vld [vmem:[%s6361_s3 + $0x210] sm:$0xff]  ;;  %v807_v46 = vld [vmem:[%s6361_s3 + $0xe0] sm:$0xff]  ;;  %v802_v51 = vld [vmem:[%s6361_s3 + $0xb8] sm:$0xff] }
 0x619   : > { %v1179_v40 = vsel %vm6387_vm4, %v1025_v35, 0.0  ;;  %v1200_v42 = vsel %vm6387_vm4, %v1032_v36, 0.0  ;;  %v1182_v47 = vsel %vm6387_vm4, %v1026_v43, 0.0  ;;  %v1335_v48 = vsel %vm6387_vm4, %v1077_v44, 0.0  ;;  %v801_v45 = vld [vmem:[%s6361_s3 + $0xb0] sm:$0xff]  ;;  %v808_v52 = vld [vmem:[%s6361_s3 + $0xe8] sm:$0xff] }
 0x61a   : > { %1156 = vadd.xlane.f32.xlu1 %v1155_v58  ;;  %1150 = vadd.xlane.f32.xlu0 %v1149_v59  ;;  %v1185_v53 = vsel %vm6387_vm4, %v1027_v49, 0.0  ;;  %v1203_v54 = vsel %vm6387_vm4, %v1033_v50, 0.0  ;;  %v1191_v58 = vsel %vm6387_vm4, %v1029_v55, 0.0  ;;  %v1251_v59 = vsel %vm6387_vm4, %v1049_v41, 0.0 }
 0x61b   : > { %v1030_v60 = vmul.f32 %v4239_v4, %v797_v56  ;;  %v1079_v61 = vmul.f32 %v4283_v37, %v846_v57  ;;  %v1045_v2 = vmul.f32 %v4251_v16, %v812_v62  ;;  %v1050_v3 = vmul.f32 %v4251_v16, %v817_v63  ;;  %v818_v56 = vld [vmem:[%s6361_s3 + $0x138] sm:$0xff]  ;;  %v809_v57 = vld [vmem:[%s6361_s3 + $0xf0] sm:$0xff]  ;;  %v848_v62 = vld [vmem:[%s6361_s3 + $0x228] sm:$0xff] }
 0x61c   : > { %v1031_v13 = vmul.f32 %v4239_v4, %v798_v6  ;;  %v1080_v14 = vmul.f32 %v4283_v37, %v847_v8  ;;  %v1047_v22 = vmul.f32 %v4251_v16, %v814_v17  ;;  %v1036_v23 = vmul.f32 %v4239_v4, %v803_v19  ;;  %v810_v63 = vld [vmem:[%s6361_s3 + $0xf8] sm:$0xff]  ;;  %v819_v6 = vld [vmem:[%s6361_s3 + $0x140] sm:$0xff]  ;;  %v857_v8 = vld [vmem:[%s6361_s3 + $0x270] sm:$0xff] }
 0x61d   : > { %v1076_v28 = vmul.f32 %v4283_v37, %v843_v24  ;;  %v1037_v29 = vmul.f32 %v4239_v4, %v804_v25  ;;  %v1048_v35 = vmul.f32 %v4251_v16, %v815_v30  ;;  %v1038_v36 = vmul.f32 %v4239_v4, %v805_v31  ;;  %v858_v17 = vld [vmem:[%s6361_s3 + $0x278] sm:$0xff]  ;;  %v820_v24 = vld [vmem:[%s6361_s3 + $0x148] sm:$0xff]  ;;  %v829_v31 = vld [vmem:[%s6361_s3 + $0x190] sm:$0xff] }
 0x61e   : > { %1165 = vadd.xlane.f32.xlu1 %v1164_v0  ;;  %1159 = vadd.xlane.f32.xlu0 %v1158_v1  ;;  %v1194_v0 = vsel %vm6387_vm4, %v1030_v60, 0.0  ;;  %v1341_v1 = vsel %vm6387_vm4, %v1079_v61, 0.0  ;;  %v1078_v43 = vmul.f32 %v4283_v37, %v845_v38  ;;  %v1039_v44 = vmul.f32 %v4239_v4, %v806_v39  ;;  %v828_v25 = vld [vmem:[%s6361_s3 + $0x188] sm:$0xff]  ;;  %v850_v30 = vld [vmem:[%s6361_s3 + $0x238] sm:$0xff]  ;;  %v821_v38 = vld [vmem:[%s6361_s3 + $0x150] sm:$0xff] }
 0x61f   : > { %v1034_v49 = vmul.f32 %v4239_v4, %v801_v45  ;;  %v1040_v50 = vmul.f32 %v4239_v4, %v807_v46  ;;  %v1035_v55 = vmul.f32 %v4239_v4, %v802_v51  ;;  %v1041_v41 = vmul.f32 %v4239_v4, %v808_v52  ;;  %v830_v39 = vld [vmem:[%s6361_s3 + $0x198] sm:$0xff]  ;;  %v851_v46 = vld [vmem:[%s6361_s3 + $0x240] sm:$0xff]  ;;  %v4489_v52 = vpop.permute.xlu1 %1000 }
 0x620   : > { %v1051_v60 = vmul.f32 %v4251_v16, %v818_v56  ;;  %v1042_v61 = vmul.f32 %v4239_v4, %v809_v57 }
 0x622   : > { %1168 = vadd.xlane.f32.xlu1 %v1167_v9  ;;  %1162 = vadd.xlane.f32.xlu0 %v1161_v11  ;;  %v1239_v9 = vsel %vm6387_vm4, %v1045_v2, 0.0  ;;  %v1254_v11 = vsel %vm6387_vm4, %v1050_v3, 0.0  ;;  %v1081_v2 = vmul.f32 %v4283_v37, %v848_v62  ;;  %v1043_v3 = vmul.f32 %v4239_v4, %v810_v63  ;;  %v849_v4 = vld [vmem:[%s6361_s3 + $0x230] sm:$0xff] }
 0x626   : > { %1171 = vadd.xlane.f32.xlu1 %v1170_v20  ;;  %1189 = vadd.xlane.f32.xlu0 %v1188_v21  ;;  %v1197_v20 = vsel %vm6387_vm4, %v1031_v13, 0.0  ;;  %v1344_v21 = vsel %vm6387_vm4, %v1080_v14, 0.0  ;;  %v1052_v13 = vmul.f32 %v4251_v16, %v819_v6  ;;  %v1090_v14 = vmul.f32 %v4283_v37, %v857_v8 }
 0x628   : > { %v1260_v19 = vsel %vm6387_vm4, %v1052_v13, 0.0 }
 0x62a   : > { %1174 = vadd.xlane.f32.xlu1 %v1173_v26  ;;  %1237 = vadd.xlane.f32.xlu0 %v1236_v27  ;;  %v1245_v26 = vsel %vm6387_vm4, %v1047_v22, 0.0  ;;  %v1212_v27 = vsel %vm6387_vm4, %v1036_v23, 0.0  ;;  %v1091_v22 = vmul.f32 %v4283_v37, %v858_v17  ;;  %v4445_v23 = vpop.permute.xlu0 %994 }
 0x62e   : > { %1177 = vadd.xlane.f32.xlu1 %v1176_v32  ;;  %1243 = vadd.xlane.f32.xlu0 %v1242_v33  ;;  %v1332_v32 = vsel %vm6387_vm4, %v1076_v28, 0.0  ;;  %v1215_v33 = vsel %vm6387_vm4, %v1037_v29, 0.0  ;;  %v1053_v28 = vmul.f32 %v4251_v16, %v820_v24  ;;  %v1061_v29 = vmul.f32 %v4445_v23, %v828_v25  ;;  %v4477_v45 = vpop.permute.xlu0 %998 }
 0x632   : > { %1180 = vadd.xlane.f32.xlu1 %v1179_v40  ;;  %1201 = vadd.xlane.f32.xlu0 %v1200_v42  ;;  %v1248_v40 = vsel %vm6387_vm4, %v1048_v35, 0.0  ;;  %v1218_v42 = vsel %vm6387_vm4, %v1038_v36, 0.0  ;;  %v1083_v35 = vmul.f32 %v4283_v37, %v850_v30  ;;  %v1062_v36 = vmul.f32 %v4445_v23, %v829_v31 }
 0x636   : > { %1183 = vadd.xlane.f32.xlu1 %v1182_v47  ;;  %1336 = vadd.xlane.f32.xlu0 %v1335_v48  ;;  %v1338_v47 = vsel %vm6387_vm4, %v1078_v43, 0.0  ;;  %v1221_v48 = vsel %vm6387_vm4, %v1039_v44, 0.0  ;;  %v1054_v43 = vmul.f32 %v4251_v16, %v821_v38  ;;  %v1063_v44 = vmul.f32 %v4445_v23, %v830_v39 }
 0x63a   : > { %1186 = vadd.xlane.f32.xlu1 %v1185_v53  ;;  %1204 = vadd.xlane.f32.xlu0 %v1203_v54  ;;  %v1206_v53 = vsel %vm6387_vm4, %v1034_v49, 0.0  ;;  %v1224_v54 = vsel %vm6387_vm4, %v1040_v50, 0.0  ;;  %v1293_v49 = vsel %vm6387_vm4, %v1063_v44, 0.0  ;;  %v1084_v50 = vmul.f32 %v4283_v37, %v851_v46  ;;  %v4571_v44 = vpop.permute.xlu0 %1002 }
 0x63e   : > { %1192 = vadd.xlane.f32.xlu1 %v1191_v58  ;;  %1252 = vadd.xlane.f32.xlu0 %v1251_v59  ;;  %v1209_v58 = vsel %vm6387_vm4, %v1035_v55, 0.0  ;;  %v1227_v59 = vsel %vm6387_vm4, %v1041_v41, 0.0  ;;  %v1356_v55 = vsel %vm6387_vm4, %v1084_v50, 0.0 }
 0x642   : > { %1195 = vadd.xlane.f32.xlu1 %v1194_v0  ;;  %1342 = vadd.xlane.f32.xlu0 %v1341_v1  ;;  %v1257_v0 = vsel %vm6387_vm4, %v1051_v60, 0.0  ;;  %v1230_v1 = vsel %vm6387_vm4, %v1042_v61, 0.0 }
 0x646   : > { %1240 = vadd.xlane.f32.xlu1 %v1239_v9  ;;  %1255 = vadd.xlane.f32.xlu0 %v1254_v11  ;;  %v1347_v9 = vsel %vm6387_vm4, %v1081_v2, 0.0  ;;  %v1233_v11 = vsel %vm6387_vm4, %v1043_v3, 0.0 }
 0x64a   : > { %1198 = vadd.xlane.f32.xlu1 %v1197_v20  ;;  %1345 = vadd.xlane.f32.xlu0 %v1344_v21  ;;  %v1374_v20 = vsel %vm6387_vm4, %v1090_v14, 0.0  ;;  %v1082_v21 = vmul.f32 %v4283_v37, %v849_v4 }
 0x64e   : > { %1246 = vadd.xlane.f32.xlu1 %v1245_v26  ;;  %1213 = vadd.xlane.f32.xlu0 %v1212_v27  ;;  %v1350_v26 = vsel %vm6387_vm4, %v1082_v21, 0.0  ;;  %v1377_v27 = vsel %vm6387_vm4, %v1091_v22, 0.0 }
 0x652   : > { %1333 = vadd.xlane.f32.xlu1 %v1332_v32  ;;  %1216 = vadd.xlane.f32.xlu0 %v1215_v33  ;;  %v1263_v32 = vsel %vm6387_vm4, %v1053_v28, 0.0  ;;  %v1287_v33 = vsel %vm6387_vm4, %v1061_v29, 0.0  ;;  %v4548_v28 = vand.u32 127, %v911_v10 }
 0x654   : > { %6395 = vst [vmem:[#allocation9_spill] sm:$0xff] %v4548_v28  ;;  %v1659_v10 = vadd.s32 4294967288, %v4548_v28  ;;  %v4575_v46 = vsub.s32 %v4548_v28, %v4162_v12 }
 0x656   : > { %1249 = vadd.xlane.f32.xlu1 %v1248_v40  ;;  %1219 = vadd.xlane.f32.xlu0 %v1218_v42  ;;  %v1353_v40 = vsel %vm6387_vm4, %v1083_v35, 0.0  ;;  %v1290_v42 = vsel %vm6387_vm4, %v1062_v36, 0.0  ;;  %v835_v35 = vld [vmem:[%s6361_s3 + $0x1c0] sm:$0xff] }
 0x65a   : > { %1339 = vadd.xlane.f32.xlu1 %v1338_v47  ;;  %1222 = vadd.xlane.f32.xlu0 %v1221_v48  ;;  %v859_v47 = vld [vmem:[%s6361_s3 + $0x280] sm:$0xff]  ;;  %v1266_v48 = vsel %vm6387_vm4, %v1054_v43, 0.0  ;;  %v865_v43 = vld [vmem:[%s6361_s3 + $0x2b0] sm:$0xff] }
 0x65b   : > { %v1092_v51 = vmul.f32 %v4477_v45, %v859_v47  ;;  %v4578_v47 = vsub.s32 %v1659_v10, %v4162_v12 }
 0x65d   : > { %v1380_v41 = vsel %vm6387_vm4, %v1092_v51, 0.0 }
 0x65e   : > { %1207 = vadd.xlane.f32.xlu1 %v1206_v53  ;;  %1225 = vadd.xlane.f32.xlu0 %v1224_v54  ;;  %v822_v53 = vld [vmem:[%s6361_s3 + $0x158] sm:$0xff]  ;;  %v875_v54 = vld [vmem:[%s6361_s3 + $0x300] sm:$0xff] }
 0x65f   : > { %v1055_v56 = vmul.f32 %v4251_v16, %v822_v53  ;;  %v1108_v57 = vmul.f32 %v4489_v52, %v875_v54  ;;  %v1098_v54 = vmul.f32 %v4477_v45, %v865_v43  ;;  %v1715_v43 = vadd.s32 4294967224, %v4548_v28 }
 0x661   : > { %v1269_v60 = vsel %vm6387_vm4, %v1055_v56, 0.0  ;;  %v1428_v61 = vsel %vm6387_vm4, %v1108_v57, 0.0 }
 0x662   : > { %1210 = vadd.xlane.f32.xlu1 %v1209_v58  ;;  %1228 = vadd.xlane.f32.xlu0 %v1227_v59  ;;  %v852_v58 = vld [vmem:[%s6361_s3 + $0x248] sm:$0xff]  ;;  %v877_v59 = vld [vmem:[%s6361_s3 + $0x310] sm:$0xff] }
 0x663   : > { %v1085_v62 = vmul.f32 %v4283_v37, %v852_v58  ;;  %v1110_v63 = vmul.f32 %v4489_v52, %v877_v59 }
 0x665   : > { %v1359_v2 = vsel %vm6387_vm4, %v1085_v62, 0.0  ;;  %v1434_v3 = vsel %vm6387_vm4, %v1110_v63, 0.0  ;;  %v1398_v63 = vsel %vm6387_vm4, %v1098_v54, 0.0 }
 0x666   : > { %1258 = vadd.xlane.f32.xlu1 %v1257_v0  ;;  %1231 = vadd.xlane.f32.xlu0 %v1230_v1  ;;  %v823_v0 = vld [vmem:[%s6361_s3 + $0x160] sm:$0xff]  ;;  %v833_v1 = vld [vmem:[%s6361_s3 + $0x1b0] sm:$0xff] }
 0x667   : > { %v1056_v6 = vmul.f32 %v4251_v16, %v823_v0  ;;  %v1066_v8 = vmul.f32 %v4445_v23, %v833_v1  ;;  %v1680_v0 = vadd.s32 4294967264, %v4548_v28 }
 0x669   : > { %v1272_v13 = vsel %vm6387_vm4, %v1056_v6, 0.0  ;;  %v1302_v14 = vsel %vm6387_vm4, %v1066_v8, 0.0  ;;  %v866_v6 = vld [vmem:[%s6361_s3 + $0x2b8] sm:$0xff] }
 0x66a   : > { %1348 = vadd.xlane.f32.xlu1 %v1347_v9  ;;  %1234 = vadd.xlane.f32.xlu0 %v1233_v11  ;;  %v853_v9 = vld [vmem:[%s6361_s3 + $0x250] sm:$0xff]  ;;  %v863_v11 = vld [vmem:[%s6361_s3 + $0x2a0] sm:$0xff] }
 0x66b   : > { %v1086_v4 = vmul.f32 %v4283_v37, %v853_v9  ;;  %v1096_v17 = vmul.f32 %v4477_v45, %v863_v11 }
 0x66d   : > { %v1362_v21 = vsel %vm6387_vm4, %v1086_v4, 0.0  ;;  %v1392_v22 = vsel %vm6387_vm4, %v1096_v17, 0.0  ;;  %v1694_v4 = vadd.s32 4294967248, %v4548_v28  ;;  %v4617_v17 = vsub.s32 %v1680_v0, %v4162_v12  ;;  %v831_v0 = vld [vmem:[%s6361_s3 + $0x1a0] sm:$0xff] }
 0x66e   : > { %1261 = vadd.xlane.f32.xlu1 %v1260_v19  ;;  %1375 = vadd.xlane.f32.xlu0 %v1374_v20  ;;  %v824_v19 = vld [vmem:[%s6361_s3 + $0x168] sm:$0xff]  ;;  %v834_v20 = vld [vmem:[%s6361_s3 + $0x1b8] sm:$0xff] }
 0x66f   : > { %v1057_v24 = vmul.f32 %v4251_v16, %v824_v19  ;;  %v1067_v25 = vmul.f32 %v4445_v23, %v834_v20 }
 0x671   : > { %v1275_v29 = vsel %vm6387_vm4, %v1057_v24, 0.0  ;;  %v1305_v30 = vsel %vm6387_vm4, %v1067_v25, 0.0  ;;  %v837_v25 = vld [vmem:[%s6361_s3 + $0x1d0] sm:$0xff] }
 0x672   : > { %1351 = vadd.xlane.f32.xlu1 %v1350_v26  ;;  %1378 = vadd.xlane.f32.xlu0 %v1377_v27  ;;  %v854_v26 = vld [vmem:[%s6361_s3 + $0x258] sm:$0xff]  ;;  %v864_v27 = vld [vmem:[%s6361_s3 + $0x2a8] sm:$0xff] }
 0x673   : > { %v1087_v31 = vmul.f32 %v4283_v37, %v854_v26 }
 0x675   : > { %v1365_v36 = vsel %vm6387_vm4, %v1087_v31, 0.0 }
 0x676   : > { %1264 = vadd.xlane.f32.xlu1 %v1263_v32  ;;  %1288 = vadd.xlane.f32.xlu0 %v1287_v33  ;;  %v1097_v32 = vmul.f32 %v4477_v45, %v864_v27  ;;  %v825_v33 = vld [vmem:[%s6361_s3 + $0x170] sm:$0xff] }
 0x677   : > { %v1058_v39 = vmul.f32 %v4251_v16, %v825_v33  ;;  %v1701_v33 = vadd.s32 4294967240, %v4548_v28 }
 0x678   : > { %v1395_v38 = vsel %vm6387_vm4, %v1097_v32, 0.0  ;;  %v4636_v32 = vsub.s32 %v1694_v4, %v4162_v12  ;;  %v1064_v4 = vmul.f32 %v4445_v23, %v831_v0 }
 0x679   : > { %v1278_v50 = vsel %vm6387_vm4, %v1058_v39, 0.0  ;;  %v1070_v39 = vmul.f32 %v4445_v23, %v837_v25 }
 0x67a   : > { %1354 = vadd.xlane.f32.xlu1 %v1353_v40  ;;  %1291 = vadd.xlane.f32.xlu0 %v1290_v42  ;;  %v1068_v40 = vmul.f32 %v4445_v23, %v835_v35  ;;  %v855_v42 = vld [vmem:[%s6361_s3 + $0x260] sm:$0xff]  ;;  %v860_v35 = vld [vmem:[%s6361_s3 + $0x288] sm:$0xff] }
 0x67b   : > { %v1088_v53 = vmul.f32 %v4283_v37, %v855_v42 }
 0x67c   : > { %v1308_v51 = vsel %vm6387_vm4, %v1068_v40, 0.0 }
 0x67d   : > { %v1368_v62 = vsel %vm6387_vm4, %v1088_v53, 0.0  ;;  %v1093_v53 = vmul.f32 %v4477_v45, %v860_v35  ;;  %v1296_v35 = vsel %vm6387_vm4, %v1064_v4, 0.0  ;;  %v862_v4 = vld [vmem:[%s6361_s3 + $0x298] sm:$0xff] }
 0x67e   : > { %1267 = vadd.xlane.f32.xlu1 %v1266_v48  ;;  %1294 = vadd.xlane.f32.xlu0 %v1293_v49  ;;  %v1666_v48 = vadd.s32 4294967280, %v4548_v28  ;;  %v826_v49 = vld [vmem:[%s6361_s3 + $0x178] sm:$0xff] }
 0x67f   : > { %v1059_v57 = vmul.f32 %v4251_v16, %v826_v49  ;;  %v856_v16 = vld [vmem:[%s6361_s3 + $0x268] sm:$0xff] }
 0x681   : > { %v1281_v19 = vsel %vm6387_vm4, %v1059_v57, 0.0 }
 0x682   : > { %1357 = vadd.xlane.f32.xlu1 %v1356_v55  ;;  %1381 = vadd.xlane.f32.xlu0 %v1380_v41  ;;  %v836_v55 = vld [vmem:[%s6361_s3 + $0x1c8] sm:$0xff] }
 0x683   : > { %v1069_v1 = vmul.f32 %v4445_v23, %v836_v55 }
 0x685   : > { %v1311_v20 = vsel %vm6387_vm4, %v1069_v1, 0.0  ;;  %v838_v1 = vld [vmem:[%s6361_s3 + $0x1d8] sm:$0xff] }
 0x686   : > { %1270 = vadd.xlane.f32.xlu1 %v1269_v60  ;;  %1429 = vadd.xlane.f32.xlu0 %v1428_v61  ;;  %v4595_v60 = vsub.s32 %v1666_v48, %v4162_v12  ;;  %v1673_v61 = vadd.s32 4294967272, %v4548_v28  ;;  %v867_v48 = vld [vmem:[%s6361_s3 + $0x2c0] sm:$0xff] }
 0x68a   : > { %1360 = vadd.xlane.f32.xlu1 %v1359_v2  ;;  %1435 = vadd.xlane.f32.xlu0 %v1434_v3  ;;  %v1687_v3 = vadd.s32 4294967256, %v4548_v28 }
 0x68c   : > { %v4624_v24 = vsub.s32 %v1687_v3, %v4162_v12 }
 0x68e   : > { %1273 = vadd.xlane.f32.xlu1 %v1272_v13  ;;  %1303 = vadd.xlane.f32.xlu0 %v1302_v14  ;;  %v4612_v13 = vsub.s32 %v1673_v61, %v4162_v12  ;;  %v1089_v14 = vmul.f32 %v4283_v37, %v856_v16  ;;  %v827_v37 = vld [vmem:[%s6361_s3 + $0x180] sm:$0xff]  ;;  %v1100_v61 = vmul.f32 %v4477_v45, %v867_v48 }
 0x690   : > { %v1371_v31 = vsel %vm6387_vm4, %v1089_v14, 0.0  ;;  %v1404_v14 = vsel %vm6387_vm4, %v1100_v61, 0.0  ;;  %v869_v61 = vld [vmem:[%s6361_s3 + $0x2d0] sm:$0xff] }
 0x692   : > { %1363 = vadd.xlane.f32.xlu1 %v1362_v21  ;;  %1393 = vadd.xlane.f32.xlu0 %v1392_v22  ;;  %v1099_v21 = vmul.f32 %v4477_v45, %v866_v6  ;;  %v1383_v6 = vsel %vm6387_vm4, %v1093_v53, 0.0 }
 0x696   : > { %1276 = vadd.xlane.f32.xlu1 %v1275_v29  ;;  %1306 = vadd.xlane.f32.xlu0 %v1305_v30  ;;  %v1708_v29 = vadd.s32 4294967232, %v4548_v28 }
 0x698   : > { %v4661_v57 = vsub.s32 %v1708_v29, %v4162_v12 }
 0x69a   : > { %1366 = vadd.xlane.f32.xlu1 %v1365_v36  ;;  %1396 = vadd.xlane.f32.xlu0 %v1395_v38  ;;  %v1401_v36 = vsel %vm6387_vm4, %v1099_v21, 0.0  ;;  %v1060_v38 = vmul.f32 %v4445_v23, %v827_v37  ;;  %v868_v37 = vld [vmem:[%s6361_s3 + $0x2c8] sm:$0xff] }
 0x69e   : > { %1279 = vadd.xlane.f32.xlu1 %v1278_v50  ;;  %1309 = vadd.xlane.f32.xlu0 %v1308_v51 }
 0x69f   : > { %v1142_v41 = vpop.xlane.xlu1 %1141  ;;  %v1145_v56 = vpop.xlane.xlu0 %1144 }
 0x6a0   : > { %v1658_v58 = vrot.slane %v1142_v41, %v4575_v46  ;;  %v1663_v59 = vrot.slane %v1145_v56, %v4578_v47  ;;  %v4657_v41 = vsub.s32 %v1701_v33, %v4162_v12  ;;  %v1722_v56 = vadd.s32 4294967216, %v4548_v28 }
 0x6a1   : > { %v1736_v33 = vadd.s32 4294967200, %v4548_v28 }
 0x6a2   : > { %v1665_v2 = vsel %vm1664_vm6, %v1663_v59, %v1658_v58  ;;  %1369 = vadd.xlane.f32.xlu1 %v1368_v62  ;;  %1399 = vadd.xlane.f32.xlu0 %v1398_v63  ;;  %v1284_v58 = vsel %vm6387_vm4, %v1060_v38, 0.0  ;;  %v1314_v59 = vsel %vm6387_vm4, %v1070_v39, 0.0  ;;  %v4668_v63 = vsub.s32 %v1715_v43, %v4162_v12 }
 0x6a3   : > { %v1154_v8 = vpop.xlane.xlu1 %1153  ;;  %v1148_v9 = vpop.xlane.xlu0 %1147  ;;  %v1101_v38 = vmul.f32 %v4477_v45, %v868_v37 }
 0x6a4   : > { %v1670_v11 = vrot.slane %v1148_v9, %v4595_v60  ;;  %v1684_v10 = vrot.slane %v1154_v8, %v4617_v17  ;;  %v4679_v8 = vsub.s32 %v1722_v56, %v4162_v12  ;;  %v1729_v9 = vadd.s32 4294967208, %v4548_v28 }
 0x6a6   : > { %v1672_v22 = vsel %vm1671_vm7, %v1670_v11, %v1665_v2  ;;  %1282 = vadd.xlane.f32.xlu1 %v1281_v19  ;;  %1312 = vadd.xlane.f32.xlu0 %v1311_v20  ;;  %v1071_v19 = vmul.f32 %v4445_v23, %v838_v1 }
 0x6a7   : > { %v1157_v26 = vpop.xlane.xlu1 %1156  ;;  %v1151_v27 = vpop.xlane.xlu0 %1150 }
 0x6a8   : > { %v1677_v30 = vrot.slane %v1151_v27, %v4612_v13  ;;  %v1691_v40 = vrot.slane %v1157_v26, %v4624_v24 }
 0x6aa   : > { %v1679_v42 = vsel %vm1678_vm8, %v1677_v30, %v1672_v22  ;;  %1372 = vadd.xlane.f32.xlu1 %v1371_v31  ;;  %1402 = vadd.xlane.f32.xlu0 %v1401_v36  ;;  %v861_v22 = vld [vmem:[%s6361_s3 + $0x290] sm:$0xff]  ;;  %v4700_v31 = vsub.s32 %v1729_v9, %v4162_v12 }
 0x6ab   : > { %v1686_v49 = vsel %vm1685_vm9, %v1684_v10, %v1679_v42  ;;  %v1166_v50 = vpop.xlane.xlu1 %1165  ;;  %v1160_v51 = vpop.xlane.xlu0 %1159  ;;  %v1317_v10 = vsel %vm6387_vm4, %v1071_v19, 0.0  ;;  %v1094_v36 = vmul.f32 %v4477_v45, %v861_v22  ;;  %v839_v42 = vld [vmem:[%s6361_s3 + $0x1e0] sm:$0xff]  ;;  %v840_v19 = vld [vmem:[%s6361_s3 + $0x1e8] sm:$0xff] }
 0x6ac   : > { %v1693_v54 = vsel %vm1692_vm10, %v1691_v40, %v1686_v49  ;;  %v1698_v55 = vrot.slane %v1160_v51, %v4636_v32  ;;  %v1712_v11 = vrot.slane %v1166_v50, %v4661_v57  ;;  %v876_v40 = vld [vmem:[%s6361_s3 + $0x308] sm:$0xff]  ;;  %v4718_v50 = vsub.s32 %v1736_v33, %v4162_v12 }
 0x6ad   : > { %v1743_v51 = vadd.s32 4294967192, %v4548_v28  ;;  %v1386_v53 = vsel %vm6387_vm4, %v1094_v36, 0.0  ;;  %v1072_v56 = vmul.f32 %v4445_v23, %v839_v42  ;;  %v1073_v33 = vmul.f32 %v4445_v23, %v840_v19  ;;  %v870_v36 = vld [vmem:[%s6361_s3 + $0x2d8] sm:$0xff] }
 0x6ae   : > { %v1700_v62 = vsel %vm6375_vm11, %v1698_v55, %v1693_v54  ;;  %1285 = vadd.xlane.f32.xlu1 %v1284_v58  ;;  %1315 = vadd.xlane.f32.xlu0 %v1314_v59  ;;  %v1407_v54 = vsel %vm6387_vm4, %v1101_v38, 0.0  ;;  %v1109_v55 = vmul.f32 %v4489_v52, %v876_v40  ;;  %v832_v59 = vld [vmem:[%s6361_s3 + $0x1a8] sm:$0xff] }
 0x6af   : > { %v1169_v16 = vpop.xlane.xlu1 %1168  ;;  %v1163_v2 = vpop.xlane.xlu0 %1162  ;;  %v1065_v9 = vmul.f32 %v4445_v23, %v832_v59 }
 0x6b0   : > { %v1705_v3 = vrot.slane %v1163_v2, %v4657_v41  ;;  %v1719_v20 = vrot.slane %v1169_v16, %v4668_v63  ;;  %v4736_v16 = vsub.s32 %v1743_v51, %v4162_v12  ;;  %v1750_v2 = vadd.s32 4294967184, %v4548_v28 }
 0x6b2   : > { %v1707_v21 = vsel %vm1706_vm12, %v1705_v3, %v1700_v62  ;;  %1384 = vadd.xlane.f32.xlu1 %v1383_v6  ;;  %1405 = vadd.xlane.f32.xlu0 %v1404_v14  ;;  %v1431_v3 = vsel %vm6387_vm4, %v1109_v55, 0.0  ;;  %v1320_v6 = vsel %vm6387_vm4, %v1072_v56, 0.0  ;;  %v4754_v37 = vsub.s32 %v1750_v2, %v4162_v12  ;;  %v879_v55 = vld [vmem:[%s6361_s3 + $0x320] sm:$0xff]  ;;  %v841_v56 = vld [vmem:[%s6361_s3 + $0x1f0] sm:$0xff] }
 0x6b3   : > { %v1714_v25 = vsel %vm1713_vm13, %v1712_v11, %v1707_v21  ;;  %v1172_v26 = vpop.xlane.xlu1 %1171  ;;  %v4695_v27 = vpop.xlane.xlu0 %1189  ;;  %v1102_v11 = vmul.f32 %v4477_v45, %v869_v61  ;;  %v1112_v2 = vmul.f32 %v4489_v52, %v879_v55 }
 0x6b4   : > { %v1721_v29 = vsel %vm1720_vm14, %v1719_v20, %v1714_v25  ;;  %v1726_v30 = vrot.slane %v1172_v26, %v4679_v8  ;;  %v1757_v25 = vadd.s32 4294967176, %v4548_v28  ;;  %v1299_v26 = vsel %vm6387_vm4, %v1065_v9, 0.0  ;;  %v880_v9 = vld [vmem:[%s6361_s3 + $0x328] sm:$0xff] }
 0x6b5   : > { %v1767_v19 = vrot.slane %v4695_v27, %v4575_v46  ;;  %v887_v27 = vld [vmem:[%s6361_s3 + $0x360] sm:$0xff] }
 0x6b6   : > { %v1728_v39 = vsel %vm1727_vm15, %v1726_v30, %v1721_v29  ;;  %1297 = vadd.xlane.f32.xlu1 %v1296_v35  ;;  %1318 = vadd.xlane.f32.xlu0 %v1317_v10  ;;  %v1410_v29 = vsel %vm6387_vm4, %v1102_v11, 0.0  ;;  %v1095_v30 = vmul.f32 %v4477_v45, %v862_v4  ;;  %v878_v10 = vld [vmem:[%s6361_s3 + $0x318] sm:$0xff]  ;;  %v4772_v42 = vsub.s32 %v1757_v25, %v4162_v12  ;;  %v871_v11 = vld [vmem:[%s6361_s3 + $0x2e0] sm:$0xff] }
 0x6b7   : > { %v1175_v43 = vpop.xlane.xlu1 %1174  ;;  %v4714_v48 = vpop.xlane.xlu0 %1237  ;;  %v1111_v51 = vmul.f32 %v4489_v52, %v878_v10 }
 0x6b8   : > { %v1733_v49 = vrot.slane %v1175_v43, %v4700_v31  ;;  %v1389_v43 = vsel %vm6387_vm4, %v1095_v30, 0.0  ;;  %v881_v30 = vld [vmem:[%s6361_s3 + $0x330] sm:$0xff] }
 0x6ba   : > { %v1735_v58 = vsel %vm1734_vm0, %v1733_v49, %v1728_v39  ;;  %1387 = vadd.xlane.f32.xlu1 %v1386_v53  ;;  %1408 = vadd.xlane.f32.xlu0 %v1407_v54  ;;  %v1323_v49 = vsel %vm6387_vm4, %v1073_v33, 0.0  ;;  %v1103_v53 = vmul.f32 %v4477_v45, %v870_v36 }
 0x6bb   : > { %v1178_v62 = vpop.xlane.xlu1 %1177  ;;  %v4732_v0 = vpop.xlane.xlu0 %1243 }
 0x6bc   : > { %v1740_v1 = vrot.slane %v1178_v62, %v4718_v50  ;;  %v1437_v62 = vsel %vm6387_vm4, %v1111_v51, 0.0 }
 0x6be   : > { %v1742_v14 = vsel %vm1741_vm1, %v1740_v1, %v1735_v58  ;;  %1432 = vadd.xlane.f32.xlu1 %v1431_v3  ;;  %1321 = vadd.xlane.f32.xlu0 %v1320_v6  ;;  %v1413_v1 = vsel %vm6387_vm4, %v1103_v53, 0.0  ;;  %v1074_v3 = vmul.f32 %v4445_v23, %v841_v56  ;;  %v882_v53 = vld [vmem:[%s6361_s3 + $0x338] sm:$0xff] }
 0x6bf   : > { %v1181_v20 = vpop.xlane.xlu1 %1180  ;;  %v4750_v21 = vpop.xlane.xlu0 %1201 }
 0x6c0   : > { %v1747_v22 = vrot.slane %v1181_v20, %v4736_v16  ;;  %v1326_v25 = vsel %vm6387_vm4, %v1074_v3, 0.0  ;;  %v1115_v3 = vmul.f32 %v4489_v52, %v882_v53 }
 0x6c2   : > { %v1749_v35 = vsel %vm1748_vm2, %v1747_v22, %v1742_v14  ;;  %1300 = vadd.xlane.f32.xlu1 %v1299_v26  ;;  %1411 = vadd.xlane.f32.xlu0 %v1410_v29  ;;  %v1440_v22 = vsel %vm6387_vm4, %v1112_v2, 0.0  ;;  %v1113_v26 = vmul.f32 %v4489_v52, %v880_v9  ;;  %v1104_v29 = vmul.f32 %v4477_v45, %v871_v11  ;;  %v883_v11 = vld [vmem:[%s6361_s3 + $0x340] sm:$0xff] }
 0x6c3   : > { %v1184_v38 = vpop.xlane.xlu1 %1183  ;;  %v4768_v39 = vpop.xlane.xlu0 %1336 }
 0x6c4   : > { %v1754_v40 = vrot.slane %v1184_v38, %v4754_v37  ;;  %v1114_v38 = vmul.f32 %v4489_v52, %v881_v30 }
 0x6c6   : > { %v1756_v54 = vsel %vm1755_vm3, %v1754_v40, %v1749_v35  ;;  %1390 = vadd.xlane.f32.xlu1 %v1389_v43  ;;  %1324 = vadd.xlane.f32.xlu0 %v1323_v49  ;;  %v1443_v40 = vsel %vm6387_vm4, %v1113_v26, 0.0  ;;  %v1416_v43 = vsel %vm6387_vm4, %v1104_v29, 0.0  ;;  %v1120_v49 = vmul.f32 %v4489_v52, %v887_v27 }
 0x6c7   : > { %v1187_v58 = vpop.xlane.xlu1 %1186  ;;  %v4785_v59 = vpop.xlane.xlu0 %1204  ;;  %v1786_v26 = vrot.slane %v4750_v21, %v4617_v17  ;;  %v1449_v29 = vsel %vm6387_vm4, %v1115_v3, 0.0  ;;  %v892_v21 = vld [vmem:[%s6361_s3 + $0x388] sm:$0xff] }
 0x6c8   : > { %v1761_v61 = vrot.slane %v1187_v58, %v4772_v42  ;;  %v1846_v58 = vrot.slane %v4714_v48, %v4575_v46  ;;  %v1464_v2 = vsel %vm6387_vm4, %v1120_v49, 0.0  ;;  %v874_v48 = vld [vmem:[%s6361_s3 + $0x2f8] sm:$0xff]  ;;  %v1791_v27 = vrot.slane %v4785_v59, %v4624_v24 }
 0x6ca   : > { %v4793_v6 = vsel %vm1762_vm5, %v1761_v61, %v1756_v54  ;;  %1438 = vadd.xlane.f32.xlu1 %v1437_v62  ;;  %1414 = vadd.xlane.f32.xlu0 %v1413_v1  ;;  %v888_v54 = vld [vmem:[%s6361_s3 + $0x368] sm:$0xff]  ;;  %v1446_v62 = vsel %vm6387_vm4, %v1114_v38, 0.0  ;;  %v1855_v1 = vrot.slane %v4732_v0, %v4595_v60 }
 0x6cb   : > { %v1193_v14 = vpop.xlane.xlu1 %1192  ;;  %v4801_v4 = vpop.xlane.xlu0 %1252  ;;  %v1121_v9 = vmul.f32 %v4489_v52, %v888_v54  ;;  %v1125_v54 = vmul.f32 %v4571_v44, %v892_v21  ;;  %v842_v21 = vld [vmem:[%s6361_s3 + $0x1f8] sm:$0xff] }
 0x6cc   : > { %v1771_v20 = vrot.slane %v1193_v14, %v4578_v47 }
 0x6cd   : > { %v1467_v30 = vsel %vm6387_vm4, %v1121_v9, 0.0  ;;  %v1479_v9 = vsel %vm6387_vm4, %v1125_v54, 0.0 }
 0x6ce   : > { %v1772_v33 = vsel %vm1664_vm6, %v1771_v20, %v1767_v19  ;;  %1441 = vadd.xlane.f32.xlu1 %v1440_v22  ;;  %1327 = vadd.xlane.f32.xlu0 %v1326_v25  ;;  %v1116_v25 = vmul.f32 %v4489_v52, %v883_v11 }
 0x6cf   : > { %v1196_v35 = vpop.xlane.xlu1 %1195  ;;  %v4817_v10 = vpop.xlane.xlu0 %1342 }
 0x6d0   : > { %v1776_v36 = vrot.slane %v1196_v35, %v4595_v60  ;;  %v1452_v59 = vsel %vm6387_vm4, %v1116_v25, 0.0 }
 0x6d2   : > { %v1777_v51 = vsel %vm1671_vm7, %v1776_v36, %v1772_v33  ;;  %1444 = vadd.xlane.f32.xlu1 %v1443_v40  ;;  %1417 = vadd.xlane.f32.xlu0 %v1416_v43  ;;  %v1107_v33 = vmul.f32 %v4477_v45, %v874_v48  ;;  %v884_v36 = vld [vmem:[%s6361_s3 + $0x348] sm:$0xff]  ;;  %v894_v48 = vld [vmem:[%s6361_s3 + $0x398] sm:$0xff] }
 0x6d3   : > { %v1241_v55 = vpop.xlane.xlu1 %1240  ;;  %v4831_v56 = vpop.xlane.xlu0 %1255  ;;  %v1117_v53 = vmul.f32 %v4489_v52, %v884_v36 }
 0x6d4   : > { %v1850_v61 = vrot.slane %v1241_v55, %v4578_v47  ;;  %v885_v55 = vld [vmem:[%s6361_s3 + $0x350] sm:$0xff] }
 0x6d5   : > { %v1455_v3 = vsel %vm6387_vm4, %v1117_v53, 0.0 }
 0x6d6   : > { %v1851_v14 = vsel %vm1664_vm6, %v1850_v61, %v1846_v58  ;;  %1447 = vadd.xlane.f32.xlu1 %v1446_v62  ;;  %1465 = vadd.xlane.f32.xlu0 %v1464_v2  ;;  %v893_v58 = vld [vmem:[%s6361_s3 + $0x390] sm:$0xff] }
 0x6d7   : > { %v1199_v19 = vpop.xlane.xlu1 %1198  ;;  %v4849_v0 = vpop.xlane.xlu0 %1345  ;;  %v1856_v20 = vsel %vm1671_vm7, %v1855_v1, %v1851_v14  ;;  %v1118_v1 = vmul.f32 %v4489_v52, %v885_v55  ;;  %v1126_v11 = vmul.f32 %v4571_v44, %v893_v58  ;;  %v886_v14 = vld [vmem:[%s6361_s3 + $0x358] sm:$0xff]  ;;  %v1075_v55 = vmul.f32 %v4445_v23, %v842_v21 }
 0x6d8   : > { %v1781_v22 = vrot.slane %v1199_v19, %v4612_v13  ;;  %v2023_v23 = vrot.slane %v4849_v0, %v4617_v17 }
 0x6d9   : > { %v1482_v36 = vsel %vm6387_vm4, %v1126_v11, 0.0  ;;  %v1329_v0 = vsel %vm6387_vm4, %v1075_v55, 0.0 }
 0x6da   : > { %v1782_v35 = vsel %vm1678_vm8, %v1781_v22, %v1777_v51  ;;  %1450 = vadd.xlane.f32.xlu1 %v1449_v29  ;;  %1468 = vadd.xlane.f32.xlu0 %v1467_v30  ;;  %v1425_v51 = vsel %vm6387_vm4, %v1107_v33, 0.0  ;;  %v1119_v29 = vmul.f32 %v4489_v52, %v886_v14  ;;  %v1127_v30 = vmul.f32 %v4571_v44, %v894_v48 }
 0x6db   : > { %v1787_v38 = vsel %vm1685_vm9, %v1786_v26, %v1782_v35  ;;  %v1247_v40 = vpop.xlane.xlu1 %1246  ;;  %v4869_v43 = vpop.xlane.xlu0 %1213  ;;  %v1458_v26 = vsel %vm6387_vm4, %v1118_v1, 0.0  ;;  %v1870_v33 = vrot.slane %v4801_v4, %v4624_v24  ;;  %v2008_v4 = vrot.slane %v4768_v39, %v4578_v47 }
 0x6dc   : > { %v4872_v49 = vsel %vm1692_vm10, %v1791_v27, %v1787_v38  ;;  %v1860_v2 = vrot.slane %v1247_v40, %v4612_v13  ;;  %v895_v38 = vld [vmem:[%s6361_s3 + $0x3a0] sm:$0xff]  ;;  %v1875_v40 = vrot.slane %v4831_v56, %v4636_v32  ;;  %v2018_v56 = vrot.slane %v4817_v10, %v4612_v13  ;;  %v896_v10 = vld [vmem:[%s6361_s3 + $0x3a8] sm:$0xff] }
 0x6dd   : > { %v1128_v58 = vmul.f32 %v4571_v44, %v895_v38  ;;  %v1461_v39 = vsel %vm6387_vm4, %v1119_v29, 0.0 }
 0x6de   : > { %1453 = vadd.xlane.f32.xlu1 %v1452_v59  ;;  %1426 = vadd.xlane.f32.xlu0 %v1425_v51  ;;  %v1861_v27 = vsel %vm1678_vm8, %v1860_v2, %v1856_v20  ;;  %v1485_v2 = vsel %vm6387_vm4, %v1127_v30, 0.0  ;;  %v1129_v30 = vmul.f32 %v4571_v44, %v896_v10 }
 0x6df   : > { %v1334_v61 = vpop.xlane.xlu1 %1333  ;;  %v4884_v62 = vpop.xlane.xlu0 %1216  ;;  %v1488_v29 = vsel %vm6387_vm4, %v1128_v58, 0.0 }
 0x6e0   : > { %v2004_v35 = vrot.slane %v1334_v61, %v4575_v46  ;;  %v1811_v55 = vrot.slane %v4884_v62, %v4668_v63 }
 0x6e2   : > { %1456 = vadd.xlane.f32.xlu1 %v1455_v3  ;;  %1480 = vadd.xlane.f32.xlu0 %v1479_v9  ;;  %v2009_v1 = vsel %vm1664_vm6, %v2008_v4, %v2004_v35  ;;  %v872_v3 = vld [vmem:[%s6361_s3 + $0x2e8] sm:$0xff] }
 0x6e3   : > { %v1250_v19 = vpop.xlane.xlu1 %1249  ;;  %v4897_v22 = vpop.xlane.xlu0 %1219 }
 0x6e4   : > { %v1865_v25 = vrot.slane %v1250_v19, %v4617_v17  ;;  %v1105_v19 = vmul.f32 %v4477_v45, %v872_v3 }
 0x6e6   : > { %v1866_v59 = vsel %vm1685_vm9, %v1865_v25, %v1861_v27  ;;  %1459 = vadd.xlane.f32.xlu1 %v1458_v26  ;;  %1483 = vadd.xlane.f32.xlu0 %v1482_v36  ;;  %v897_v27 = vld [vmem:[%s6361_s3 + $0x3b0] sm:$0xff]  ;;  %v1419_v38 = vsel %vm6387_vm4, %v1105_v19, 0.0 }
 0x6e7   : > { %v1871_v20 = vsel %vm1692_vm10, %v1870_v33, %v1866_v59  ;;  %v1340_v51 = vpop.xlane.xlu1 %1339  ;;  %v1223_v53 = vpop.xlane.xlu0 %1222  ;;  %v873_v33 = vld [vmem:[%s6361_s3 + $0x2f0] sm:$0xff]  ;;  %v1806_v59 = vrot.slane %v4869_v43, %v4661_v57  ;;  %v1816_v43 = vrot.slane %v4897_v22, %v4679_v8 }
 0x6e8   : > { %v2013_v54 = vrot.slane %v1340_v51, %v4595_v60  ;;  %v4924_v61 = vsel %vm6375_vm11, %v1875_v40, %v1871_v20  ;;  %v1106_v40 = vmul.f32 %v4477_v45, %v873_v33  ;;  %v1491_v20 = vsel %vm6387_vm4, %v1129_v30, 0.0  ;;  %v898_v45 = vld [vmem:[%s6361_s3 + $0x3b8] sm:$0xff] }
 0x6e9   : > { %v1130_v51 = vmul.f32 %v4571_v44, %v897_v27  ;;  %v1131_v22 = vmul.f32 %v4571_v44, %v898_v45 }
 0x6ea   : > { %v2014_v9 = vsel %vm1671_vm7, %v2013_v54, %v2009_v1  ;;  %1462 = vadd.xlane.f32.xlu1 %v1461_v39  ;;  %1486 = vadd.xlane.f32.xlu0 %v1485_v2  ;;  %v889_v54 = vld [vmem:[%s6361_s3 + $0x370] sm:$0xff]  ;;  %v1821_v39 = vrot.slane %v1223_v53, %v4700_v31  ;;  %v1422_v2 = vsel %vm6387_vm4, %v1106_v40, 0.0 }
 0x6eb   : > { %v2019_v11 = vsel %vm1678_vm8, %v2018_v56, %v2014_v9  ;;  %v1208_v14 = vpop.xlane.xlu1 %1207  ;;  %v1226_v48 = vpop.xlane.xlu0 %1225  ;;  %v1122_v3 = vmul.f32 %v4489_v52, %v889_v54  ;;  %v1494_v10 = vsel %vm6387_vm4, %v1130_v51, 0.0 }
 0x6ec   : > { %v4943_v25 = vsel %vm1685_vm9, %v2023_v23, %v2019_v11  ;;  %v1796_v26 = vrot.slane %v1208_v14, %v4636_v32  ;;  %v1826_v23 = vrot.slane %v1226_v48, %v4718_v50  ;;  %v890_v11 = vld [vmem:[%s6361_s3 + $0x378] sm:$0xff]  ;;  %v899_v48 = vld [vmem:[%s6361_s3 + $0x3c0] sm:$0xff] }
 0x6ed   : > { %v1123_v27 = vmul.f32 %v4489_v52, %v890_v11  ;;  %v900_v52 = vld [vmem:[%s6361_s3 + $0x3c8] sm:$0xff] }
 0x6ee   : > { %1330 = vadd.xlane.f32.xlu1 %v1329_v0  ;;  %1489 = vadd.xlane.f32.xlu0 %v1488_v29  ;;  %v1797_v4 = vsel %vm6375_vm11, %v1796_v26, %v4872_v49  ;;  %vm6376_vm11 = vcmask 1041409   ;;  %v1133_v45 = vmul.f32 %v4571_v44, %v900_v52 }
 0x6ef   : > { %v1211_v35 = vpop.xlane.xlu1 %1210  ;;  %v1229_v36 = vpop.xlane.xlu0 %1228  ;;  %v1473_v54 = vsel %vm6387_vm4, %v1123_v27, 0.0 }
 0x6f0   : > { %v1801_v21 = vrot.slane %v1211_v35, %v4657_v41  ;;  %v1831_v14 = vrot.slane %v1229_v36, %v4736_v16  ;;  %v1470_v36 = vsel %vm6387_vm4, %v1122_v3, 0.0 }
 0x6f2   : > { %v1802_v58 = vsel %vm1706_vm12, %v1801_v21, %v1797_v4  ;;  %1420 = vadd.xlane.f32.xlu1 %v1419_v38  ;;  %1492 = vadd.xlane.f32.xlu0 %v1491_v20  ;;  %v1497_v21 = vsel %vm6387_vm4, %v1131_v22, 0.0  ;;  %v1132_v38 = vmul.f32 %v4571_v44, %v899_v48 }
 0x6f3   : > { %v1807_v49 = vsel %vm1713_vm13, %v1806_v59, %v1802_v58  ;;  %v4976_v56 = vpop.xlane.xlu1 %1258  ;;  %v1232_v1 = vpop.xlane.xlu0 %1231  ;;  %v891_v59 = vld [vmem:[%s6361_s3 + $0x380] sm:$0xff] }
 0x6f4   : > { %v1812_v62 = vsel %vm1720_vm14, %v1811_v55, %v1807_v49  ;;  %v1836_v26 = vrot.slane %v1232_v1, %v4754_v37  ;;  %v1500_v55 = vsel %vm6387_vm4, %v1132_v38, 0.0  ;;  %v1124_v58 = vmul.f32 %v4571_v44, %v891_v59 }
 0x6f5   : > { %v1817_v9 = vsel %vm1727_vm15, %v1816_v43, %v1812_v62  ;;  %v902_v43 = vld [vmem:[%s6361_s3 + $0x3d8] sm:$0xff]  ;;  %v1503_v62 = vsel %vm6387_vm4, %v1133_v45, 0.0 }
 0x6f6   : > { %v1822_v53 = vsel %vm1734_vm0, %v1821_v39, %v1817_v9  ;;  %1423 = vadd.xlane.f32.xlu1 %v1422_v2  ;;  %1495 = vadd.xlane.f32.xlu0 %v1494_v10  ;;  %v1476_v39 = vsel %vm6387_vm4, %v1124_v58, 0.0  ;;  %v1135_v2 = vmul.f32 %v4571_v44, %v902_v43  ;;  %v904_v9 = vld [vmem:[%s6361_s3 + $0x3e8] sm:$0xff] }
 0x6f7   : > { %v1827_v19 = vsel %vm1741_vm1, %v1826_v23, %v1822_v53  ;;  %v4996_v0 = vpop.xlane.xlu1 %1348  ;;  %v1235_v29 = vpop.xlane.xlu0 %1234  ;;  %v903_v23 = vld [vmem:[%s6361_s3 + $0x3e0] sm:$0xff]  ;;  %v1137_v48 = vmul.f32 %v4571_v44, %v904_v9 }
 0x6f8   : > { %v1832_v30 = vsel %vm1748_vm2, %v1831_v14, %v1827_v19  ;;  %v1841_v33 = vrot.slane %v1235_v29, %v4772_v42  ;;  %v1509_v11 = vsel %vm6387_vm4, %v1135_v2, 0.0  ;;  %v1136_v14 = vmul.f32 %v4571_v44, %v903_v23  ;;  %v906_v19 = vld [vmem:[%s6361_s3 + $0x3f8] sm:$0xff] }
 0x6f9   : > { %v1837_v35 = vsel %vm1755_vm3, %v1836_v26, %v1832_v30  ;;  %v905_v26 = vld [vmem:[%s6361_s3 + $0x3f0] sm:$0xff]  ;;  %v1515_v27 = vsel %vm6387_vm4, %v1137_v48, 0.0 }
 0x6fa   : > { %v1842_v40 = vsel %vm1762_vm5, %v1841_v33, %v1837_v35  ;;  %1471 = vadd.xlane.f32.xlu1 %v1470_v36  ;;  %1498 = vadd.xlane.f32.xlu0 %v1497_v21  ;;  %v1512_v33 = vsel %vm6387_vm4, %v1136_v14, 0.0  ;;  %v1139_v35 = vmul.f32 %v4571_v44, %v906_v19  ;;  %v1138_v36 = vmul.f32 %v4571_v44, %v905_v26 }
 0x6fb   : > { %v5014_v4 = vsel %vm6376_vm11, %v1842_v40, %v4793_v6  ;;  %v5016_v20 = vpop.xlane.xlu1 %1261  ;;  %v5018_v51 = vpop.xlane.xlu0 %1375  ;;  %v901_v6 = vld [vmem:[%s6361_s3 + $0x3d0] sm:$0xff]  ;;  %vm6386_vm11 = vcmask 1042434  }
 0x6fc   : > { %v1134_v3 = vmul.f32 %v4571_v44, %v901_v6  ;;  %v1521_v40 = vsel %vm6387_vm4, %v1139_v35, 0.0  ;;  %v1518_v59 = vsel %vm6387_vm4, %v1138_v36, 0.0 }
 0x6fe   : > { %1474 = vadd.xlane.f32.xlu1 %v1473_v54  ;;  %1501 = vadd.xlane.f32.xlu0 %v1500_v55  ;;  %v1506_v53 = vsel %vm6387_vm4, %v1134_v3, 0.0  ;;  %vm2323_vm4 = vcmask 1044484  }
 0x6ff   : > { %v5030_v49 = vpop.xlane.xlu1 %1351  ;;  %v5032_v1 = vpop.xlane.xlu0 %1378 }
 0x702   : > { %1477 = vadd.xlane.f32.xlu1 %v1476_v39  ;;  %1504 = vadd.xlane.f32.xlu0 %v1503_v62 }
 0x703   : > { %v1265_v10 = vpop.xlane.xlu1 %1264  ;;  %v5044_v22 = vpop.xlane.xlu0 %1288 }
 0x704   : > { %v1890_v19 = vrot.slane %v1265_v10, %v4668_v63  ;;  %v1929_v15 = vrot.slane %v5044_v22, %v4578_v47 }
 0x706   : > { %1510 = vadd.xlane.f32.xlu1 %v1509_v11  ;;  %1507 = vadd.xlane.f32.xlu0 %v1506_v53  ;;  %v1880_v11 = vrot.slane %v4976_v56, %v4657_v41  ;;  %v1885_v53 = vrot.slane %v5016_v20, %v4661_v57 }
 0x707   : > { %v5056_v29 = vpop.xlane.xlu1 %1354  ;;  %v5058_v30 = vpop.xlane.xlu0 %1291 }
 0x70a   : > { %1513 = vadd.xlane.f32.xlu1 %v1512_v33  ;;  %1516 = vadd.xlane.f32.xlu0 %v1515_v27  ;;  %v1881_v33 = vsel %vm1706_vm12, %v1880_v11, %v4924_v61 }
 0x70b   : > { %v1268_v21 = vpop.xlane.xlu1 %1267  ;;  %v5064_v38 = vpop.xlane.xlu0 %1294  ;;  %v1886_v35 = vsel %vm1713_vm13, %v1885_v53, %v1881_v33 }
 0x70c   : > { %v1895_v26 = vrot.slane %v1268_v21, %v4679_v8  ;;  %v1891_v20 = vsel %vm1720_vm14, %v1890_v19, %v1886_v35  ;;  %v1939_v22 = vrot.slane %v5064_v38, %v4612_v13 }
 0x70e   : > { %1522 = vadd.xlane.f32.xlu1 %v1521_v40  ;;  %1519 = vadd.xlane.f32.xlu0 %v1518_v59  ;;  %v1896_v10 = vsel %vm1727_vm15, %v1895_v26, %v1891_v20 }
 0x70f   : > { %v5068_v52 = vpop.xlane.xlu1 %1357  ;;  %v5070_v54 = vpop.xlane.xlu0 %1381 }
 0x713   : > { %v1271_v55 = vpop.xlane.xlu1 %1270  ;;  %v5072_v58 = vpop.xlane.xlu0 %1429 }
 0x714   : > { %v1900_v27 = vrot.slane %v1271_v55, %v4700_v31 }
 0x716   : > { %v1901_v61 = vsel %vm1734_vm0, %v1900_v27, %v1896_v10 }
 0x717   : > { %v5074_v45 = vpop.xlane.xlu1 %1360  ;;  %v5076_v44 = vpop.xlane.xlu0 %1435 }
 0x718   : > { %6396 = vst [vmem:[#allocation10_spill] sm:$0xff] %v5076_v44 }
 0x71b   : > { %v1274_v43 = vpop.xlane.xlu1 %1273  ;;  %v5078_v6 = vpop.xlane.xlu0 %1303 }
 0x71c   : > { %v1905_v36 = vrot.slane %v1274_v43, %v4718_v50 }
 0x71e   : > { %v1906_v55 = vsel %vm1741_vm1, %v1905_v36, %v1901_v61 }
 0x71f   : > { %v5080_v39 = vpop.xlane.xlu1 %1363  ;;  %v5082_v62 = vpop.xlane.xlu0 %1393 }
 0x723   : > { %v1277_v2 = vpop.xlane.xlu1 %1276  ;;  %v5084_v3 = vpop.xlane.xlu0 %1306 }
 0x724   : > { %v1910_v59 = vrot.slane %v1277_v2, %v4736_v16 }
 0x726   : > { %v1911_v43 = vsel %vm1748_vm2, %v1910_v59, %v1906_v55 }
 0x727   : > { %v5086_v23 = vpop.xlane.xlu1 %1366  ;;  %v5088_v9 = vpop.xlane.xlu0 %1396 }
 0x72b   : > { %v1280_v14 = vpop.xlane.xlu1 %1279  ;;  %v5094_v48 = vpop.xlane.xlu0 %1309 }
 0x72c   : > { %v1915_v21 = vrot.slane %v1280_v14, %v4754_v37 }
 0x72e   : > { %v1916_v7 = vsel %vm1755_vm3, %v1915_v21, %v1911_v43 }
 0x72f   : > { %v5103_v56 = vpop.xlane.xlu1 %1369  ;;  %v5105_v40 = vpop.xlane.xlu0 %1399 }
 0x733   : > { %v1283_v11 = vpop.xlane.xlu1 %1282  ;;  %v1313_v53 = vpop.xlane.xlu0 %1312 }
 0x734   : > { %v1920_v33 = vrot.slane %v1283_v11, %v4772_v42 }
 0x736   : > { %v1921_v19 = vsel %vm1762_vm5, %v1920_v33, %v1916_v7 }
 0x737   : > { %v5119_v2 = vsel %vm6386_vm11, %v1921_v19, %v5014_v4  ;;  %v5121_v14 = vpop.xlane.xlu1 %1372  ;;  %v5123_v26 = vpop.xlane.xlu0 %1402  ;;  %vm6403_vm11 = vcmask 458112  }
 0x73b   : > { %v1286_v27 = vpop.xlane.xlu1 %1285  ;;  %v1316_v35 = vpop.xlane.xlu0 %1315 }
 0x73c   : > { %v1925_v5 = vrot.slane %v1286_v27, %v4575_v46 }
 0x73e   : > { %v1930_v28 = vsel %vm1664_vm6, %v1929_v15, %v1925_v5 }
 0x73f   : > { %v5125_v36 = vpop.xlane.xlu1 %1384  ;;  %v5127_v20 = vpop.xlane.xlu0 %1405 }
 0x740   : > { %6397 = vst [vmem:[#allocation11_spill] sm:$0xff] %v5127_v20 }
 0x743   : > { %v1298_v59 = vpop.xlane.xlu1 %1297  ;;  %v5129_v10 = vpop.xlane.xlu0 %1318 }
 0x744   : > { %v1944_v20 = vrot.slane %v1298_v59, %v4617_v17  ;;  %v1954_v59 = vrot.slane %v5078_v6, %v4636_v32  ;;  %v2028_v6 = vrot.slane %v4996_v0, %v4624_v24 }
 0x746   : > { %v2029_v0 = vsel %vm1692_vm10, %v2028_v6, %v4943_v25  ;;  %v1979_v6 = vrot.slane %v5129_v10, %v4700_v31 }
 0x747   : > { %v5131_v21 = vpop.xlane.xlu1 %1387  ;;  %v5133_v7 = vpop.xlane.xlu0 %1408 }
 0x748   : > { %6398 = vst [vmem:[#allocation12_spill] sm:$0xff] %v5133_v7 }
 0x74b   : > { %v5135_v61 = vpop.xlane.xlu1 %1432  ;;  %v5137_v4 = vpop.xlane.xlu0 %1321 }
 0x74c   : > { %v1984_v10 = vrot.slane %v5137_v4, %v4718_v50  ;;  %v2073_v4 = vrot.slane %v5018_v51, %v4754_v37  ;;  %v2078_v51 = vrot.slane %v5032_v1, %v4772_v42  ;;  %v2107_v1 = vrot.slane %v5088_v9, %v4624_v24 }
 0x74d   : > { %v2162_v9 = vrot.slane %v5072_v58, %v4575_v46 }
 0x74f   : > { %v1301_v55 = vpop.xlane.xlu1 %1300  ;;  %v5139_v11 = vpop.xlane.xlu0 %1411 }
 0x750   : > { %6399 = vst [vmem:[#allocation13_spill] sm:$0xff] %v5139_v11  ;;  %v1934_v11 = vrot.slane %v5058_v30, %v4595_v60  ;;  %v1949_v27 = vrot.slane %v1301_v55, %v4624_v24 }
 0x752   : > { %v1935_v7 = vsel %vm1671_vm7, %v1934_v11, %v1930_v28 }
 0x753   : > { %v5141_v43 = vpop.xlane.xlu1 %1390  ;;  %v5143_v33 = vpop.xlane.xlu0 %1324 }
 0x757   : > { %v5145_v19 = vpop.xlane.xlu1 %1438  ;;  %v5147_v34 = vpop.xlane.xlu0 %1414 }
 0x758   : > { %6400 = vst [vmem:[#allocation14_spill] sm:$0xff] %v5147_v34 }
 0x75b   : > { %v5152_v18 = vpop.xlane.xlu1 %1441  ;;  %v5154_v12 = vpop.xlane.xlu0 %1327 }
 0x75c   : > { %6401 = vst [vmem:[#allocation15_spill] sm:$0xff] %v5152_v18  ;;  %v1940_v18 = vsel %vm1678_vm8, %v1939_v22, %v1935_v7  ;;  %v1959_v7 = vrot.slane %v5084_v3, %v4657_v41  ;;  %v2038_v3 = vrot.slane %v5056_v29, %v4657_v41  ;;  %v2053_v29 = vrot.slane %v5080_v39, %v4679_v8 }
 0x75d   : > { %v1945_v5 = vsel %vm1685_vm9, %v1944_v20, %v1940_v18  ;;  %v1964_v20 = vrot.slane %v5094_v48, %v4661_v57 }
 0x75e   : > { %v1950_v28 = vsel %vm1692_vm10, %v1949_v27, %v1945_v5  ;;  %v2033_v5 = vrot.slane %v5030_v49, %v4636_v32  ;;  %v2048_v49 = vrot.slane %v5074_v45, %v4668_v63 }
 0x75f   : > { %v5161_v44 = vpop.xlane.xlu1 %1444  ;;  %v5163_v34 = vpop.xlane.xlu0 %1417  ;;  %v1955_v11 = vsel %vm6403_vm11, %v1954_v59, %v1950_v28  ;;  %v1969_v28 = vrot.slane %v1313_v53, %v4668_v63  ;;  %v1974_v53 = vrot.slane %v1316_v35, %v4679_v8  ;;  %v2063_v35 = vrot.slane %v5103_v56, %v4718_v50 }
 0x760   : > { %6402 = vst [vmem:[#allocation16_spill] sm:$0xff] %v5163_v34  ;;  %v1960_v18 = vsel %vm1706_vm12, %v1959_v7, %v1955_v11  ;;  %v2043_v11 = vrot.slane %v5068_v52, %v4661_v57  ;;  %v2058_v52 = vrot.slane %v5086_v23, %v4700_v31  ;;  %v2092_v56 = vrot.slane %v5131_v21, %v4595_v60 }
 0x761   : > { %v1965_v27 = vsel %vm1713_vm13, %v1964_v20, %v1960_v18  ;;  %v2034_v18 = vsel %vm6403_vm11, %v2033_v5, %v2029_v0  ;;  %v2068_v5 = vrot.slane %v5121_v14, %v4736_v16  ;;  %v2083_v14 = vrot.slane %v5070_v54, %v4575_v46 }
 0x762   : > { %v1970_v7 = vsel %vm1720_vm14, %v1969_v28, %v1965_v27  ;;  %v2039_v20 = vsel %vm1706_vm12, %v2038_v3, %v2034_v18  ;;  %v2087_v3 = vrot.slane %v5125_v36, %v4578_v47  ;;  %v2097_v36 = vrot.slane %v5141_v43, %v4612_v13 }
 0x763   : > { %v5170_v15 = vpop.xlane.xlu1 %1447  ;;  %v5172_v30 = vpop.xlane.xlu0 %1465  ;;  %v1975_v27 = vsel %vm1727_vm15, %v1974_v53, %v1970_v7  ;;  %v2044_v45 = vsel %vm1713_vm13, %v2043_v11, %v2039_v20  ;;  %v1994_v21 = vrot.slane %v5154_v12, %v4754_v37  ;;  %v1989_v54 = vrot.slane %v5143_v33, %v4736_v16 }
 0x764   : > { %v2049_v39 = vsel %vm1720_vm14, %v2048_v49, %v2044_v45  ;;  %v1980_v7 = vsel %vm1734_vm0, %v1979_v6, %v1975_v27  ;;  %v2088_v20 = vsel %vm1664_vm6, %v2087_v3, %v2083_v14  ;;  %vm6388_vm11 = vcmask 1043459  }
 0x765   : > { %v2054_v23 = vsel %vm1727_vm15, %v2053_v29, %v2049_v39  ;;  %v1985_v29 = vsel %vm1741_vm1, %v1984_v10, %v1980_v7  ;;  %v2102_v33 = vrot.slane %v5082_v62, %v4617_v17  ;;  %v2112_v14 = vrot.slane %v5105_v40, %v4636_v32 }
 0x766   : > { %v2059_v11 = vsel %vm1734_vm0, %v2058_v52, %v2054_v23  ;;  %v2093_v52 = vsel %vm1671_vm7, %v2092_v56, %v2088_v20  ;;  %v1990_v12 = vsel %vm1748_vm2, %v1989_v54, %v1985_v29  ;;  %v2117_v29 = vrot.slane %v5123_v26, %v4657_v41 }
 0x767   : > { %v5178_v34 = vpop.xlane.xlu1 %1450  ;;  %v5180_v38 = vpop.xlane.xlu0 %1468  ;;  %v2064_v53 = vsel %vm1741_vm1, %v2063_v35, %v2059_v11  ;;  %v2098_v35 = vsel %vm1678_vm8, %v2097_v36, %v2093_v52  ;;  %v1995_v39 = vsel %vm1755_vm3, %v1994_v21, %v1990_v12  ;;  %v2176_v20 = vrot.slane %v5145_v19, %v4612_v13 }
 0x768   : > { %v2069_v18 = vsel %vm1748_vm2, %v2068_v5, %v2064_v53  ;;  %v2103_v3 = vsel %vm1685_vm9, %v2102_v33, %v2098_v35  ;;  %v2186_v35 = vrot.slane %v5161_v44, %v4624_v24  ;;  %v2191_v19 = vrot.slane %v5170_v15, %v4636_v32 }
 0x769   : > { %v2074_v45 = vsel %vm1755_vm3, %v2073_v4, %v2069_v18  ;;  %v2108_v10 = vsel %vm1692_vm10, %v2107_v1, %v2103_v3  ;;  %v2196_v3 = vrot.slane %v5178_v34, %v4657_v41 }
 0x76a   : > { %v2079_v23 = vsel %vm1762_vm5, %v2078_v51, %v2074_v45  ;;  %v6407_v45 = vld [vmem:[#allocation15_spill] sm:$0xff] }
 0x76b   : > { %v5187_v55 = vpop.xlane.xlu1 %1453  ;;  %v5189_v22 = vpop.xlane.xlu0 %1426  ;;  %v2181_v26 = vrot.slane %v6407_v45, %v4617_v17 }
 0x76f   : > { %v5199_v59 = vpop.xlane.xlu1 %1456  ;;  %v5201_v48 = vpop.xlane.xlu0 %1480 }
 0x773   : > { %v5218_v28 = vpop.xlane.xlu1 %1459  ;;  %v5220_v25 = vpop.xlane.xlu0 %1483 }
 0x774   : > { %v2211_v34 = vrot.slane %v5218_v28, %v4679_v8  ;;  %v2250_v28 = vrot.slane %v5220_v25, %v4595_v60 }
 0x777   : > { %v5239_v0 = vpop.xlane.xlu1 %1462  ;;  %v5241_v49 = vpop.xlane.xlu0 %1486 }
 0x77b   : > { %v1331_v27 = vpop.xlane.xlu1 %1330  ;;  %v5258_v43 = vpop.xlane.xlu0 %1489 }
 0x77c   : > { %v1999_v6 = vrot.slane %v1331_v27, %v4772_v42  ;;  %v6406_v27 = vld [vmem:[#allocation11_spill] sm:$0xff] }
 0x77d   : > { %v2122_v58 = vrot.slane %v6406_v27, %v4661_v57 }
 0x77e   : > { %v2000_v5 = vsel %vm1762_vm5, %v1999_v6, %v1995_v39  ;;  %v6408_v39 = vld [vmem:[#allocation12_spill] sm:$0xff] }
 0x77f   : > { %v2322_v7 = vsel %vm6388_vm11, %v2000_v5, %v5119_v2  ;;  %v5274_v11 = vpop.xlane.xlu1 %1420  ;;  %v5276_v56 = vpop.xlane.xlu0 %1492  ;;  %v2166_v2 = vrot.slane %v5135_v61, %v4578_v47  ;;  %vm6404_vm11 = vcmask 458112   ;;  %v6405_v61 = vld [vmem:[#allocation10_spill] sm:$0xff]  ;;  %v2127_v5 = vrot.slane %v6408_v39, %v4668_v63 }
 0x780   : > { %v5281_v62 = vsel %vm2323_vm4, %v2079_v23, %v2322_v7  ;;  %v2113_v18 = vsel %vm6404_vm11, %v2112_v14, %v2108_v10  ;;  %v2171_v52 = vrot.slane %v6405_v61, %v4595_v60  ;;  %v2201_v7 = vrot.slane %v5187_v55, %v4661_v57  ;;  %v6409_v14 = vld [vmem:[#allocation13_spill] sm:$0xff]  ;;  %v6410_v61 = vld [vmem:[#allocation14_spill] sm:$0xff] }
 0x781   : > { %v2167_v40 = vsel %vm1664_vm6, %v2166_v2, %v2162_v9  ;;  %v2118_v54 = vsel %vm1706_vm12, %v2117_v29, %v2113_v18  ;;  %v2206_v10 = vrot.slane %v5199_v59, %v4668_v63  ;;  %v2132_v2 = vrot.slane %v6409_v14, %v4679_v8 }
 0x782   : > { %v2172_v12 = vsel %vm1671_vm7, %v2171_v52, %v2167_v40  ;;  %v2123_v6 = vsel %vm1713_vm13, %v2122_v58, %v2118_v54  ;;  %v2245_v55 = vrot.slane %v5201_v48, %v4578_v47  ;;  %v2137_v52 = vrot.slane %v6410_v61, %v4700_v31  ;;  %v6411_v58 = vld [vmem:[#allocation16_spill] sm:$0xff] }
 0x783   : > { %v5286_v53 = vpop.xlane.xlu1 %1423  ;;  %v5288_v36 = vpop.xlane.xlu0 %1495  ;;  %v2177_v23 = vsel %vm1678_vm8, %v2176_v20, %v2172_v12  ;;  %v2128_v1 = vsel %vm1720_vm14, %v2127_v5, %v2123_v6  ;;  %v2216_v20 = vrot.slane %v5239_v0, %v4700_v31  ;;  %v2142_v45 = vrot.slane %v6411_v58, %v4718_v50 }
 0x784   : > { %v2182_v44 = vsel %vm1685_vm9, %v2181_v26, %v2177_v23  ;;  %v2133_v54 = vsel %vm1727_vm15, %v2132_v2, %v2128_v1  ;;  %v2255_v48 = vrot.slane %v5241_v49, %v4612_v13  ;;  %v2260_v26 = vrot.slane %v5258_v43, %v4617_v17 }
 0x785   : > { %v2187_v15 = vsel %vm1692_vm10, %v2186_v35, %v2182_v44  ;;  %v2147_v35 = vrot.slane %v5274_v11, %v4736_v16  ;;  %v2152_v13 = vrot.slane %v5286_v53, %v4754_v37  ;;  %v2138_v39 = vsel %vm1734_vm0, %v2137_v52, %v2133_v54 }
 0x786   : > { %v2192_v18 = vsel %vm6404_vm11, %v2191_v19, %v2187_v15  ;;  %v2265_v19 = vrot.slane %v5276_v56, %v4624_v24  ;;  %v2221_v17 = vrot.slane %v5172_v30, %v4718_v50  ;;  %v2270_v43 = vrot.slane %v5288_v36, %v4636_v32 }
 0x787   : > { %v5297_v21 = vpop.xlane.xlu1 %1471  ;;  %v5299_v4 = vpop.xlane.xlu0 %1498  ;;  %v2197_v40 = vsel %vm1706_vm12, %v2196_v3, %v2192_v18  ;;  %v2143_v5 = vsel %vm1741_vm1, %v2142_v45, %v2138_v39  ;;  %v2226_v24 = vrot.slane %v5180_v38, %v4736_v16 }
 0x788   : > { %v2202_v27 = vsel %vm1713_vm13, %v2201_v7, %v2197_v40  ;;  %v2275_v56 = vrot.slane %v5299_v4, %v4657_v41  ;;  %v2148_v3 = vsel %vm1748_vm2, %v2147_v35, %v2143_v5  ;;  %v2231_v38 = vrot.slane %v5297_v21, %v4754_v37 }
 0x789   : > { %v2207_v47 = vsel %vm1720_vm14, %v2206_v10, %v2202_v27  ;;  %v2153_v7 = vsel %vm1755_vm3, %v2152_v13, %v2148_v3  ;;  %v2157_v4 = vrot.slane %v5189_v22, %v4772_v42 }
 0x78a   : > { %v2212_v0 = vsel %vm1727_vm15, %v2211_v34, %v2207_v47 }
 0x78b   : > { %v5317_v51 = vpop.xlane.xlu1 %1474  ;;  %v1502_v33 = vpop.xlane.xlu0 %1501  ;;  %v2217_v6 = vsel %vm1734_vm0, %v2216_v20, %v2212_v0  ;;  %v2158_v21 = vsel %vm1762_vm5, %v2157_v4, %v2153_v7  ;;  %v6415_v0 = vld [vmem:[#allocation8_spill] sm:$0xff] }
 0x78c   : > { %v2222_v23 = vsel %vm1741_vm1, %v2221_v17, %v2217_v6  ;;  %v2280_v30 = vrot.slane %v1502_v33, %v4661_v57  ;;  %v2236_v15 = vrot.slane %v5317_v51, %v4772_v42 }
 0x78d   : > { %v2227_v2 = vsel %vm1748_vm2, %v2226_v24, %v2222_v23 }
 0x78e   : > { %v2232_v51 = vsel %vm1755_vm3, %v2231_v38, %v2227_v2 }
 0x78f   : > { %v1478_v9 = vpop.xlane.xlu1 %1477  ;;  %v1505_v29 = vpop.xlane.xlu0 %1504 }
 0x790   : > { %v2241_v59 = vrot.slane %v1478_v9, %v4575_v46  ;;  %v2285_v41 = vrot.slane %v1505_v29, %v4668_v63 }
 0x792   : > { %v2246_v46 = vsel %vm1664_vm6, %v2245_v55, %v2241_v59  ;;  %vm6412_vm6 = vmmov %vm6404_vm11  ;;  %v6413_v59 = vld [vmem:[#allocation9_spill] sm:$0xff] }
 0x793   : > { %v2251_v60 = vsel %vm1671_vm7, %v2250_v28, %v2246_v46  ;;  %v1511_v25 = vpop.xlane.xlu1 %1510  ;;  %v1508_v12 = vpop.xlane.xlu0 %1507  ;;  %vm2325_vm7 = vcmask 1045509  }
 0x794   : > { %v2256_v49 = vsel %vm1678_vm8, %v2255_v48, %v2251_v60  ;;  %v2290_v33 = vrot.slane %v1508_v12, %v4679_v8  ;;  %v2295_v14 = vrot.slane %v1511_v25, %v4700_v31  ;;  %v2237_v31 = vsel %vm1762_vm5, %v2236_v15, %v2232_v51 }
 0x795   : > { %v2261_v11 = vsel %vm1685_vm9, %v2260_v26, %v2256_v49  ;;  %vm2327_vm8 = vcmask 1046534   ;;  %vm2329_vm9 = vcmask 1047559   ;;  %v2326_v54 = vsel %vm2325_vm7, %v2158_v21, %v5281_v62  ;;  %v6414_v62 = vld [vmem:[#allocation6_spill] sm:$0xff] }
 0x796   : > { %v2266_v53 = vsel %vm1692_vm10, %v2265_v19, %v2261_v11  ;;  %vm1526_vm10 = vcmp.lt.s32.totalorder %v6413_v59, 8  ;;  %v2412_v46 = vsub.s32 1, %v6414_v62  ;;  %v2479_v35 = vsub.s32 2, %v6414_v62 }
 0x797   : > { %v2271_v32 = vsel %vm6412_vm6, %v2270_v43, %v2266_v53  ;;  %v1514_v36 = vpop.xlane.xlu1 %1513  ;;  %v1517_v44 = vpop.xlane.xlu0 %1516  ;;  %v2546_v12 = vsub.s32 3, %v6414_v62  ;;  %v2613_v6 = vsub.s32 4, %v6414_v62  ;;  %v2680_v49 = vsub.s32 5, %v6414_v62 }
 0x798   : > { %v2276_v1 = vsel %vm1706_vm12, %v2275_v56, %v2271_v32  ;;  %v2300_v22 = vrot.slane %v1514_v36, %v4718_v50  ;;  %v2305_v8 = vrot.slane %v1517_v44, %v4736_v16  ;;  %v2747_v17 = vsub.s32 6, %v6414_v62 }
 0x799   : > { %v2281_v57 = vsel %vm1713_vm13, %v2280_v30, %v2276_v1  ;;  %v2814_v11 = vsub.s32 7, %v6414_v62 }
 0x79a   : > { %v2286_v10 = vsel %vm1720_vm14, %v2285_v41, %v2281_v57 }
 0x79b   : > { %v2291_v63 = vsel %vm1727_vm15, %v2290_v33, %v2286_v10  ;;  %v1523_v18 = vpop.xlane.xlu1 %1522  ;;  %v1520_v34 = vpop.xlane.xlu0 %1519 }
 0x79c   : > { %v2296_v9 = vsel %vm1734_vm0, %v2295_v14, %v2291_v63  ;;  %v2310_v29 = vrot.slane %v1520_v34, %v4754_v37  ;;  %v2315_v20 = vrot.slane %v1523_v18, %v4772_v42  ;;  %v2328_v37 = vsel %vm2327_vm8, %v2237_v31, %v2326_v54 }
 0x79d   : > { %v2301_v40 = vsel %vm1741_vm1, %v2300_v22, %v2296_v9 }
 0x79e   : > { %v2306_v55 = vsel %vm1748_vm2, %v2305_v8, %v2301_v40  ;;  %v3809_v40 = vld [vmem:[%s6361_s3 + $0x8] sm:$0xff] }
 0x79f   : > { %v2311_v50 = vsel %vm1755_vm3, %v2310_v29, %v2306_v55 }
 0x7a0   : > { %v2316_v16 = vsel %vm1762_vm5, %v2315_v20, %v2311_v50  ;;  %v3810_v20 = vld [vmem:[%s6361_s3] sm:$0xff]  ;;  %vm6416_vm5 = vcmask 261120  }
 0x7a1   : > { %v2330_v61 = vsel %vm2329_vm9, %v2316_v16, %v2328_v37  ;;  %vm6417_vm12 = vmmov %vm6416_vm5 }
 0x7a2   : > { %v2332_v52 = vsel %vm1526_vm10, %v2330_v61, -1e+30  ;;  %v3811_v61 = vld [vmem:[%s6361_s3 + $0x80] sm:$0xff]  ;;  %vm6418_vm13 = vmmov %vm6416_vm5 }
 0x7a3   : > { %2333 = vmax.xlane.f32.xlu0 %v2332_v52  ;;  %vm6419_vm14 = vmmov %vm6416_vm5 }
 0x7a4   : > { %vm6420_vm15 = vmmov %vm6416_vm5 }
 0x7a5   : > { %vm6421_vm0 = vmmov %vm6416_vm5 }
 0x7a6   : > { %vm6422_vm1 = vmmov %vm6421_vm0 }
 0x7a7   : > { %vm6423_vm2 = vmmov %vm6421_vm0 }
 0x7a8   : > { %vm6424_vm3 = vmmov %vm6421_vm0 }
 0x7a9   : > { %vm6425_vm11 = vmmov %vm6421_vm0 }
 0x7aa   : > { %vm6426_vm6 = vmmov %vm6421_vm0 }
 0x7ab   : > { %vm6427_vm10 = vmmov %vm6421_vm0 }
 0x830   : > { %v2334_v27 = vpop.xlane.xlu0 %2333 }
 0x831   : > { %v2335_v28 = vsub.f32 %v2332_v52, %v2334_v27  ;;  %v3812_v27 = vld [vmem:[%s6361_s3 + $0x88] sm:$0xff] }
 0x833   : > { %v2336_v42 = vmul.f32 1.442695, %v2335_v28 }
 0x835   : > { %3801 = vpow2.f32 %v2336_v42  ;;  %v3813_v42 = vld [vmem:[%s6361_s3 + $0x100] sm:$0xff] }
 0x83f   : > { %v3802_v58 = vpop.eup %3801 }
 0x840   : > { %2338 = vadd.xlane.f32.xlu1 %v3802_v58 }
 0x8cd   : > { %v2339_v45 = vpop.xlane.xlu1 %2338 }
 0x8ce   : > { %3803 = vrcp.f32 %v2339_v45  ;;  %v3814_v45 = vld [vmem:[%s6361_s3 + $0x108] sm:$0xff] }
 0x8d8   : > { %v3804_v47 = vpop.eup %3803 }
 0x8d9   : > { %v2341_v48 = vmul.f32 %v3804_v47, %v3802_v58 }
 0x8db   : > { %2342 = vst [vmem:[%s494_s30] sm:$0xff] %v2341_v48  ;;  %v5421_v26 = vrot.slane %v2341_v48, %v6415_v0  ;;  %v5426_v60 = vrot.slane %v2341_v48, %v2412_v46  ;;  %v5430_v25 = vrot.slane %v2341_v48, %v2479_v35  ;;  %v5438_v19 = vrot.slane %v2341_v48, %v2546_v12  ;;  %v3816_v46 = vld [vmem:[%s6361_s3 + $0x90] sm:$0xff]  ;;  %s6547_s30 = scalar_lea.vmem %s6370_s12, %s4045_s21 }
 0x8dc   : > { %v5442_v13 = vrot.slane %v2341_v48, %v2613_v6  ;;  %v5451_v39 = vrot.slane %v2341_v48, %v2680_v49  ;;  %v5458_v43 = vrot.slane %v2341_v48, %v2747_v17  ;;  %v5467_v5 = vrot.slane %v2341_v48, %v2814_v11  ;;  %v3815_v48 = vld [vmem:[%s6361_s3 + $0x10] sm:$0xff]  ;;  %v3817_v6 = vld [vmem:[%s6361_s3 + $0x180] sm:$0xff]  ;;  %v3818_v17 = vld [vmem:[%s6361_s3 + $0x188] sm:$0xff] }
 0x8dd   : > { %2352 = vbcast.lane.b32.xlu1 %v5421_v26, 264  ;;  %2348 = vbcast.lane.b32.xlu0 %v5421_v26, 256 }
 0x8e1   : > { %2415 = vbcast.lane.b32.xlu1 %v5426_v60, 256  ;;  %2419 = vbcast.lane.b32.xlu0 %v5426_v60, 264 }
 0x8e5   : > { %2482 = vbcast.lane.b32.xlu1 %v5430_v25, 256  ;;  %2486 = vbcast.lane.b32.xlu0 %v5430_v25, 264 }
 0x8e9   : > { %2356 = vbcast.lane.b32.xlu1 %v5421_v26, 272  ;;  %2423 = vbcast.lane.b32.xlu0 %v5426_v60, 272 }
 0x8ed   : > { %2549 = vbcast.lane.b32.xlu1 %v5438_v19, 256  ;;  %2553 = vbcast.lane.b32.xlu0 %v5438_v19, 264 }
 0x8f1   : > { %2490 = vbcast.lane.b32.xlu1 %v5430_v25, 272  ;;  %2616 = vbcast.lane.b32.xlu0 %v5442_v13, 256 }
 0x8f5   : > { %2620 = vbcast.lane.b32.xlu1 %v5442_v13, 264  ;;  %2360 = vbcast.lane.b32.xlu0 %v5421_v26, 280 }
 0x8f9   : > { %2427 = vbcast.lane.b32.xlu1 %v5426_v60, 280  ;;  %2557 = vbcast.lane.b32.xlu0 %v5438_v19, 272 }
 0x8fd   : > { %2683 = vbcast.lane.b32.xlu1 %v5451_v39, 256  ;;  %2687 = vbcast.lane.b32.xlu0 %v5451_v39, 264 }
 0x901   : > { %2494 = vbcast.lane.b32.xlu1 %v5430_v25, 280  ;;  %2624 = vbcast.lane.b32.xlu0 %v5442_v13, 272 }
 0x905   : > { %2750 = vbcast.lane.b32.xlu1 %v5458_v43, 256  ;;  %2754 = vbcast.lane.b32.xlu0 %v5458_v43, 264 }
 0x909   : > { %2364 = vbcast.lane.b32.xlu1 %v5421_v26, 288  ;;  %2431 = vbcast.lane.b32.xlu0 %v5426_v60, 288 }
 0x90d   : > { %2561 = vbcast.lane.b32.xlu1 %v5438_v19, 280  ;;  %2691 = vbcast.lane.b32.xlu0 %v5451_v39, 272 }
 0x911   : > { %2817 = vbcast.lane.b32.xlu1 %v5467_v5, 256  ;;  %2821 = vbcast.lane.b32.xlu0 %v5467_v5, 264 }
 0x915   : > { %2498 = vbcast.lane.b32.xlu1 %v5430_v25, 288  ;;  %2628 = vbcast.lane.b32.xlu0 %v5442_v13, 280 }
 0x919   : > { %2758 = vbcast.lane.b32.xlu1 %v5458_v43, 272  ;;  %2368 = vbcast.lane.b32.xlu0 %v5421_v26, 296 }
 0x91d   : > { %2435 = vbcast.lane.b32.xlu1 %v5426_v60, 296  ;;  %2565 = vbcast.lane.b32.xlu0 %v5438_v19, 288 }
 0x921   : > { %2695 = vbcast.lane.b32.xlu1 %v5451_v39, 280  ;;  %2825 = vbcast.lane.b32.xlu0 %v5467_v5, 272 }
 0x925   : > { %2502 = vbcast.lane.b32.xlu1 %v5430_v25, 296  ;;  %2632 = vbcast.lane.b32.xlu0 %v5442_v13, 288 }
 0x929   : > { %2762 = vbcast.lane.b32.xlu1 %v5458_v43, 280  ;;  %2372 = vbcast.lane.b32.xlu0 %v5421_v26, 304 }
 0x92d   : > { %2439 = vbcast.lane.b32.xlu1 %v5426_v60, 304  ;;  %2569 = vbcast.lane.b32.xlu0 %v5438_v19, 296 }
 0x931   : > { %2699 = vbcast.lane.b32.xlu1 %v5451_v39, 288  ;;  %2829 = vbcast.lane.b32.xlu0 %v5467_v5, 280 }
 0x935   : > { %2506 = vbcast.lane.b32.xlu1 %v5430_v25, 304  ;;  %2636 = vbcast.lane.b32.xlu0 %v5442_v13, 296 }
 0x939   : > { %2766 = vbcast.lane.b32.xlu1 %v5458_v43, 288  ;;  %2376 = vbcast.lane.b32.xlu0 %v5421_v26, 312 }
 0x93d   : > { %2443 = vbcast.lane.b32.xlu1 %v5426_v60, 312  ;;  %2573 = vbcast.lane.b32.xlu0 %v5438_v19, 304 }
 0x941   : > { %2703 = vbcast.lane.b32.xlu1 %v5451_v39, 296  ;;  %2833 = vbcast.lane.b32.xlu0 %v5467_v5, 288 }
 0x945   : > { %2510 = vbcast.lane.b32.xlu1 %v5430_v25, 312  ;;  %2640 = vbcast.lane.b32.xlu0 %v5442_v13, 304 }
 0x949   : > { %2770 = vbcast.lane.b32.xlu1 %v5458_v43, 296  ;;  %2380 = vbcast.lane.b32.xlu0 %v5421_v26, 320 }
 0x94d   : > { %2447 = vbcast.lane.b32.xlu1 %v5426_v60, 320  ;;  %2577 = vbcast.lane.b32.xlu0 %v5438_v19, 312 }
 0x94f   : > { %v2353_v24 = vpop.permute.xlu1 %2352  ;;  %v2349_v56 = vpop.permute.xlu0 %2348 }
 0x950   : > { %v2880_v55 = vmul.f32 %v3809_v40, %v2353_v24  ;;  %v2879_v50 = vmul.f32 %v3810_v20, %v2349_v56  ;;  %v3819_v40 = vld [vmem:[%s6361_s3 + $0x110] sm:$0xff]  ;;  %v3820_v20 = vld [vmem:[%s6361_s3 + $0x200] sm:$0xff] }
 0x951   : > { %2707 = vbcast.lane.b32.xlu1 %v5451_v39, 304  ;;  %2837 = vbcast.lane.b32.xlu0 %v5467_v5, 296 }
 0x952   : > { %v3008_v16 = vsel %vm6416_vm5, %v2880_v55, 0.0  ;;  %v3007_v37 = vsel %vm6417_vm12, %v2879_v50, 0.0  ;;  %vm6428_vm5 = vmmov %vm6421_vm0 }
 0x953   : > { %v5503_v53 = vpop.permute.xlu1 %2415  ;;  %v5505_v23 = vpop.permute.xlu0 %2419  ;;  %v3009_v24 = vadd.f32 %v3008_v16, %v3007_v37  ;;  %v3821_v16 = vld [vmem:[%s6361_s3 + $0x208] sm:$0xff]  ;;  %vm6429_vm12 = vmmov %vm6421_vm0 }
 0x954   : > { %v2895_v52 = vmul.f32 %v3811_v61, %v5503_v53  ;;  %v2896_v28 = vmul.f32 %v3812_v27, %v5505_v23  ;;  %v3823_v27 = vld [vmem:[%s6361_s3 + $0x98] sm:$0xff] }
 0x955   : > { %2514 = vbcast.lane.b32.xlu1 %v5430_v25, 320  ;;  %2644 = vbcast.lane.b32.xlu0 %v5442_v13, 312 }
 0x956   : > { %v3044_v56 = vsel %vm6418_vm13, %v2895_v52, 0.0  ;;  %v3045_v53 = vsel %vm6419_vm14, %v2896_v28, 0.0  ;;  %v3822_v52 = vld [vmem:[%s6361_s3 + $0x18] sm:$0xff]  ;;  %v3824_v28 = vld [vmem:[%s6361_s3 + $0x190] sm:$0xff]  ;;  %vm6430_vm13 = vmmov %vm6421_vm0 }
 0x957   : > { %v5509_v3 = vpop.permute.xlu1 %2482  ;;  %v5511_v30 = vpop.permute.xlu0 %2486  ;;  %vm6431_vm14 = vmmov %vm6421_vm0 }
 0x958   : > { %v2911_v58 = vmul.f32 %v3813_v42, %v5509_v3  ;;  %v2912_v47 = vmul.f32 %v3814_v45, %v5511_v30  ;;  %v3046_v42 = vadd.f32 %v3045_v53, %v3044_v56  ;;  %v3827_v53 = vld [vmem:[%s6361_s3 + $0x118] sm:$0xff] }
 0x959   : > { %2774 = vbcast.lane.b32.xlu1 %v5458_v43, 304  ;;  %2384 = vbcast.lane.b32.xlu0 %v5421_v26, 328 }
 0x95a   : > { %v3081_v23 = vsel %vm6420_vm15, %v2911_v58, 0.0  ;;  %v3082_v3 = vsel %vm6421_vm0, %v2912_v47, 0.0  ;;  %vm6432_vm15 = vmmov %vm6421_vm0 }
 0x95b   : > { %v5515_v32 = vpop.permute.xlu1 %2356  ;;  %v5517_v36 = vpop.permute.xlu0 %2423  ;;  %v3083_v58 = vadd.f32 %v3082_v3, %v3081_v23  ;;  %v3828_v3 = vld [vmem:[%s6361_s3 + $0x210] sm:$0xff] }
 0x95c   : > { %v2881_v62 = vmul.f32 %v3815_v48, %v5515_v32  ;;  %v2897_v0 = vmul.f32 %v3816_v46, %v5517_v36 }
 0x95d   : > { %2451 = vbcast.lane.b32.xlu1 %v5426_v60, 328  ;;  %2581 = vbcast.lane.b32.xlu0 %v5438_v19, 320 }
 0x95e   : > { %v3010_v30 = vsel %vm6422_vm1, %v2881_v62, 0.0  ;;  %v3047_v32 = vsel %vm6423_vm2, %v2897_v0, 0.0  ;;  %vm6433_vm1 = vmmov %vm6421_vm0 }
 0x95f   : > { %v5521_v44 = vpop.permute.xlu1 %2549  ;;  %v5523_v7 = vpop.permute.xlu0 %2553  ;;  %v3011_v45 = vadd.f32 %v3010_v30, %v3009_v24  ;;  %v3048_v48 = vadd.f32 %v3047_v32, %v3046_v42  ;;  %v3826_v24 = vld [vmem:[%s6361_s3 + $0x288] sm:$0xff]  ;;  %vm6434_vm2 = vmmov %vm6421_vm0 }
 0x960   : > { %v2927_v49 = vmul.f32 %v3817_v6, %v5521_v44  ;;  %v2928_v11 = vmul.f32 %v3818_v17, %v5523_v7  ;;  %v3825_v17 = vld [vmem:[%s6361_s3 + $0x280] sm:$0xff] }
 0x961   : > { %2711 = vbcast.lane.b32.xlu1 %v5451_v39, 312  ;;  %2841 = vbcast.lane.b32.xlu0 %v5467_v5, 304 }
 0x962   : > { %v3118_v7 = vsel %vm6424_vm3, %v2927_v49, 0.0  ;;  %v3119_v61 = vsel %vm6425_vm11, %v2928_v11, 0.0  ;;  %vm6435_vm3 = vmmov %vm6421_vm0 }
 0x963   : > { %v5527_v38 = vpop.permute.xlu1 %2490  ;;  %v5529_v1 = vpop.permute.xlu0 %2616  ;;  %v3120_v62 = vadd.f32 %v3119_v61, %v3118_v7  ;;  %vm6436_vm11 = vmmov %vm6421_vm0 }
 0x964   : > { %v2913_v55 = vmul.f32 %v3819_v40, %v5527_v38  ;;  %v2943_v50 = vmul.f32 %v3820_v20, %v5529_v1 }
 0x965   : > { %2518 = vbcast.lane.b32.xlu1 %v5430_v25, 328  ;;  %2648 = vbcast.lane.b32.xlu0 %v5442_v13, 320 }
 0x966   : > { %v3155_v46 = vsel %vm6427_vm10, %v2943_v50, 0.0  ;;  %vm6438_vm10 = vmmov %vm6421_vm0 }
 0x967   : > { %v5533_v41 = vpop.permute.xlu1 %2620  ;;  %v5535_v4 = vpop.permute.xlu0 %2360 }
 0x968   : > { %v2944_v37 = vmul.f32 %v3821_v16, %v5533_v41  ;;  %v2882_v38 = vmul.f32 %v3822_v52, %v5535_v4 }
 0x969   : > { %2778 = vbcast.lane.b32.xlu1 %v5458_v43, 312  ;;  %2388 = vbcast.lane.b32.xlu0 %v5421_v26, 336 }
 0x96a   : > { %v3156_v0 = vsel %vm6428_vm5, %v2944_v37, 0.0  ;;  %vm6439_vm5 = vmmov %vm6421_vm0 }
 0x96b   : > { %v5539_v15 = vpop.permute.xlu1 %2427  ;;  %v5541_v57 = vpop.permute.xlu0 %2557  ;;  %v3157_v50 = vadd.f32 %v3156_v0, %v3155_v46  ;;  %v3836_v0 = vld [vmem:[%s6361_s3 + $0x218] sm:$0xff] }
 0x96c   : > { %v2898_v1 = vmul.f32 %v3823_v27, %v5539_v15  ;;  %v2929_v41 = vmul.f32 %v3824_v28, %v5541_v57  ;;  %v3084_v15 = vsel %vm6426_vm6, %v2913_v55, 0.0  ;;  %v3012_v57 = vsel %vm6429_vm12, %v2882_v38, 0.0  ;;  %v3834_v38 = vld [vmem:[%s6361_s3 + $0x290] sm:$0xff]  ;;  %vm6437_vm6 = vmmov %vm6421_vm0 }
 0x96d   : > { %2455 = vbcast.lane.b32.xlu1 %v5426_v60, 336  ;;  %2585 = vbcast.lane.b32.xlu0 %v5438_v19, 328  ;;  %v3085_v32 = vadd.f32 %v3084_v15, %v3083_v58  ;;  %v3013_v16 = vadd.f32 %v3012_v57, %v3011_v45  ;;  %vm6440_vm12 = vmmov %vm6421_vm0 }
 0x96e   : > { %v3049_v6 = vsel %vm6430_vm13, %v2898_v1, 0.0  ;;  %v3121_v49 = vsel %vm6431_vm14, %v2929_v41, 0.0  ;;  %vm6441_vm13 = vmmov %vm6421_vm0 }
 0x96f   : > { %v5545_v33 = vpop.permute.xlu1 %2683  ;;  %v5547_v10 = vpop.permute.xlu0 %2687  ;;  %v3050_v52 = vadd.f32 %v3049_v6, %v3048_v48  ;;  %v3837_v6 = vld [vmem:[%s6361_s3 + $0x310] sm:$0xff]  ;;  %vm6442_vm14 = vmmov %vm6421_vm0 }
 0x970   : > { %v2959_v11 = vmul.f32 %v3825_v17, %v5545_v33  ;;  %v2960_v56 = vmul.f32 %v3826_v24, %v5547_v10  ;;  %v3829_v33 = vld [vmem:[%s6361_s3 + $0x300] sm:$0xff]  ;;  %v3830_v10 = vld [vmem:[%s6361_s3 + $0x308] sm:$0xff] }
 0x971   : > { %2715 = vbcast.lane.b32.xlu1 %v5451_v39, 320  ;;  %2845 = vbcast.lane.b32.xlu0 %v5467_v5, 312  ;;  %v3838_v17 = vld [vmem:[%s6361_s3 + $0x380] sm:$0xff]  ;;  %v3839_v24 = vld [vmem:[%s6361_s3 + $0x28] sm:$0xff] }
 0x972   : > { %v3193_v1 = vsel %vm6421_vm0, %v2960_v56, 0.0  ;;  %v3840_v56 = vld [vmem:[%s6361_s3 + $0x128] sm:$0xff] }
 0x973   : > { %v5551_v14 = vpop.permute.xlu1 %2494  ;;  %v5553_v21 = vpop.permute.xlu0 %2624 }
 0x974   : > { %v2914_v23 = vmul.f32 %v3827_v53, %v5551_v14  ;;  %v2945_v30 = vmul.f32 %v3828_v3, %v5553_v21  ;;  %v3831_v14 = vld [vmem:[%s6361_s3 + $0x20] sm:$0xff] }
 0x975   : > { %2522 = vbcast.lane.b32.xlu1 %v5430_v25, 336  ;;  %2652 = vbcast.lane.b32.xlu0 %v5442_v13, 328 }
 0x976   : > { %v3086_v28 = vsel %vm6433_vm1, %v2914_v23, 0.0  ;;  %vm6444_vm1 = vmmov %vm6421_vm0 }
 0x977   : > { %v5557_v2 = vpop.permute.xlu1 %2750  ;;  %v5559_v63 = vpop.permute.xlu0 %2754  ;;  %v3087_v23 = vadd.f32 %v3086_v28, %v3085_v32  ;;  %v3845_v28 = vld [vmem:[%s6361_s3 + $0xa8] sm:$0xff] }
 0x978   : > { %v2975_v7 = vmul.f32 %v3829_v33, %v5557_v2  ;;  %v2976_v40 = vmul.f32 %v3830_v10, %v5559_v63  ;;  %v3832_v2 = vld [vmem:[%s6361_s3 + $0xa0] sm:$0xff]  ;;  %v3833_v63 = vld [vmem:[%s6361_s3 + $0x198] sm:$0xff] }
 0x979   : > { %2782 = vbcast.lane.b32.xlu1 %v5458_v43, 320  ;;  %2392 = vbcast.lane.b32.xlu0 %v5421_v26, 344 }
 0x97a   : > { %v3229_v41 = vsel %vm6435_vm3, %v2975_v7, 0.0  ;;  %v3230_v42 = vsel %vm6436_vm11, %v2976_v40, 0.0  ;;  %vm6446_vm3 = vmmov %vm6421_vm0 }
 0x97b   : > { %v5563_v22 = vpop.permute.xlu1 %2364  ;;  %v5565_v18 = vpop.permute.xlu0 %2431  ;;  %vm6447_vm11 = vmmov %vm6421_vm0 }
 0x97c   : > { %v2883_v55 = vmul.f32 %v3831_v14, %v5563_v22  ;;  %v2899_v37 = vmul.f32 %v3832_v2, %v5565_v18  ;;  %v3122_v22 = vadd.f32 %v3121_v49, %v3120_v62  ;;  %v3192_v18 = vsel %vm6432_vm15, %v2959_v11, 0.0  ;;  %vm6443_vm15 = vmmov %vm6421_vm0 }
 0x97d   : > { %2459 = vbcast.lane.b32.xlu1 %v5426_v60, 344  ;;  %2589 = vbcast.lane.b32.xlu0 %v5438_v19, 336  ;;  %v3194_v53 = vadd.f32 %v3193_v1, %v3192_v18 }
 0x97e   : > { %v3014_v58 = vsel %vm6437_vm6, %v2883_v55, 0.0  ;;  %v3051_v15 = vsel %vm6438_vm10, %v2899_v37, 0.0  ;;  %vm6448_vm6 = vmmov %vm6421_vm0 }
 0x97f   : > { %v5569_v34 = vpop.permute.xlu1 %2561  ;;  %v5571_v51 = vpop.permute.xlu0 %2691  ;;  %v3015_v33 = vadd.f32 %v3014_v58, %v3013_v16  ;;  %v5777_v7 = vadd.f32 %v3051_v15, %v3050_v52  ;;  %v3842_v16 = vld [vmem:[%s6361_s3 + $0x388] sm:$0xff]  ;;  %vm6449_vm10 = vmmov %vm6421_vm0 }
 0x980   : > { %v2930_v61 = vmul.f32 %v3833_v63, %v5569_v34  ;;  %v2961_v27 = vmul.f32 %v3834_v38, %v5571_v51  ;;  %v3158_v34 = vsel %vm6434_vm2, %v2945_v30, 0.0  ;;  %v3835_v51 = vld [vmem:[%s6361_s3 + $0x120] sm:$0xff]  ;;  %vm6445_vm2 = vmmov %vm6421_vm0 }
 0x981   : > { %2719 = vbcast.lane.b32.xlu1 %v5451_v39, 328  ;;  %2849 = vbcast.lane.b32.xlu0 %v5467_v5, 320  ;;  %v3159_v3 = vadd.f32 %v3158_v34, %v3157_v50 }
 0x982   : > { %v3123_v46 = vsel %vm6439_vm5, %v2930_v61, 0.0  ;;  %vm6450_vm5 = vmmov %vm6421_vm0 }
 0x983   : > { %v5575_v9 = vpop.permute.xlu1 %2817  ;;  %v5577_v8 = vpop.permute.xlu0 %2821  ;;  %v5784_v14 = vadd.f32 %v3123_v46, %v3122_v22  ;;  %v3843_v22 = vld [vmem:[%s6361_s3 + $0x318] sm:$0xff]  ;;  %v3848_v46 = vld [vmem:[%s6361_s3 + $0x228] sm:$0xff] }
 0x984   : > { %v2991_v11 = vmul.f32 %v3838_v17, %v5575_v9  ;;  %v3841_v9 = vld [vmem:[%s6361_s3 + $0x220] sm:$0xff]  ;;  %v2992_v2 = vmul.f32 %v3842_v16, %v5577_v8  ;;  %v3844_v8 = vld [vmem:[%s6361_s3 + $0x30] sm:$0xff] }
 0x985   : > { %2526 = vbcast.lane.b32.xlu1 %v5430_v25, 344  ;;  %2656 = vbcast.lane.b32.xlu0 %v5442_v13, 336 }
 0x987   : > { %v5581_v29 = vpop.permute.xlu1 %2498  ;;  %v5583_v31 = vpop.permute.xlu0 %2628 }
 0x988   : > { %v2915_v45 = vmul.f32 %v3835_v51, %v5581_v29  ;;  %v2946_v57 = vmul.f32 %v3836_v0, %v5583_v31  ;;  %v3195_v29 = vsel %vm6440_vm12, %v2961_v27, 0.0  ;;  %v3267_v0 = vsel %vm6447_vm11, %v2992_v2, 0.0  ;;  %vm6451_vm12 = vmmov %vm6421_vm0 }
 0x989   : > { %2786 = vbcast.lane.b32.xlu1 %v5458_v43, 328  ;;  %2396 = vbcast.lane.b32.xlu0 %v5421_v26, 352  ;;  %v5786_v32 = vadd.f32 %v3195_v29, %v3194_v53  ;;  %vm6458_vm11 = vmmov %vm6421_vm0 }
 0x98a   : > { %v3088_v10 = vsel %vm6441_vm13, %v2915_v45, 0.0  ;;  %v3160_v55 = vsel %vm6442_vm14, %v2946_v57, 0.0  ;;  %vm6452_vm13 = vmmov %vm6421_vm0 }
 0x98b   : > { %v5593_v59 = vpop.permute.xlu1 %2758  ;;  %v5595_v54 = vpop.permute.xlu0 %2368  ;;  %v3089_v61 = vadd.f32 %v3088_v10, %v3087_v23  ;;  %v3161_v18 = vadd.f32 %v3160_v55, %v3159_v3  ;;  %vm6453_vm14 = vmmov %vm6421_vm0  ;;  %v3851_v3 = vld [vmem:[%s6361_s3 + $0x298] sm:$0xff] }
 0x98c   : > { %v2977_v49 = vmul.f32 %v3837_v6, %v5593_v59  ;;  %v2884_v31 = vmul.f32 %v3839_v24, %v5595_v54  ;;  %v3231_v54 = vadd.f32 %v3230_v42, %v3229_v41  ;;  %v3846_v41 = vld [vmem:[%s6361_s3 + $0x1a0] sm:$0xff]  ;;  %v3854_v55 = vld [vmem:[%s6361_s3 + $0x38] sm:$0xff] }
 0x98d   : > { %2463 = vbcast.lane.b32.xlu1 %v5426_v60, 352  ;;  %2593 = vbcast.lane.b32.xlu0 %v5438_v19, 344 }
 0x98e   : > { %v3232_v50 = vsel %vm6443_vm15, %v2977_v49, 0.0  ;;  %v3016_v37 = vsel %vm6444_vm1, %v2884_v31, 0.0  ;;  %v3850_v49 = vld [vmem:[%s6361_s3 + $0x1a8] sm:$0xff]  ;;  %vm6454_vm15 = vmmov %vm6421_vm0 }
 0x98f   : > { %v5625_v35 = vpop.permute.xlu1 %2435  ;;  %v5627_v12 = vpop.permute.xlu0 %2565  ;;  %v3233_v1 = vadd.f32 %v3232_v50, %v3231_v54  ;;  %v3017_v51 = vadd.f32 %v3016_v37, %v3015_v33  ;;  %v3853_v33 = vld [vmem:[%s6361_s3 + $0x320] sm:$0xff]  ;;  %vm6455_vm1 = vmmov %vm6421_vm0 }
 0x990   : > { %v2900_v34 = vmul.f32 %v3845_v28, %v5625_v35 }
 0x991   : > { %2723 = vbcast.lane.b32.xlu1 %v5451_v39, 336  ;;  %2853 = vbcast.lane.b32.xlu0 %v5467_v5, 328 }
 0x993   : > { %v5645_v36 = vpop.permute.xlu1 %2695  ;;  %v5647_v44 = vpop.permute.xlu0 %2825 }
 0x995   : > { %2530 = vbcast.lane.b32.xlu1 %v5430_v25, 352  ;;  %2660 = vbcast.lane.b32.xlu0 %v5442_v13, 344 }
 0x997   : > { %v5677_v4 = vpop.permute.xlu1 %2502  ;;  %v5679_v47 = vpop.permute.xlu0 %2632 }
 0x998   : > { %v2916_v59 = vmul.f32 %v3840_v56, %v5677_v4  ;;  %v2947_v30 = vmul.f32 %v3841_v9, %v5679_v47  ;;  %v5791_v47 = vsel %vm6421_vm0, %v2991_v11, 0.0  ;;  %v2962_v9 = vmul.f32 %v3851_v3, %v5645_v36 }
 0x999   : > { %2790 = vbcast.lane.b32.xlu1 %v5458_v43, 336  ;;  %2400 = vbcast.lane.b32.xlu0 %v5421_v26, 360 }
 0x99a   : > { %v3090_v63 = vsel %vm6445_vm2, %v2916_v59, 0.0  ;;  %v3162_v52 = vsel %vm6446_vm3, %v2947_v30, 0.0  ;;  %v3852_v30 = vld [vmem:[%s6361_s3 + $0x390] sm:$0xff]  ;;  %vm6456_vm2 = vmmov %vm6421_vm0 }
 0x99b   : > { %v5717_v21 = vpop.permute.xlu1 %2762  ;;  %v5719_v20 = vpop.permute.xlu0 %2372  ;;  %v3091_v45 = vadd.f32 %v3090_v63, %v3089_v61  ;;  %v3163_v57 = vadd.f32 %v3162_v52, %v3161_v18  ;;  %v2993_v54 = vmul.f32 %v3852_v30, %v5647_v44  ;;  %v3855_v44 = vld [vmem:[%s6361_s3 + $0x2a0] sm:$0xff]  ;;  %v3856_v61 = vld [vmem:[%s6361_s3 + $0x398] sm:$0xff]  ;;  %vm6457_vm3 = vmmov %vm6421_vm0 }
 0x99c   : > { %v2978_v38 = vmul.f32 %v3843_v22, %v5717_v21  ;;  %v2885_v27 = vmul.f32 %v3844_v8, %v5719_v20  ;;  %v2931_v21 = vmul.f32 %v3846_v41, %v5627_v12  ;;  %v3847_v20 = vld [vmem:[%s6361_s3 + $0x130] sm:$0xff] }
 0x99d   : > { %2467 = vbcast.lane.b32.xlu1 %v5426_v60, 360  ;;  %2597 = vbcast.lane.b32.xlu0 %v5438_v19, 352  ;;  %v3849_v12 = vld [vmem:[%s6361_s3 + $0xb0] sm:$0xff]  ;;  %v3269_v41 = vsel %vm6458_vm11, %v2993_v54, 0.0  ;;  %vm6469_vm11 = vmmov %vm6421_vm0 }
 0x99e   : > { %v3234_v17 = vsel %vm6448_vm6, %v2978_v38, 0.0  ;;  %v3018_v11 = vsel %vm6449_vm10, %v2885_v27, 0.0  ;;  %v3125_v56 = vsel %vm6453_vm14, %v2931_v21, 0.0  ;;  %vm6459_vm6 = vmmov %vm6421_vm0  ;;  %v3862_v54 = vld [vmem:[%s6361_s3 + $0x230] sm:$0xff] }
 0x99f   : > { %v2440_v48 = vpop.permute.xlu1 %2439  ;;  %v5746_v62 = vpop.permute.xlu0 %2569  ;;  %v3235_v16 = vadd.f32 %v3234_v17, %v3233_v1  ;;  %v3019_v2 = vadd.f32 %v3018_v11, %v3017_v51  ;;  %v3126_v27 = vadd.f32 %v3125_v56, %v5784_v14  ;;  %v3268_v14 = vadd.f32 %v3267_v0, %v5791_v47  ;;  %vm6460_vm10 = vmmov %vm6421_vm0  ;;  %v3860_v17 = vld [vmem:[%s6361_s3 + $0x3a0] sm:$0xff] }
 0x9a0   : > { %v2901_v6 = vmul.f32 %v3849_v12, %v2440_v48  ;;  %v2932_v29 = vmul.f32 %v3850_v49, %v5746_v62  ;;  %v3053_v48 = vsel %vm6452_vm13, %v2900_v34, 0.0  ;;  %v3859_v49 = vld [vmem:[%s6361_s3 + $0x2a8] sm:$0xff]  ;;  %vm6463_vm13 = vmmov %vm6421_vm0 }
 0x9a1   : > { %2727 = vbcast.lane.b32.xlu1 %v5451_v39, 344  ;;  %2857 = vbcast.lane.b32.xlu0 %v5467_v5, 336  ;;  %v3054_v8 = vadd.f32 %v3053_v48, %v5777_v7  ;;  %vm6464_vm14 = vmmov %vm6421_vm0 }
 0x9a2   : > { %v3055_v36 = vsel %vm6454_vm15, %v2901_v6, 0.0  ;;  %v3127_v37 = vsel %vm6421_vm0, %v2932_v29, 0.0  ;;  %vm6465_vm15 = vmmov %vm6421_vm0 }
 0x9a3   : > { %v5780_v4 = vpop.permute.xlu1 %2699  ;;  %v5782_v40 = vpop.permute.xlu0 %2829  ;;  %v3128_v51 = vadd.f32 %v3127_v37, %v3126_v27  ;;  %v3863_v37 = vld [vmem:[%s6361_s3 + $0x328] sm:$0xff] }
 0x9a4   : > { %v2963_v63 = vmul.f32 %v3855_v44, %v5780_v4  ;;  %v2994_v52 = vmul.f32 %v3856_v61, %v5782_v40  ;;  %v3197_v4 = vsel %vm6457_vm3, %v2962_v9, 0.0  ;;  %v3857_v40 = vld [vmem:[%s6361_s3 + $0xb8] sm:$0xff]  ;;  %vm6468_vm3 = vmmov %vm6421_vm0 }
 0x9a5   : > { %2534 = vbcast.lane.b32.xlu1 %v5430_v25, 360  ;;  %2664 = vbcast.lane.b32.xlu0 %v5442_v13, 352  ;;  %v3861_v9 = vld [vmem:[%s6361_s3 + $0x138] sm:$0xff] }
 0x9a7   : > { %v2507_v42 = vpop.permute.xlu1 %2506  ;;  %v2637_v58 = vpop.permute.xlu0 %2636 }
 0x9a8   : > { %v2917_v15 = vmul.f32 %v3847_v20, %v2507_v42  ;;  %v2948_v35 = vmul.f32 %v3848_v46, %v2637_v58  ;;  %v3858_v42 = vld [vmem:[%s6361_s3 + $0x1b0] sm:$0xff]  ;;  %v3056_v58 = vadd.f32 %v3055_v36, %v3054_v8  ;;  %v3271_v20 = vsel %vm6460_vm10, %v2994_v52, 0.0  ;;  %v3865_v8 = vld [vmem:[%s6361_s3 + $0xc0] sm:$0xff]  ;;  %vm6471_vm10 = vmmov %vm6421_vm0 }
 0x9a9   : > { %2794 = vbcast.lane.b32.xlu1 %v5458_v43, 344  ;;  %2404 = vbcast.lane.b32.xlu0 %v5421_v26, 368 }
 0x9aa   : > { %v3092_v24 = vsel %vm6450_vm5, %v2917_v15, 0.0  ;;  %v3164_v31 = vsel %vm6451_vm12, %v2948_v35, 0.0  ;;  %vm6461_vm5 = vmmov %vm6421_vm0  ;;  %v3198_v35 = vadd.f32 %v3197_v4, %v5786_v32 }
 0x9ab   : > { %v5840_v59 = vadd.f32 %v3092_v24, %v3091_v45  ;;  %v5842_v53 = vadd.f32 %v3164_v31, %v3163_v57  ;;  %v2767_v62 = vpop.permute.xlu1 %2766  ;;  %v2377_v23 = vpop.permute.xlu0 %2376  ;;  %v3199_v45 = vsel %vm6459_vm6, %v2963_v63, 0.0  ;;  %vm6462_vm12 = vmmov %vm6421_vm0  ;;  %v3270_v57 = vadd.f32 %v3269_v41, %v3268_v14  ;;  %v3864_v63 = vld [vmem:[%s6361_s3 + $0x40] sm:$0xff] }
 0x9ac   : > { %v2979_v10 = vmul.f32 %v3853_v33, %v2767_v62  ;;  %v2886_v50 = vmul.f32 %v3854_v55, %v2377_v23  ;;  %v3200_v24 = vadd.f32 %v3199_v45, %v3198_v35  ;;  %vm6470_vm6 = vmmov %vm6421_vm0  ;;  %v3869_v35 = vld [vmem:[%s6361_s3 + $0x140] sm:$0xff] }
 0x9ad   : > { %2471 = vbcast.lane.b32.xlu1 %v5426_v60, 368  ;;  %2601 = vbcast.lane.b32.xlu0 %v5438_v19, 360  ;;  %v3272_v31 = vadd.f32 %v3271_v20, %v3270_v57 }
 0x9ae   : > { %v3236_v22 = vsel %vm6455_vm1, %v2979_v10, 0.0  ;;  %v3020_v38 = vsel %vm6456_vm2, %v2886_v50, 0.0  ;;  %vm6466_vm1 = vmmov %vm6421_vm0 }
 0x9af   : > { %v3237_v18 = vadd.f32 %v3236_v22, %v3235_v16  ;;  %v3021_v1 = vadd.f32 %v3020_v38, %v3019_v2  ;;  %v2444_v28 = vpop.permute.xlu1 %2443  ;;  %v2574_v34 = vpop.permute.xlu0 %2573  ;;  %vm6467_vm2 = vmmov %vm6421_vm0 }
 0x9b0   : > { %v2902_v21 = vmul.f32 %v3857_v40, %v2444_v28  ;;  %v2933_v7 = vmul.f32 %v3858_v42, %v2574_v34  ;;  %v3866_v28 = vld [vmem:[%s6361_s3 + $0x1b8] sm:$0xff] }
 0x9b1   : > { %2731 = vbcast.lane.b32.xlu1 %v5451_v39, 352  ;;  %2861 = vbcast.lane.b32.xlu0 %v5467_v5, 344 }
 0x9b2   : > { %v3057_v15 = vsel %vm6461_vm5, %v2902_v21, 0.0  ;;  %v3129_v46 = vsel %vm6462_vm12, %v2933_v7, 0.0  ;;  %v3867_v21 = vld [vmem:[%s6361_s3 + $0x2b0] sm:$0xff]  ;;  %v3868_v7 = vld [vmem:[%s6361_s3 + $0x3a8] sm:$0xff]  ;;  %vm6472_vm5 = vmmov %vm6421_vm0 }
 0x9b3   : > { %v3058_v12 = vadd.f32 %v3057_v15, %v3056_v58  ;;  %v3130_v6 = vadd.f32 %v3129_v46, %v3128_v51  ;;  %v2704_v47 = vpop.permute.xlu1 %2703  ;;  %v2834_v0 = vpop.permute.xlu0 %2833  ;;  %vm6473_vm12 = vmmov %vm6421_vm0 }
 0x9b4   : > { %v2964_v29 = vmul.f32 %v3859_v49, %v2704_v47  ;;  %v2995_v11 = vmul.f32 %v3860_v17, %v2834_v0 }
 0x9b5   : > { %2538 = vbcast.lane.b32.xlu1 %v5430_v25, 368  ;;  %2668 = vbcast.lane.b32.xlu0 %v5442_v13, 360 }
 0x9b6   : > { %v3201_v32 = vsel %vm6463_vm13, %v2964_v29, 0.0  ;;  %v3273_v48 = vsel %vm6464_vm14, %v2995_v11, 0.0  ;;  %v3871_v11 = vld [vmem:[%s6361_s3 + $0x330] sm:$0xff]  ;;  %vm6474_vm13 = vmmov %vm6421_vm0 }
 0x9b7   : > { %v3202_v56 = vadd.f32 %v3201_v32, %v3200_v24  ;;  %v3274_v62 = vadd.f32 %v3273_v48, %v3272_v31  ;;  %v2511_v23 = vpop.permute.xlu1 %2510  ;;  %v2641_v3 = vpop.permute.xlu0 %2640  ;;  %v3872_v31 = vld [vmem:[%s6361_s3 + $0x48] sm:$0xff]  ;;  %vm6475_vm14 = vmmov %vm6421_vm0 }
 0x9b8   : > { %v2918_v30 = vmul.f32 %v3861_v9, %v2511_v23  ;;  %v2949_v33 = vmul.f32 %v3862_v54, %v2641_v3  ;;  %v3873_v9 = vld [vmem:[%s6361_s3 + $0xc8] sm:$0xff]  ;;  %v3874_v54 = vld [vmem:[%s6361_s3 + $0x1c0] sm:$0xff] }
 0x9b9   : > { %2798 = vbcast.lane.b32.xlu1 %v5458_v43, 352  ;;  %2408 = vbcast.lane.b32.xlu0 %v5421_v26, 376 }
 0x9ba   : > { %v3094_v10 = vsel %vm6465_vm15, %v2918_v30, 0.0  ;;  %v3166_v55 = vsel %vm6421_vm0, %v2949_v33, 0.0  ;;  %vm6476_vm15 = vmmov %vm6421_vm0 }
 0x9bb   : > { %v3095_v50 = vadd.f32 %v3094_v10, %v5840_v59  ;;  %v3167_v16 = vadd.f32 %v3166_v55, %v5842_v53  ;;  %v2771_v2 = vpop.permute.xlu1 %2770  ;;  %v2381_v36 = vpop.permute.xlu0 %2380 }
 0x9bc   : > { %v2980_v44 = vmul.f32 %v3863_v37, %v2771_v2  ;;  %v2887_v26 = vmul.f32 %v3864_v63, %v2381_v36  ;;  %v3875_v37 = vld [vmem:[%s6361_s3 + $0x2b8] sm:$0xff]  ;;  %v3876_v63 = vld [vmem:[%s6361_s3 + $0x3b0] sm:$0xff] }
 0x9bd   : > { %2475 = vbcast.lane.b32.xlu1 %v5426_v60, 376  ;;  %2605 = vbcast.lane.b32.xlu0 %v5438_v19, 368 }
 0x9be   : > { %v3238_v59 = vsel %vm6466_vm1, %v2980_v44, 0.0  ;;  %v3022_v53 = vsel %vm6467_vm2, %v2887_v26, 0.0  ;;  %vm6477_vm1 = vmmov %vm6421_vm0 }
 0x9bf   : > { %v3239_v61 = vadd.f32 %v3238_v59, %v3237_v18  ;;  %v3023_v52 = vadd.f32 %v3022_v53, %v3021_v1  ;;  %v2448_v22 = vpop.permute.xlu1 %2447  ;;  %v2578_v38 = vpop.permute.xlu0 %2577  ;;  %vm6478_vm2 = vmmov %vm6421_vm0 }
 0x9c0   : > { %v2903_v27 = vmul.f32 %v3865_v8, %v2448_v22  ;;  %v2934_v60 = vmul.f32 %v3866_v28, %v2578_v38  ;;  %v3877_v38 = vld [vmem:[%s6361_s3 + $0x148] sm:$0xff] }
 0x9c1   : > { %2735 = vbcast.lane.b32.xlu1 %v5451_v39, 360  ;;  %2865 = vbcast.lane.b32.xlu0 %v5467_v5, 352 }
 0x9c2   : > { %v3059_v34 = vsel %vm6468_vm3, %v2903_v27, 0.0  ;;  %v3131_v18 = vsel %vm6469_vm11, %v2934_v60, 0.0  ;;  %v3878_v27 = vld [vmem:[%s6361_s3 + $0x240] sm:$0xff]  ;;  %vm6479_vm3 = vmmov %vm6421_vm0 }
 0x9c3   : > { %v3060_v1 = vadd.f32 %v3059_v34, %v3058_v12  ;;  %v3132_v4 = vadd.f32 %v3131_v18, %v3130_v6  ;;  %v2708_v41 = vpop.permute.xlu1 %2707  ;;  %v2838_v40 = vpop.permute.xlu0 %2837  ;;  %v3870_v12 = vld [vmem:[%s6361_s3 + $0x238] sm:$0xff]  ;;  %vm6480_vm11 = vmmov %vm6421_vm0 }
 0x9c4   : > { %v2965_v42 = vmul.f32 %v3867_v21, %v2708_v41  ;;  %v2996_v14 = vmul.f32 %v3868_v7, %v2838_v40  ;;  %v3879_v41 = vld [vmem:[%s6361_s3 + $0x338] sm:$0xff]  ;;  %v3880_v21 = vld [vmem:[%s6361_s3 + $0x50] sm:$0xff] }
 0x9c5   : > { %2542 = vbcast.lane.b32.xlu1 %v5430_v25, 376  ;;  %2672 = vbcast.lane.b32.xlu0 %v5442_v13, 368 }
 0x9c6   : > { %v3203_v58 = vsel %vm6470_vm6, %v2965_v42, 0.0  ;;  %v3275_v51 = vsel %vm6471_vm10, %v2996_v14, 0.0  ;;  %vm6482_vm6 = vmmov %vm6421_vm0 }
 0x9c7   : > { %v3204_v45 = vadd.f32 %v3203_v58, %v3202_v56  ;;  %v3276_v20 = vadd.f32 %v3275_v51, %v3274_v62  ;;  %v2515_v15 = vpop.permute.xlu1 %2514  ;;  %v2645_v46 = vpop.permute.xlu0 %2644  ;;  %vm6483_vm10 = vmmov %vm6421_vm0 }
 0x9c8   : > { %v2919_v57 = vmul.f32 %v3869_v35, %v2515_v15  ;;  %v2950_v25 = vmul.f32 %v3870_v12, %v2645_v46  ;;  %v3323_v15 = vld [vmem:[%s6366_s8 + $0x8] sm:$0xff]  ;;  %v3324_v46 = vld [vmem:[%s6366_s8 + $0x10] sm:$0xff] }
 0x9c9   : > { %2802 = vbcast.lane.b32.xlu1 %v5458_v43, 360  ;;  %2609 = vbcast.lane.b32.xlu0 %v5438_v19, 376  ;;  %v3881_v35 = vld [vmem:[%s6361_s3 + $0xd0] sm:$0xff]  ;;  %v3882_v12 = vld [vmem:[%s6361_s3 + $0x1c8] sm:$0xff] }
 0x9ca   : > { %v3096_v6 = vsel %vm6472_vm5, %v2919_v57, 0.0  ;;  %v3168_v47 = vsel %vm6473_vm12, %v2950_v25, 0.0  ;;  %vm6484_vm5 = vmmov %vm6421_vm0 }
 0x9cb   : > { %v3097_v0 = vadd.f32 %v3096_v6, %v3095_v50  ;;  %v3169_v49 = vadd.f32 %v3168_v47, %v3167_v16  ;;  %v2775_v29 = vpop.permute.xlu1 %2774  ;;  %v2385_v17 = vpop.permute.xlu0 %2384  ;;  %v3325_v47 = vld [vmem:[%s6366_s8 + $0x18] sm:$0xff]  ;;  %vm6485_vm12 = vmmov %vm6421_vm0 }
 0x9cc   : > { %v2981_v24 = vmul.f32 %v3871_v11, %v2775_v29  ;;  %v2888_v32 = vmul.f32 %v3872_v31, %v2385_v17  ;;  %v3755_v29 = vpack.c.bf16 %v3325_v47, %v3324_v46 }
 0x9cd   : > { %2739 = vbcast.lane.b32.xlu1 %v5451_v39, 368  ;;  %2869 = vbcast.lane.b32.xlu0 %v5467_v5, 360 }
 0x9ce   : > { %v3240_v19 = vsel %vm6474_vm13, %v2981_v24, 0.0  ;;  %v3024_v48 = vsel %vm6475_vm14, %v2888_v32, 0.0  ;;  %v6486_v32 = vmov 0.0|0.0   ;;  %vm6487_vm13 = vmmov %vm6421_vm0 }
 0x9cf   : > { %v3241_v56 = vadd.f32 %v3240_v19, %v3239_v61  ;;  %v3025_v62 = vadd.f32 %v3024_v48, %v3023_v52  ;;  %v2452_v23 = vpop.permute.xlu1 %2451  ;;  %v2582_v3 = vpop.permute.xlu0 %2581  ;;  %v3326_v19 = vld [vmem:[%s6366_s8 + $0x20] sm:$0xff]  ;;  %v3327_v48 = vld [vmem:[%s6366_s8 + $0x28] sm:$0xff]  ;;  %vm6488_vm14 = vmmov %vm6421_vm0 }
 0x9d0   : > { %v2904_v30 = vmul.f32 %v3873_v9, %v2452_v23  ;;  %v2935_v33 = vmul.f32 %v3874_v54, %v2582_v3  ;;  %v3884_v23 = vld [vmem:[%s6361_s3 + $0x3b8] sm:$0xff]  ;;  %v3758_v54 = vpack.c.bf16 %v3327_v48, %v3326_v19 }
 0x9d1   : > { %2676 = vbcast.lane.b32.xlu1 %v5442_v13, 376  ;;  %2806 = vbcast.lane.b32.xlu0 %v5458_v43, 368 }
 0x9d2   : > { %v3061_v10 = vsel %vm6476_vm15, %v2904_v30, 0.0  ;;  %v3133_v55 = vsel %vm6421_vm0, %v2935_v33, 0.0  ;;  %vm6489_vm15 = vmmov %vm6421_vm0 }
 0x9d3   : > { %v3062_v50 = vadd.f32 %v3061_v10, %v3060_v1  ;;  %v3134_v16 = vadd.f32 %v3133_v55, %v3132_v4  ;;  %v2712_v2 = vpop.permute.xlu1 %2711  ;;  %v2842_v36 = vpop.permute.xlu0 %2841 }
 0x9d4   : > { %v2966_v44 = vmul.f32 %v3875_v37, %v2712_v2  ;;  %v2997_v13 = vmul.f32 %v3876_v63, %v2842_v36  ;;  %v3329_v2 = vld [vmem:[%s6366_s8 + $0x38] sm:$0xff]  ;;  %v3885_v36 = vld [vmem:[%s6361_s3 + $0x150] sm:$0xff] }
 0x9d5   : > { %2743 = vbcast.lane.b32.xlu1 %v5451_v39, 376  ;;  %2873 = vbcast.lane.b32.xlu0 %v5467_v5, 368 }
 0x9d6   : > { %v3205_v26 = vsel %vm6477_vm1, %v2966_v44, 0.0  ;;  %v3277_v59 = vsel %vm6478_vm2, %v2997_v13, 0.0  ;;  %v3886_v44 = vld [vmem:[%s6361_s3 + $0x248] sm:$0xff]  ;;  %vm6490_vm1 = vmmov %vm6421_vm0 }
 0x9d7   : > { %v3206_v53 = vadd.f32 %v3205_v26, %v3204_v45  ;;  %v3278_v61 = vadd.f32 %v3277_v59, %v3276_v20  ;;  %v2519_v52 = vpop.permute.xlu1 %2518  ;;  %v2649_v22 = vpop.permute.xlu0 %2648  ;;  %v3322_v20 = vld [vmem:[%s6366_s8] sm:$0xff]  ;;  %vm6491_vm2 = vmmov %vm6421_vm0 }
 0x9d8   : > { %v2920_v8 = vmul.f32 %v3877_v38, %v2519_v52  ;;  %v2951_v39 = vmul.f32 %v3878_v27, %v2649_v22  ;;  %v3752_v6 = vpack.c.bf16 %v3323_v15, %v3322_v20  ;;  %v3887_v38 = vld [vmem:[%s6361_s3 + $0x340] sm:$0xff]  ;;  %v3888_v27 = vld [vmem:[%s6361_s3 + $0x58] sm:$0xff] }
 0x9d9   : > { %2810 = vbcast.lane.b32.xlu1 %v5458_v43, 376  ;;  %2877 = vbcast.lane.b32.xlu0 %v5467_v5, 376  ;;  %v6481_v5 = vld [vmem:[#allocation7_spill] sm:$0xff]  ;;  %v3892_v15 = vld [vmem:[%s6361_s3 + $0x3c0] sm:$0xff] }
 0x9da   : > { %v3098_v28 = vsel %vm6479_vm3, %v2920_v8, 0.0  ;;  %v3170_v60 = vsel %vm6480_vm11, %v2951_v39, 0.0  ;;  %3753 = vmatpush3.bf16.msra.mxu0 %v3752_v6  ;;  %vm6492_vm3 = vmmov %vm6421_vm0 }
 0x9db   : > { %v3099_v34 = vadd.f32 %v3098_v28, %v3097_v0  ;;  %v3171_v18 = vadd.f32 %v3170_v60, %v3169_v49  ;;  %v2779_v1 = vpop.permute.xlu1 %2778  ;;  %v2389_v4 = vpop.permute.xlu0 %2388  ;;  %3754 = vmatprep.subr.bf16.mxu0 %v6486_v32  ;;  %vm6493_vm11 = vmmov %vm6421_vm0 }
 0x9dc   : > { %v2982_v40 = vmul.f32 %v3879_v41, %v2779_v1  ;;  %v2889_v43 = vmul.f32 %v3880_v21, %v2389_v4  ;;  %v3889_v41 = vld [vmem:[%s6361_s3 + $0xd8] sm:$0xff]  ;;  %v3890_v21 = vld [vmem:[%s6361_s3 + $0x1d0] sm:$0xff] }
 0x9dd   : > { %765 = vrot.lane.b32.xlu1 %v6481_v5, %s3949_s26 }
 0x9de   : > { %v3242_v42 = vsel %vm6482_vm6, %v2982_v40, 0.0  ;;  %v3026_v7 = vsel %vm6483_vm10, %v2889_v43, 0.0  ;;  %3756 = vmatpush3.bf16.msra.mxu0 %v3755_v29  ;;  %vm6494_vm6 = vmmov %vm6421_vm0  ;;  %v3894_v29 = vld [vmem:[%s6361_s3 + $0x250] sm:$0xff] }
 0x9df   : > { %v3243_v14 = vadd.f32 %v3242_v42, %v3241_v56  ;;  %v3027_v58 = vadd.f32 %v3026_v7, %v3025_v62  ;;  %v2456_v51 = vpop.permute.xlu1 %2455  ;;  %v2586_v45 = vpop.permute.xlu0 %2585  ;;  %v3883_v56 = vld [vmem:[%s6361_s3 + $0x2c0] sm:$0xff]  ;;  %3757 = vmatprep.subr.bf16.mxu0 %v6486_v32  ;;  %vm6495_vm10 = vmmov %vm6421_vm0 }
 0x9e0   : > { %v2905_v57 = vmul.f32 %v3881_v35, %v2456_v51  ;;  %v2936_v25 = vmul.f32 %v3882_v12, %v2586_v45  ;;  %v3891_v45 = vld [vmem:[%s6361_s3 + $0x2c8] sm:$0xff] }
 0x9e2   : > { %v3063_v0 = vsel %vm6484_vm5, %v2905_v57, 0.0  ;;  %v3135_v49 = vsel %vm6485_vm12, %v2936_v25, 0.0  ;;  %3759 = vmatpush3.bf16.msra.mxu0 %v3758_v54  ;;  %vm6496_vm5 = vmmov %vm6421_vm0 }
 0x9e3   : > { %v3064_v17 = vadd.f32 %v3063_v0, %v3062_v50  ;;  %v3136_v11 = vadd.f32 %v3135_v49, %v3134_v16  ;;  %v2716_v24 = vpop.permute.xlu1 %2715  ;;  %v2846_v31 = vpop.permute.xlu0 %2845  ;;  %v3328_v16 = vld [vmem:[%s6366_s8 + $0x30] sm:$0xff]  ;;  %3760 = vmatprep.subr.bf16.mxu0 %v6486_v32  ;;  %v3893_v0 = vld [vmem:[%s6361_s3 + $0x158] sm:$0xff]  ;;  %vm6497_vm12 = vmmov %vm6421_vm0 }
 0x9e4   : > { %v2967_v62 = vmul.f32 %v3883_v56, %v2716_v24  ;;  %v2998_v3 = vmul.f32 %v3884_v23, %v2846_v31  ;;  %v3761_v59 = vpack.c.bf16 %v3329_v2, %v3328_v16  ;;  %v3897_v16 = vld [vmem:[%s6361_s3 + $0xe0] sm:$0xff] }
 0x9e6   : > { %v3207_v9 = vsel %vm6487_vm13, %v2967_v62, 0.0  ;;  %v3279_v30 = vsel %vm6488_vm14, %v2998_v3, 0.0  ;;  %3762 = vmatpush3.bf16.msra.mxu0 %v3761_v59  ;;  %v3895_v62 = vld [vmem:[%s6361_s3 + $0x348] sm:$0xff]  ;;  %v3896_v3 = vld [vmem:[%s6361_s3 + $0x60] sm:$0xff]  ;;  %vm6498_vm13 = vmmov %vm6421_vm0 }
 0x9e7   : > { %v3208_v33 = vadd.f32 %v3207_v9, %v3206_v53  ;;  %v3280_v10 = vadd.f32 %v3279_v30, %v3278_v61  ;;  %v2523_v55 = vpop.permute.xlu1 %2522  ;;  %v2653_v50 = vpop.permute.xlu0 %2652  ;;  %vm6499_vm14 = vmmov %vm6421_vm0 }
 0x9e8   : > { %v2921_v37 = vmul.f32 %v3885_v36, %v2523_v55  ;;  %v2952_v63 = vmul.f32 %v3886_v44, %v2653_v50  ;;  %v3898_v36 = vld [vmem:[%s6361_s3 + $0x1d8] sm:$0xff] }
 0x9ea   : > { %v3100_v13 = vsel %vm6489_vm15, %v2921_v37, 0.0  ;;  %v3172_v26 = vsel %vm6421_vm0, %v2952_v63, 0.0  ;;  %vm6500_vm15 = vmmov %vm6421_vm0 }
 0x9eb   : > { %v3101_v53 = vadd.f32 %v3100_v13, %v3099_v34  ;;  %v3173_v61 = vadd.f32 %v3172_v26, %v3171_v18  ;;  %v2783_v52 = vpop.permute.xlu1 %2782  ;;  %v2393_v22 = vpop.permute.xlu0 %2392 }
 0x9ec   : > { %v2983_v8 = vmul.f32 %v3887_v38, %v2783_v52  ;;  %v2890_v39 = vmul.f32 %v3888_v27, %v2393_v22 }
 0x9ee   : > { %v3244_v28 = vsel %vm6490_vm1, %v2983_v8, 0.0  ;;  %v3028_v60 = vsel %vm6491_vm2, %v2890_v39, 0.0  ;;  %vm6501_vm1 = vmmov %vm6421_vm0 }
 0x9ef   : > { %v3245_v34 = vadd.f32 %v3244_v28, %v3243_v14  ;;  %v3029_v18 = vadd.f32 %v3028_v60, %v3027_v58  ;;  %v2460_v1 = vpop.permute.xlu1 %2459  ;;  %v2590_v4 = vpop.permute.xlu0 %2589  ;;  %vm6502_vm2 = vmmov %vm6421_vm0 }
 0x9f0   : > { %v2906_v40 = vmul.f32 %v3889_v41, %v2460_v1  ;;  %v2937_v43 = vmul.f32 %v3890_v21, %v2590_v4 }
 0x9f2   : > { %v3065_v5 = vsel %vm6492_vm3, %v2906_v40, 0.0  ;;  %v3137_v42 = vsel %vm6493_vm11, %v2937_v43, 0.0  ;;  %v3899_v43 = vld [vmem:[%s6361_s3 + $0x68] sm:$0xff]  ;;  %vm6503_vm3 = vmmov %vm6421_vm0 }
 0x9f3   : > { %v3066_v7 = vadd.f32 %v3065_v5, %v3064_v17  ;;  %v3138_v51 = vadd.f32 %v3137_v42, %v3136_v11  ;;  %v2720_v14 = vpop.permute.xlu1 %2719  ;;  %v2850_v58 = vpop.permute.xlu0 %2849  ;;  %v3900_v42 = vld [vmem:[%s6361_s3 + $0x70] sm:$0xff]  ;;  %vm6504_vm11 = vmmov %vm6421_vm0 }
 0x9f4   : > { %v2968_v20 = vmul.f32 %v3891_v45, %v2720_v14  ;;  %v2999_v46 = vmul.f32 %v3892_v15, %v2850_v58  ;;  %v3901_v45 = vld [vmem:[%s6361_s3 + $0xe8] sm:$0xff]  ;;  %v3902_v15 = vld [vmem:[%s6361_s3 + $0x2d0] sm:$0xff] }
 0x9f6   : > { %v3209_v35 = vsel %vm6494_vm6, %v2968_v20, 0.0  ;;  %v3281_v57 = vsel %vm6495_vm10, %v2999_v46, 0.0  ;;  %vm6505_vm6 = vmmov %vm6421_vm0 }
 0x9f7   : > { %v6077_v12 = vadd.f32 %v3209_v35, %v3208_v33  ;;  %v6079_v25 = vadd.f32 %v3281_v57, %v3280_v10  ;;  %v2527_v6 = vpop.permute.xlu1 %2526  ;;  %v2657_v47 = vpop.permute.xlu0 %2656  ;;  %v3903_v35 = vld [vmem:[%s6361_s3 + $0x3c8] sm:$0xff]  ;;  %vm6506_vm10 = vmmov %vm6421_vm0 }
 0x9f8   : > { %v2922_v49 = vmul.f32 %v3893_v0, %v2527_v6  ;;  %v2953_v17 = vmul.f32 %v3894_v29, %v2657_v47  ;;  %v3904_v47 = vld [vmem:[%s6361_s3 + $0xf0] sm:$0xff] }
 0x9fa   : > { %v3102_v11 = vsel %vm6496_vm5, %v2922_v49, 0.0  ;;  %v3174_v24 = vsel %vm6497_vm12, %v2953_v17, 0.0  ;;  %v3905_v49 = vld [vmem:[%s6361_s3 + $0x160] sm:$0xff]  ;;  %v3906_v17 = vld [vmem:[%s6361_s3 + $0x258] sm:$0xff]  ;;  %vm6507_vm5 = vmmov %vm6421_vm0 }
 0x9fb   : > { %v6089_v31 = vadd.f32 %v3102_v11, %v3101_v53  ;;  %v6091_v19 = vadd.f32 %v3174_v24, %v3173_v61  ;;  %v2787_v48 = vpop.permute.xlu1 %2786  ;;  %v2397_v56 = vpop.permute.xlu0 %2396  ;;  %vm6508_vm12 = vmmov %vm6421_vm0 }
 0x9fc   : > { %v2984_v23 = vmul.f32 %v3895_v62, %v2787_v48  ;;  %v2891_v9 = vmul.f32 %v3896_v3, %v2397_v56  ;;  %v3907_v62 = vld [vmem:[%s6361_s3 + $0x350] sm:$0xff] }
 0x9fe   : > { %v3246_v30 = vsel %vm6498_vm13, %v2984_v23, 0.0  ;;  %v3030_v54 = vsel %vm6499_vm14, %v2891_v9, 0.0  ;;  %v3908_v9 = vld [vmem:[%s6361_s3 + $0x78] sm:$0xff]  ;;  %vm6509_vm13 = vmmov %vm6421_vm0 }
 0x9ff   : > { %v6101_v33 = vadd.f32 %v3246_v30, %v3245_v34  ;;  %v3031_v10 = vadd.f32 %v3030_v54, %v3029_v18  ;;  %v2464_v55 = vpop.permute.xlu1 %2463  ;;  %v2594_v50 = vpop.permute.xlu0 %2593  ;;  %vm6510_vm14 = vmmov %vm6421_vm0 }
 0xa00   : > { %v2907_v2 = vmul.f32 %v3897_v16, %v2464_v55  ;;  %v2938_v37 = vmul.f32 %v3898_v36, %v2594_v50 }
 0xa02   : > { %v3067_v44 = vsel %vm6500_vm15, %v2907_v2, 0.0  ;;  %v3139_v63 = vsel %vm6421_vm0, %v2938_v37, 0.0  ;;  %vm6511_vm15 = vmmov %vm6421_vm0 }
 0xa03   : > { %v3068_v13 = vadd.f32 %v3067_v44, %v3066_v7  ;;  %v6111_v26 = vadd.f32 %v3139_v63, %v3138_v51  ;;  %v2724_v59 = vpop.permute.xlu1 %2723  ;;  %v2854_v53 = vpop.permute.xlu0 %2853 }
 0xa04   : > { %v2969_v46 = vmul.f32 %v3902_v15, %v2724_v59  ;;  %v3000_v57 = vmul.f32 %v3903_v35, %v2854_v53 }
 0xa06   : > { %v3211_v55 = vsel %vm6504_vm11, %v2969_v46, 0.0  ;;  %vm6515_vm11 = vmmov %vm6421_vm0 }
 0xa07   : > { %v2531_v61 = vpop.permute.xlu1 %2530  ;;  %v2661_v52 = vpop.permute.xlu0 %2660 }
 0xa08   : > { %v2923_v29 = vmul.f32 %v3905_v49, %v2531_v61  ;;  %v2954_v11 = vmul.f32 %v3906_v17, %v2661_v52  ;;  %v3909_v61 = vld [vmem:[%s6361_s3 + $0x1e0] sm:$0xff]  ;;  %v3917_v17 = vld [vmem:[%s6361_s3 + $0x358] sm:$0xff] }
 0xa0a   : > { %v3104_v2 = vsel %vm6508_vm12, %v2923_v29, 0.0  ;;  %v3176_v36 = vsel %vm6509_vm13, %v2954_v11, 0.0  ;;  %vm6519_vm12 = vmmov %vm6421_vm0 }
 0xa0b   : > { %v2791_v22 = vpop.permute.xlu1 %2790  ;;  %v2401_v38 = vpop.permute.xlu0 %2400  ;;  %v6190_v15 = vadd.f32 %v3176_v36, %v6091_v19  ;;  %v3921_v36 = vld [vmem:[%s6361_s3 + $0x268] sm:$0xff]  ;;  %vm6520_vm13 = vmmov %vm6421_vm0 }
 0xa0c   : > { %v2892_v5 = vmul.f32 %v3899_v43, %v2401_v38  ;;  %v2985_v23 = vmul.f32 %v3907_v62, %v2791_v22  ;;  %v3910_v22 = vld [vmem:[%s6361_s3 + $0x168] sm:$0xff]  ;;  %v3913_v43 = vld [vmem:[%s6361_s3 + $0x3d0] sm:$0xff] }
 0xa0e   : > { %v3032_v58 = vsel %vm6501_vm1, %v2892_v5, 0.0  ;;  %v3248_v53 = vsel %vm6510_vm14, %v2985_v23, 0.0  ;;  %vm6512_vm1 = vmmov %vm6421_vm0 }
 0xa0f   : > { %v2468_v8 = vpop.permute.xlu1 %2467  ;;  %v2598_v27 = vpop.permute.xlu0 %2597  ;;  %v3033_v24 = vadd.f32 %v3032_v58, %v3031_v10  ;;  %v3283_v10 = vsel %vm6505_vm6, %v3000_v57, 0.0  ;;  %v3914_v58 = vld [vmem:[%s6361_s3 + $0x170] sm:$0xff]  ;;  %vm6516_vm6 = vmmov %vm6421_vm0 }
 0xa10   : > { %v2908_v20 = vmul.f32 %v3901_v45, %v2468_v8  ;;  %v2939_v52 = vmul.f32 %v3909_v61, %v2598_v27  ;;  %v3911_v8 = vld [vmem:[%s6361_s3 + $0xf8] sm:$0xff]  ;;  %vm6521_vm14 = vmmov %vm6421_vm0 }
 0xa12   : > { %v3069_v3 = vsel %vm6503_vm3, %v2908_v20, 0.0  ;;  %vm6514_vm3 = vmmov %vm6421_vm0 }
 0xa13   : > { %v2728_v39 = vpop.permute.xlu1 %2727  ;;  %v2858_v28 = vpop.permute.xlu0 %2857  ;;  %v3070_v37 = vadd.f32 %v3069_v3, %v3068_v13 }
 0xa14   : > { %v3001_v27 = vmul.f32 %v3913_v43, %v2858_v28  ;;  %v3923_v43 = vld [vmem:[%s6361_s3 + $0x270] sm:$0xff] }
 0xa17   : > { %v2535_v60 = vpop.permute.xlu1 %2534  ;;  %v6113_v34 = vpop.permute.xlu0 %2664 }
 0xa18   : > { %v2924_v38 = vmul.f32 %v3910_v22, %v2535_v60  ;;  %v3284_v60 = vadd.f32 %v3283_v10, %v6079_v25  ;;  %v3141_v25 = vsel %vm6421_vm0, %v2939_v52, 0.0 }
 0xa19   : > { %v3142_v62 = vadd.f32 %v3141_v25, %v6111_v26 }
 0xa1b   : > { %v6115_v18 = vpop.permute.xlu1 %2794  ;;  %v2405_v1 = vpop.permute.xlu0 %2404 }
 0xa1c   : > { %v2893_v7 = vmul.f32 %v3900_v42, %v2405_v1  ;;  %v3912_v1 = vld [vmem:[%s6361_s3 + $0x2d8] sm:$0xff]  ;;  %v2986_v11 = vmul.f32 %v3917_v17, %v6115_v18  ;;  %v3919_v18 = vld [vmem:[%s6361_s3 + $0x2e0] sm:$0xff] }
 0xa1e   : > { %v3034_v6 = vsel %vm6502_vm2, %v2893_v7, 0.0  ;;  %v3212_v7 = vadd.f32 %v3211_v55, %v6077_v12  ;;  %v6193_v12 = vadd.f32 %v3248_v53, %v6101_v33  ;;  %vm6513_vm2 = vmmov %vm6421_vm0  ;;  %v3916_v33 = vld [vmem:[%s6361_s3 + $0x260] sm:$0xff] }
 0xa1f   : > { %v2472_v4 = vpop.permute.xlu1 %2471  ;;  %v6117_v41 = vpop.permute.xlu0 %2601  ;;  %v3035_v54 = vadd.f32 %v3034_v6, %v3033_v24  ;;  %v3106_v6 = vsel %vm6512_vm1, %v2924_v38, 0.0  ;;  %v2955_v29 = vmul.f32 %v3916_v33, %v6113_v34  ;;  %v3918_v24 = vld [vmem:[%s6361_s3 + $0x1f0] sm:$0xff]  ;;  %vm6523_vm1 = vmmov %vm6421_vm0 }
 0xa20   : > { %v2909_v0 = vmul.f32 %v3904_v47, %v2472_v4  ;;  %v2970_v4 = vmul.f32 %v3912_v1, %v2728_v39  ;;  %v3105_v39 = vadd.f32 %v3104_v2, %v6089_v31  ;;  %v3285_v47 = vsel %vm6514_vm3, %v3001_v27, 0.0 }
 0xa21   : > { %v3286_v26 = vadd.f32 %v3285_v47, %v3284_v60  ;;  %vm6525_vm3 = vcmask 1041409  }
 0xa22   : > { %v3071_v50 = vsel %vm6506_vm10, %v2909_v0, 0.0  ;;  %v3213_v19 = vsel %vm6513_vm2, %v2970_v4, 0.0  ;;  %v3107_v23 = vadd.f32 %v3106_v6, %v3105_v39  ;;  %vm6517_vm10 = vmmov %vm6421_vm0  ;;  %v3926_v39 = vld [vmem:[%s6361_s3 + $0x2e8] sm:$0xff] }
 0xa23   : > { %v6119_v40 = vpop.permute.xlu1 %2731  ;;  %v6121_v21 = vpop.permute.xlu0 %2861  ;;  %v3072_v5 = vadd.f32 %v3071_v50, %v3070_v37  ;;  %v3920_v50 = vld [vmem:[%s6361_s3 + $0x178] sm:$0xff]  ;;  %vm6524_vm2 = vmmov %vm6421_vm0 }
 0xa24   : > { %v2971_v10 = vmul.f32 %v3919_v18, %v6119_v40 }
 0xa26   : > { %v3215_v1 = vsel %vm6521_vm14, %v2971_v10, 0.0  ;;  %vm6532_vm14 = vmmov %vm6421_vm0 }
 0xa27   : > { %v2539_v51 = vpop.permute.xlu1 %2538  ;;  %v6129_v14 = vpop.permute.xlu0 %2668 }
 0xa28   : > { %v2925_v45 = vmul.f32 %v3914_v58, %v2539_v51  ;;  %v3915_v51 = vld [vmem:[%s6361_s3 + $0x1e8] sm:$0xff]  ;;  %v2956_v37 = vmul.f32 %v3921_v36, %v6129_v14  ;;  %v3922_v14 = vld [vmem:[%s6361_s3 + $0x3d8] sm:$0xff] }
 0xa29   : > { %v2940_v31 = vmul.f32 %v3915_v51, %v6117_v41  ;;  %v3002_v4 = vmul.f32 %v3922_v14, %v6121_v21 }
 0xa2a   : > { %v3108_v41 = vsel %vm6515_vm11, %v2925_v45, 0.0  ;;  %vm6526_vm11 = vmmov %vm6421_vm0 }
 0xa2b   : > { %v6151_v48 = vpop.permute.xlu1 %2798  ;;  %v2409_v56 = vpop.permute.xlu0 %2408  ;;  %v3143_v55 = vsel %vm6516_vm6, %v2940_v31, 0.0  ;;  %v3109_v2 = vadd.f32 %v3108_v41, %v3107_v23  ;;  %v3928_v41 = vld [vmem:[%s6361_s3 + $0x2f0] sm:$0xff]  ;;  %vm6527_vm6 = vmmov %vm6421_vm0 }
 0xa2c   : > { %v2894_v30 = vmul.f32 %v3908_v9, %v2409_v56  ;;  %v3144_v61 = vadd.f32 %v3143_v55, %v3142_v62 }
 0xa2e   : > { %v3036_v16 = vsel %vm6507_vm5, %v2894_v30, 0.0  ;;  %vm6518_vm5 = vmmov %vm6421_vm0 }
 0xa2f   : > { %v3037_v44 = vadd.f32 %v3036_v16, %v3035_v54  ;;  %v2476_v63 = vpop.permute.xlu1 %2475  ;;  %v2606_v59 = vpop.permute.xlu0 %2605  ;;  %v3214_v54 = vadd.f32 %v3213_v19, %v3212_v7 }
 0xa30   : > { %v2910_v13 = vmul.f32 %v3911_v8, %v2476_v63  ;;  %v2941_v56 = vmul.f32 %v3918_v24, %v2606_v59  ;;  %v3178_v63 = vsel %vm6517_vm10, %v2955_v29, 0.0  ;;  %v3250_v59 = vsel %vm6518_vm5, %v2986_v11, 0.0  ;;  %vm6528_vm10 = vmmov %vm6421_vm0 }
 0xa31   : > { %v3038_v42 = vrot.slane %v3037_v44, 4  ;;  %v3251_v33 = vadd.f32 %v3250_v59, %v6193_v12  ;;  %v3287_v29 = vsel %vm6523_vm1, %v3002_v4, 0.0  ;;  %vm6529_vm5 = vmmov %vm6421_vm0  ;;  %v3932_v59 = vld [vmem:[%s6361_s3 + $0x370] sm:$0xff] }
 0xa32   : > { %v3073_v20 = vsel %vm6511_vm15, %v2910_v13, 0.0  ;;  %v3145_v40 = vsel %vm6519_vm12, %v2941_v56, 0.0  ;;  %vm6522_vm15 = vmmov %vm6421_vm0  ;;  %v3216_v56 = vadd.f32 %v3215_v1, %v3214_v54  ;;  %v3288_v10 = vadd.f32 %v3287_v29, %v3286_v26  ;;  %v3930_v54 = vld [vmem:[%s6361_s3 + $0x3e8] sm:$0xff] }
 0xa33   : > { %v3039_v46 = vadd.f32 %v3038_v42, %v3037_v44  ;;  %v3074_v28 = vadd.f32 %v3073_v20, %v3072_v5  ;;  %v2736_v35 = vpop.permute.xlu1 %2735  ;;  %v2866_v57 = vpop.permute.xlu0 %2865  ;;  %v3924_v5 = vld [vmem:[%s6361_s3 + $0x1f8] sm:$0xff]  ;;  %v3180_v7 = vsel %vm6522_vm15, %v2956_v37, 0.0  ;;  %v3146_v58 = vadd.f32 %v3145_v40, %v3144_v61  ;;  %v3925_v20 = vld [vmem:[%s6361_s3 + $0x360] sm:$0xff]  ;;  %vm6530_vm12 = vmmov %vm6421_vm0 }
 0xa34   : > { %v2987_v21 = vmul.f32 %v3925_v20, %v6151_v48  ;;  %v3179_v48 = vadd.f32 %v3178_v63, %v6190_v15  ;;  %vm6533_vm15 = vcmask 1042434   ;;  %vm6534_vm1 = vmmov %vm6421_vm0 }
 0xa35   : > { %v3040_v0 = vrot.slane %v3039_v46, 2  ;;  %v3075_v49 = vrot.slane %v3074_v28, 4 }
 0xa36   : > { %v3181_v62 = vadd.f32 %v3180_v7, %v3179_v48  ;;  %v3252_v23 = vsel %vm6526_vm11, %v2987_v21, 0.0  ;;  %v3936_v48 = vld [vmem:[%s6361_s3 + $0x3f8] sm:$0xff]  ;;  %vm6537_vm11 = vmmov %vm6421_vm0 }
 0xa37   : > { %v3041_v3 = vadd.f32 %v3040_v0, %v3039_v46  ;;  %v3076_v9 = vadd.f32 %v3075_v49, %v3074_v28  ;;  %v2543_v30 = vpop.permute.xlu1 %2542  ;;  %v2673_v34 = vpop.permute.xlu0 %2672  ;;  %v2972_v46 = vmul.f32 %v3926_v39, %v2736_v35  ;;  %v3927_v28 = vld [vmem:[%s6361_s3 + $0x3e0] sm:$0xff]  ;;  %v3253_v40 = vadd.f32 %v3252_v23, %v3251_v33 }
 0xa38   : > { %v2926_v16 = vmul.f32 %v3920_v50, %v2543_v30  ;;  %v2957_v27 = vmul.f32 %v3923_v43, %v2673_v34  ;;  %v3003_v25 = vmul.f32 %v3927_v28, %v2866_v57 }
 0xa39   : > { %v3077_v44 = vrot.slane %v3076_v9, 2  ;;  %v3042_v52 = vrot.slane %v3041_v3, 1  ;;  %v3217_v15 = vsel %vm6527_vm6, %v2972_v46, 0.0  ;;  %vm6538_vm6 = vmmov %vm6421_vm0 }
 0xa3a   : > { %v3110_v53 = vsel %vm6520_vm13, %v2926_v16, 0.0  ;;  %v3182_v35 = vsel %vm6524_vm2, %v2957_v27, 0.0  ;;  %v3289_v12 = vsel %vm6528_vm10, %v3003_v25, 0.0  ;;  %vm6531_vm13 = vmmov %vm6421_vm0  ;;  %v3933_v27 = vld [vmem:[%s6361_s3 + $0x2f8] sm:$0xff] }
 0xa3b   : > { %v3078_v22 = vadd.f32 %v3077_v44, %v3076_v9  ;;  %v3111_v38 = vadd.f32 %v3110_v53, %v3109_v2  ;;  %v2803_v8 = vpop.permute.xlu1 %2802  ;;  %v2610_v13 = vpop.permute.xlu0 %2609  ;;  %v3043_v51 = vadd.f32 %v3042_v52, %v3041_v3  ;;  %v3929_v9 = vld [vmem:[%s6361_s3 + $0x368] sm:$0xff]  ;;  %v3183_v50 = vadd.f32 %v3182_v35, %v3181_v62  ;;  %v3931_v2 = vld [vmem:[%s6361_s3 + $0x278] sm:$0xff]  ;;  %vm6535_vm2 = vmmov %vm6421_vm0 }
 0xa3c   : > { %v2942_v42 = vmul.f32 %v3924_v5, %v2610_v13  ;;  %v2988_v30 = vmul.f32 %v3929_v9, %v2803_v8  ;;  %v3218_v53 = vadd.f32 %v3217_v15, %v3216_v56  ;;  %v3290_v61 = vadd.f32 %v3289_v12, %v3288_v10  ;;  %vm6539_vm10 = vmmov %vm6421_vm0 }
 0xa3d   : > { %v3079_v60 = vrot.slane %v3078_v22, 1  ;;  %v3112_v45 = vrot.slane %v3111_v38, 4 }
 0xa3e   : > { %v3147_v6 = vsel %vm6421_vm0, %v2942_v42, 0.0  ;;  %v3934_v42 = vld [vmem:[%s6361_s3 + $0x3f0] sm:$0xff] }
 0xa3f   : > { %v3080_v31 = vadd.f32 %v3079_v60, %v3078_v22  ;;  %v3113_v19 = vadd.f32 %v3112_v45, %v3111_v38  ;;  %v3148_v47 = vadd.f32 %v3147_v6, %v3146_v58  ;;  %v2740_v0 = vpop.permute.xlu1 %2739  ;;  %v2870_v49 = vpop.permute.xlu0 %2869  ;;  %v3254_v38 = vsel %vm6531_vm13, %v2988_v30, 0.0 }
 0xa40   : > { %v2973_v24 = vmul.f32 %v3928_v41, %v2740_v0  ;;  %v3004_v16 = vmul.f32 %v3930_v54, %v2870_v49  ;;  %v3255_v21 = vadd.f32 %v3254_v38, %v3253_v40  ;;  %v3935_v0 = vld [vmem:[%s6361_s3 + $0x378] sm:$0xff]  ;;  %v3412_v54 = vld [vmem:[%s6368_s10 + $0x8] sm:$0xff] }
 0xa41   : > { %v3311_v17 = vsel %vm6525_vm3, %v3080_v31, %v3043_v51  ;;  %v3114_v11 = vrot.slane %v3113_v19, 2  ;;  %v3149_v57 = vrot.slane %v3148_v47, 4  ;;  %vm6536_vm3 = vcmask 1043459  }
 0xa42   : > { %v3219_v63 = vsel %vm6529_vm5, %v2973_v24, 0.0  ;;  %v3291_v43 = vsel %vm6532_vm14, %v3004_v16, 0.0  ;;  %vm6541_vm5 = vcmask 523264  }
 0xa43   : > { %v3115_v3 = vadd.f32 %v3114_v11, %v3113_v19  ;;  %v3150_v34 = vadd.f32 %v3149_v57, %v3148_v47  ;;  %v2677_v55 = vpop.permute.xlu1 %2676  ;;  %v2807_v18 = vpop.permute.xlu0 %2806  ;;  %v3220_v4 = vadd.f32 %v3219_v63, %v3218_v53  ;;  %v3292_v25 = vadd.f32 %v3291_v43, %v3290_v61  ;;  %v3629_v43 = vld [vmem:[%s6367_s9] ss:$0 sm:$0xff] }
 0xa44   : > { %v2958_v36 = vmul.f32 %v3931_v2, %v2677_v55  ;;  %v2989_v26 = vmul.f32 %v3932_v59, %v2807_v18 }
 0xa45   : > { %v3116_v37 = vrot.slane %v3115_v3, 1  ;;  %v3151_v44 = vrot.slane %v3150_v34, 2 }
 0xa46   : > { %v3184_v52 = vsel %vm6530_vm12, %v2958_v36, 0.0  ;;  %v3256_v20 = vsel %vm6421_vm0, %v2989_v26, 0.0  ;;  %vm6548_vm12 = vcmask (!%p3633_p5), 261120  }
 0xa47   : > { %v3117_v22 = vadd.f32 %v3116_v37, %v3115_v3  ;;  %v3152_v8 = vadd.f32 %v3151_v44, %v3150_v34  ;;  %v3185_v13 = vadd.f32 %v3184_v52, %v3183_v50  ;;  %v2744_v1 = vpop.permute.xlu1 %2743  ;;  %v2874_v14 = vpop.permute.xlu0 %2873  ;;  %v3257_v47 = vadd.f32 %v3256_v20, %v3255_v21  ;;  %v3411_v50 = vld [vmem:[%s6368_s10] sm:$0xff]  ;;  %v6543_v21 = vld [vmem:[#allocation5_spill] sm:$0xff]  ;;  %vm6549_vm13 = vmmov (!%p3633_p5), %vm6548_vm12 }
 0xa48   : > { %v2974_v5 = vmul.f32 %v3933_v27, %v2744_v1  ;;  %v3005_v7 = vmul.f32 %v3934_v42, %v2874_v14  ;;  %v3764_v16 = vpack.c.bf16 %v3412_v54, %v3411_v50  ;;  %v3414_v14 = vld [vmem:[%s6368_s10 + $0x18] sm:$0xff]  ;;  %vm6550_vm14 = vmmov (!%p3633_p5), %vm6548_vm12 }
 0xa49   : > { %v3312_v60 = vsel %vm6533_vm15, %v3117_v22, %v3311_v17  ;;  %v3153_v58 = vrot.slane %v3152_v8, 1  ;;  %v3186_v45 = vrot.slane %v3185_v13, 4  ;;  %vm6551_vm15 = vmmov (!%p3633_p5), %vm6548_vm12 }
 0xa4a   : > { %v3221_v39 = vsel %vm6534_vm1, %v2974_v5, 0.0  ;;  %v3293_v46 = vsel %vm6535_vm2, %v3005_v7, 0.0  ;;  %3765 = vmatpush3.bf16.msra.mxu1 %v3764_v16 }
 0xa4b   : > { %v3154_v28 = vadd.f32 %v3153_v58, %v3152_v8  ;;  %v3187_v6 = vadd.f32 %v3186_v45, %v3185_v13  ;;  %v3222_v51 = vadd.f32 %v3221_v39, %v3220_v4  ;;  %v2811_v31 = vpop.permute.xlu1 %2810  ;;  %v2878_v19 = vpop.permute.xlu0 %2877  ;;  %v3294_v17 = vadd.f32 %v3293_v46, %v3292_v25  ;;  %3766 = vmatprep.subr.bf16.mxu1 %v6486_v32  ;;  %v3413_v32 = vld [vmem:[%s6368_s10 + $0x10] sm:$0xff] }
 0xa4c   : > { %v2990_v49 = vmul.f32 %v3935_v0, %v2811_v31  ;;  %v3006_v33 = vmul.f32 %v3936_v48, %v2878_v19  ;;  %v3767_v4 = vpack.c.bf16 %v3414_v14, %v3413_v32  ;;  %v3510_v48 = vld [vmem:[#allocation2] sm:$0xff] (!%p3633_p5) }
 0xa4d   : > { %v3188_v29 = vrot.slane %v3187_v6, 2  ;;  %v3223_v35 = vrot.slane %v3222_v51, 4  ;;  %v3313_v11 = vsel %vm6536_vm3, %v3154_v28, %v3312_v60  ;;  %v3631_v60 = vld [vmem:[%s6369_s11] ss:$0 sm:$0xff]  ;;  %3512 = vst.msk [vmem:[%s6372_s14] sm:$0xff] (!%p3633_p5), %vm6548_vm12, %v3510_v48 }
 0xa4e   : > { %v3258_v57 = vsel %vm6537_vm11, %v2990_v49, 0.0  ;;  %v3295_v41 = vsel %vm6538_vm6, %v3006_v33, 0.0  ;;  %3768 = vmatpush3.bf16.msra.mxu1 %v3767_v4 }
 0xa4f   : > { %v3189_v24 = vadd.f32 %v3188_v29, %v3187_v6  ;;  %v3224_v56 = vadd.f32 %v3223_v35, %v3222_v51  ;;  %v3259_v62 = vadd.f32 %v3258_v57, %v3257_v47  ;;  %v3296_v23 = vadd.f32 %v3295_v41, %v3294_v17  ;;  %v766_v15 = vpop.permute.xlu1 %765  ;;  %v6545_v51 = vld [vmem:[#allocation4_spill] sm:$0xff] }
 0xa50   : > { %768 = vst.msk [vmem:[#allocation2 + $0x8] sm:$0xff] %vm6539_vm10, %v766_v15 }
 0xa51   : > { %v3190_v12 = vrot.slane %v3189_v24, 1  ;;  %v3225_v3 = vrot.slane %v3224_v56, 2  ;;  %v3260_v9 = vrot.slane %v3259_v62, 4  ;;  %v3297_v30 = vrot.slane %v3296_v23, 4 }
 0xa53   : > { %v3191_v34 = vadd.f32 %v3190_v12, %v3189_v24  ;;  %v3226_v55 = vadd.f32 %v3225_v3, %v3224_v56  ;;  %v3261_v18 = vadd.f32 %v3260_v9, %v3259_v62  ;;  %v3298_v10 = vadd.f32 %v3297_v30, %v3296_v23 }
 0xa55   : > { %v3227_v2 = vrot.slane %v3226_v55, 1  ;;  %v3262_v36 = vrot.slane %v3261_v18, 2  ;;  %v3299_v37 = vrot.slane %v3298_v10, 2  ;;  %v3314_v44 = vsel %vm2323_vm4, %v3191_v34, %v3313_v11  ;;  %vm6540_vm4 = vmmov %vm6421_vm0 }
 0xa57   : > { %v3228_v63 = vadd.f32 %v3227_v2, %v3226_v55  ;;  %v3263_v59 = vadd.f32 %v3262_v36, %v3261_v18  ;;  %v3300_v26 = vadd.f32 %v3299_v37, %v3298_v10  ;;  %v3511_v33 = vld [vmem:[#allocation2 + $0x8] sm:$0xff] (!%p3633_p5) }
 0xa58   : > { %3513 = vst.msk [vmem:[%s6372_s14 + $0x8] sm:$0xff] (!%p3633_p5), %vm6549_vm13, %v3511_v33 }
 0xa59   : > { %v3264_v40 = vrot.slane %v3263_v59, 1  ;;  %v3301_v53 = vrot.slane %v3300_v26, 1  ;;  %v3315_v61 = vsel %vm2325_vm7, %v3228_v63, %v3314_v44  ;;  %vm6542_vm7 = vmmov %vm6421_vm0 }
 0xa5b   : > { %v3265_v52 = vadd.f32 %v3264_v40, %v3263_v59  ;;  %v3302_v22 = vadd.f32 %v3301_v53, %v3300_v26 }
 0xa5d   : > { %v3316_v38 = vsel %vm2327_vm8, %v3265_v52, %v3315_v61  ;;  %vm6544_vm8 = vmmov %vm6421_vm0 }
 0xa5e   : > { %v3317_v8 = vsel %vm2329_vm9, %v3302_v22, %v3316_v38  ;;  %vm6546_vm9 = vmmov %vm6421_vm0 }
 0xa5f   : > { %3318 = vrot.lane.b32.xlu0 %v3317_v8, %s3949_s26 }
 0xad1   : > { %v3319_v13 = vpop.permute.xlu0 %3318 }
 0xad2   : > { %v3321_v1 = vsel %vm6540_vm4, %v766_v15, %v3319_v13 }
 0xad3   : > { %3717 = vmatmul.mubr.msk.f32.vlgmr.msra.gmra.mrb[2].mxu0 %vm6541_vm5, %v3321_v1 }
 0xba6   : > { %v3406_v27 = vpop.f32.mrb[2].mxu0 }
 0xba7   : > { %v3407_v5 = vadd.f32 %v3629_v43, %v3406_v27  ;;  %v3718_v42 = vpop.f32.mrb[3].mxu0 }
 0xba9   : > { %v3410_v7 = vmax.f32 %v3407_v5, 0.0 }
 0xbab   : > { %3728 = vmatmul.mubr.msk.f32.vlgmr.msra.gmra.mrb[2].mxu1 %vm6542_vm7, %v3410_v7 }
 0xc7e   : > { %v3491_v58 = vpop.f32.mrb[2].mxu1 }
 0xc7f   : > { %v3492_v45 = vadd.f32 %v3631_v60, %v3491_v58  ;;  %v3729_v20 = vpop.f32.mrb[3].mxu1 }
 0xc81   : > { %3495 = vmax.xlane.f32.xlu1 %v3492_v45 }
 0xc92   : > { %775 = vrot.lane.b32.xlu1 %v6543_v21, %s3952_s20 }
 0xd0e   : > { %v3496_v39 = vpop.xlane.xlu1 %3495 }
 0xd0f   : > { %v3497_v46 = vsub.f32 %v3492_v45, %v3496_v39 }
 0xd11   : > { %v3498_v28 = vmul.f32 1.442695, %v3497_v46 }
 0xd12   : > { %v776_v25 = vpop.permute.xlu1 %775 }
 0xd13   : > { %3805 = vpow2.f32 %v3498_v28  ;;  %778 = vst.msk [vmem:[#allocation3 + $0x8] sm:$0xff] %vm6544_vm8, %v776_v25 }
 0xd1a   : > { %v3515_v35 = vld [vmem:[#allocation3 + $0x8] sm:$0xff] (!%p3633_p5) }
 0xd1b   : > { %3517 = vst.msk [vmem:[%s6373_s15 + $0x8] sm:$0xff] (!%p3633_p5), %vm6551_vm15, %v3515_v35 }
 0xd1d   : > { %v3806_v6 = vpop.eup %3805 }
 0xd1e   : > { %3500 = vadd.xlane.f32.xlu0 %v3806_v6 }
 0xd34   : > { %770 = vrot.lane.b32.xlu0 %v6545_v51, %s3952_s20 }
 0xdab   : > { %v3501_v31 = vpop.xlane.xlu0 %3500 }
 0xdac   : > { %3807 = vlog2.f32 %v3501_v31 }
 0xdaf   : > { %v771_v19 = vpop.permute.xlu0 %770 }
 0xdb0   : > { %773 = vst.msk [vmem:[#allocation3] sm:$0xff] %vm6546_vm9, %v771_v19 }
 0xdb5   : > { %3509 = sbr.rel (%p3633_p5) target bundleno = 3516 (0xdbc), region = 76 }
 0xdb6   : > { %v3808_v47 = vpop.eup %3807 }
 0xdb7   : > { %v3503_v0 = vmul.f32 0.6931472, %v3808_v47  ;;  %v3514_v29 = vld [vmem:[#allocation3] sm:$0xff] (!%p3633_p5) }
 0xdb8   : > { %3516 = vst.msk [vmem:[%s6373_s15] sm:$0xff] (!%p3633_p5), %vm6550_vm14, %v3514_v29 }
 0xdb9   : > { %v3504_v49 = vsub.f32 %v3497_v46, %v3503_v0 }
 0xdbb   : > { %3505 = vst [vmem:[%s6547_s30] sm:$0xff] %v3504_v49 }
 0xdbc PF: > { %s26_s18 = sadd.s32 1, %s3943_s18  }
 0xdbd   : > { %p23_p6 = scmp.ge.s32.totalorder %s26_s18, 6  }
 0xdbf   :  { %25 = sbr.rel (!%p23_p6) target bundleno = 1 (0x1), region = 136 }

</bundles_post_ra>
